<compile_context>
chip_gen: v7x
topology: tpu7x:2x2x1
jax: 0.10.0
libtpu: 0.0.40
codegen_flags: <defaults>
</compile_context>

<pallas_src>
import functools

import jax
import jax.numpy as jnp
from jax.experimental import pallas as pl
from jax.experimental.pallas import tpu as pltpu


_COUT_PAD = 128  # pad output channels to the lane width -> unmasked stores


# ----------------------------- Pallas kernel -------------------------------- #
def _fused_conv_kernel(*refs, kh, kw, stride, th, wo, act, has_bias):
    """Fused conv: in-kernel patch extraction + kh*kw tap matmuls + epilogue.

    Ref shapes:
      stride == 2 : x_ref (2, 2, 1, Hq, Wq, Cin_p)   (phase-split padded input)
      stride == 1 : x_ref (1, Hp, Wp, Cin_p)          (padded input)
      w_ref (kh*kw, Cin_p, 128)   bf16, tap-major, Cout zero-padded to 128
      b_ref (1,) f32 in SMEM      (only for the biased Cout=1 head)
      o_ref (1, th*wo, 128)
    """
    if has_bias:
        x_ref, w_ref, b_ref, o_ref = refs
    else:
        x_ref, w_ref, o_ref = refs
        b_ref = None

    ht = pl.program_id(1)          # output-row tile index
    m = th * wo
    coutp = o_ref.shape[-1]

    acc = jnp.zeros((m, coutp), jnp.float32)
    for i in range(kh):            # unrolled tap loop == fused im2col reduction
        for j in range(kw):
            if stride == 2:
                # out[ho, wo] tap (i, j) reads phase (i%2, j%2) at (ho+i//2, wo+j//2)
                slab = x_ref[i % 2, j % 2, 0,
                             pl.ds(ht * th + i // 2, th),
                             pl.ds(j // 2, wo), :]
            else:
                # stride 1: out[ho, wo] tap (i, j) reads padded input (ho+i, wo+j)
                slab = x_ref[0, pl.ds(ht * th + i, th), pl.ds(j, wo), :]
            lhs = slab.reshape(m, slab.shape[-1])            # (TH*Wo, Cin_p) bf16
            acc = acc + jnp.dot(lhs, w_ref[i * kw + j],
                                preferred_element_type=jnp.float32)

    if b_ref is not None:
        acc = acc + b_ref[0]                                  # scalar SMEM bias

    if act == "lrelu":
        acc = jnp.where(acc >= 0.0, acc, 0.2 * acc)
    elif act == "sigmoid":
        acc = jax.nn.sigmoid(acc)

    o_ref[0] = acc.astype(o_ref.dtype)                        # lane-dense store


# ------------------------------- JAX glue ----------------------------------- #
def _pick_block_rows(ho, wo, cap_rows=512):
    """Rows-per-grid-step TH: divides Ho, keeps TH*Wo (x128 f32 acc) VMEM-sized."""
    if ho * wo <= cap_rows:
        return ho
    best = ho
    for th in range(1, ho):
        if ho % th == 0 and th * wo <= cap_rows and (th * wo) % 8 == 0:
            best = th
    return best


def conv2d_fused(x_nhwc, w_oihw, bias, *, stride, pad, act, out_dtype):
    """Conv2d (PyTorch OIHW weight) + bias + activation as a fused Pallas kernel."""
    Cout, Cin, kh, kw = w_oihw.shape
    B, H, W, C = x_nhwc.shape
    assert C == Cin
    Ho = (H + 2 * pad - kh) // stride + 1
    Wo = (W + 2 * pad - kw) // stride + 1
    cin_p = ((Cin + 7) // 8) * 8           # pad K (channels) to a sublane multiple
    coutp = _COUT_PAD                      # pad N (Cout) to 128 lanes

    # Weight: (Cout,Cin,kh,kw) -> (kh*kw, Cin_p, 128), tap-major, bf16, zero-padded.
    w_taps = jnp.transpose(w_oihw, (2, 3, 1, 0)).reshape(kh * kw, Cin, Cout)
    w_taps = jnp.pad(w_taps, ((0, 0), (0, cin_p - Cin), (0, coutp - Cout)))
    w_taps = w_taps.astype(jnp.bfloat16)

    # Spatial pad + channel pad (bf16).  This is 1x the input data (no im2col).
    xp = jnp.pad(x_nhwc.astype(jnp.bfloat16),
                 ((0, 0), (pad, pad), (pad, pad), (0, cin_p - Cin)))

    if stride == 2:
        Hp, Wp = H + 2 * pad, W + 2 * pad
        assert Hp % 2 == 0 and Wp % 2 == 0, "phase split needs even padded extents"
        Hq, Wq = Hp // 2, Wp // 2          # == Ho+1, Wo+1 for the 4/2/1 convs
        # space-to-depth phases: xin[ph, pw, b, hq, wq, c] = xp[b, 2hq+ph, 2wq+pw, c]
        xin = xp.reshape(B, Hq, 2, Wq, 2, cin_p).transpose(2, 4, 0, 1, 3, 5)
        in_block = (2, 2, 1, Hq, Wq, cin_p)
        in_map = lambda b, ht: (0, 0, b, 0, 0, 0)
    else:
        assert stride == 1
        xin = xp
        in_block = (1, H + 2 * pad, W + 2 * pad, cin_p)
        in_map = lambda b, ht: (b, 0, 0, 0)

    TH = _pick_block_rows(Ho, Wo)
    n_ht = Ho // TH

    in_specs = [
        pl.BlockSpec(in_block, in_map),                                   # resident per batch
        pl.BlockSpec((kh * kw, cin_p, coutp), lambda b, ht: (0, 0, 0)),   # weights resident
    ]
    args = [xin, w_taps]
    has_bias = bias is not None
    if has_bias:
        # Scalar-bias path via SMEM (sufficient here: only the Cout=1 head has bias).
        assert Cout == 1
        in_specs.append(pl.BlockSpec(memory_space=pltpu.MemorySpace.SMEM))
        args.append(bias.reshape(1).astype(jnp.float32))

    out = pl.pallas_call(
        functools.partial(_fused_conv_kernel, kh=kh, kw=kw, stride=stride,
                          th=TH, wo=Wo, act=act, has_bias=has_bias),
        out_shape=jax.ShapeDtypeStruct((B, Ho * Wo, coutp), out_dtype),
        grid=(B, n_ht),
        in_specs=in_specs,
        out_specs=pl.BlockSpec((1, TH * Wo, coutp), lambda b, ht: (b, ht, 0)),
        compiler_params=pltpu.CompilerParams(
            dimension_semantics=("parallel", "parallel")),
    )(*args)

    # Drop the lane padding, restore (B, Ho, Wo, Cout).
    return out[:, :, :Cout].reshape(B, Ho, Wo, Cout)


def spectral_normalize(w_oihw, n_iter=20):
    """Deterministic spectral norm of a conv weight (PyTorch reshapes to (Cout, -1))."""
    Cout = w_oihw.shape[0]
    w_mat = w_oihw.reshape(Cout, -1).astype(jnp.float32)
    u = jnp.ones((Cout,), jnp.float32) / jnp.sqrt(jnp.float32(Cout))
    v = None
    for _ in range(n_iter):
        v = w_mat.T @ u
        v = v / (jnp.linalg.norm(v) + 1e-12)
        u = w_mat @ v
        u = u / (jnp.linalg.norm(u) + 1e-12)
    sigma = u @ (w_mat @ v)
    return w_oihw / sigma


# ------------------------------ SEG_D_NET ----------------------------------- #
def init_params(key, ndf):
    k1, k2, k3, k4 = jax.random.split(key, 4)
    # encode_image_by_ntimes: conv(3->ndf,4,2,1,bias=False), conv(ndf->2ndf,4,2,1,bias=False)
    w1 = 0.05 * jax.random.normal(k1, (ndf, 3, 4, 4), jnp.float32)
    w2 = 0.05 * jax.random.normal(k2, (2 * ndf, ndf, 4, 4), jnp.float32)
    # final head: conv(2ndf -> 1, 3, padding=1) (nn.Conv2d default bias=True)
    w3 = 0.05 * jax.random.normal(k3, (1, 2 * ndf, 3, 3), jnp.float32)
    b3 = 0.05 * jax.random.normal(k4, (1,), jnp.float32)
    return {
        "w1": spectral_normalize(w1),
        "w2": spectral_normalize(w2),
        "w3": spectral_normalize(w3),
        "b3": b3,
    }


def seg_d_net_forward(params, x_nchw):
    # NCHW (PyTorch) -> NHWC; intermediates stay bf16, final sigmoid output f32.
    x = jnp.transpose(x_nchw, (0, 2, 3, 1))
    x = conv2d_fused(x, params["w1"], None, stride=2, pad=1, act="lrelu",
                     out_dtype=jnp.bfloat16)
    x = conv2d_fused(x, params["w2"], None, stride=2, pad=1, act="lrelu",
                     out_dtype=jnp.bfloat16)
    x = conv2d_fused(x, params["w3"], params["b3"], stride=1, pad=1, act="sigmoid",
                     out_dtype=jnp.float32)
    # Back to NCHW: (B, 1, H/4, W/4)
    return jnp.transpose(x, (0, 3, 1, 2))


# Pure-JAX f32 reference (same params) for a correctness check of the kernels.
def reference_forward(params, x_nchw):
    def conv(x, w_oihw, b, stride, pad, act):
        w = jnp.transpose(w_oihw, (2, 3, 1, 0))  # HWIO
        y = jax.lax.conv_general_dilated(
            x, w, (stride, stride), [(pad, pad), (pad, pad)],
            dimension_numbers=("NHWC", "HWIO", "NHWC"))
        if b is not None:
            y = y + b
        return jnp.where(y >= 0, y, 0.2 * y) if act == "lrelu" else jax.nn.sigmoid(y)

    x = jnp.transpose(x_nchw, (0, 2, 3, 1)).astype(jnp.float32)
    x = conv(x, params["w1"], None, 2, 1, "lrelu")
    x = conv(x, params["w2"], None, 2, 1, "lrelu")
    x = conv(x, params["w3"], params["b3"], 1, 1, "sigmoid")
    return jnp.transpose(x, (0, 3, 1, 2))


if __name__ == "__main__":
    key = jax.random.PRNGKey(0)
    k_param, k_input = jax.random.split(key)

    ndf = 8                      # cfg.GAN.DF_DIM (synthetic, small)
    B, C, H, W = 2, 3, 16, 16    # RGB image input (ngf=0 -> 3 input channels)

    params = init_params(k_param, ndf)
    x = jax.random.normal(k_input, (B, C, H, W), jnp.float32)

    out = jax.jit(seg_d_net_forward)(params, x)
    out = jax.block_until_ready(out)

    assert out.shape == (B, 1, H // 4, W // 4), out.shape
    assert bool(jnp.all((out >= 0.0) & (out <= 1.0)))          # sigmoid range

    ref = jax.block_until_ready(jax.jit(reference_forward)(params, x))
    max_err = float(jnp.max(jnp.abs(out - ref)))
    assert max_err < 5e-2, f"kernel/ref mismatch: {max_err}"   # bf16-tolerant check

    print("KERNEL_OK")
</pallas_src>

<mosaic_0001>
module attributes {stable_mosaic.version = 11 : i64} {
  func.func @_fused_conv_kernel(%arg0: i32, %arg1: i32, %arg2: memref<2x2x1x9x9x8xbf16, #tpu.memory_space<vmem>>, %arg3: memref<16x8x128xbf16, #tpu.memory_space<vmem>>, %arg4: memref<1x64x128xbf16, #tpu.memory_space<vmem>>) attributes {dimension_semantics = [#tpu.dimension_semantics<parallel>, #tpu.dimension_semantics<parallel>], iteration_bounds = array<i64: 2, 1>, scalar_prefetch = 0 : i64, scratch_operands = 0 : i64, tpu.core_type = #tpu.core_type<tc>, window_params = [{transform_indices = @transform_0, window_bounds = array<i64: 2, 2, 1, 9, 9, 8>}, {pipeline_mode = #tpu.pipeline_mode<synchronous>, transform_indices = @transform_1, window_bounds = array<i64: 16, 8, 128>}, {transform_indices = @transform_2, window_bounds = array<i64: 1, 64, 128>}]} {
    %cst = arith.constant 0.000000e+00 : f32
    %0 = vector.broadcast %cst : f32 to vector<64x128xf32>
    %c8_i32 = arith.constant 8 : i32
    %1 = arith.muli %arg1, %c8_i32 : i32
    %c0_i32 = arith.constant 0 : i32
    %2 = arith.addi %1, %c0_i32 : i32
    %c0 = arith.constant 0 : index
    %c0_0 = arith.constant 0 : index
    %c0_1 = arith.constant 0 : index
    %3 = arith.index_cast %2 : i32 to index
    %c0_2 = arith.constant 0 : index
    %c0_3 = arith.constant 0 : index
    %4 = vector.load %arg2[%c0, %c0_0, %c0_1, %3, %c0_2, %c0_3] : memref<2x2x1x9x9x8xbf16, #tpu.memory_space<vmem>>, vector<1x1x1x8x8x8xbf16>
    %5 = vector.shape_cast %4 : vector<1x1x1x8x8x8xbf16> to vector<8x8x8xbf16>
    %6 = vector.shape_cast %5 : vector<8x8x8xbf16> to vector<64x8xbf16>
    %c0_4 = arith.constant 0 : index
    %c0_5 = arith.constant 0 : index
    %c0_6 = arith.constant 0 : index
    %7 = vector.load %arg3[%c0_4, %c0_5, %c0_6] : memref<16x8x128xbf16, #tpu.memory_space<vmem>>, vector<1x8x128xbf16>
    %8 = vector.shape_cast %7 : vector<1x8x128xbf16> to vector<8x128xbf16>
    %cst_7 = arith.constant dense<0.000000e+00> : vector<64x128xf32>
    %9 = tpu.matmul %6, %8, %cst_7 {dimension_numbers = #tpu.dot_dimension_numbers<[1], [0], [0], [1], [0, 0, 1, 1], [], []>} : vector<64x8xbf16>, vector<8x128xbf16>, vector<64x128xf32> -> vector<64x128xf32>
    %10 = arith.addf %0, %9 : vector<64x128xf32>
    %c8_i32_8 = arith.constant 8 : i32
    %11 = arith.muli %arg1, %c8_i32_8 : i32
    %c0_i32_9 = arith.constant 0 : i32
    %12 = arith.addi %11, %c0_i32_9 : i32
    %c0_10 = arith.constant 0 : index
    %c1 = arith.constant 1 : index
    %c0_11 = arith.constant 0 : index
    %13 = arith.index_cast %12 : i32 to index
    %c0_12 = arith.constant 0 : index
    %c0_13 = arith.constant 0 : index
    %14 = vector.load %arg2[%c0_10, %c1, %c0_11, %13, %c0_12, %c0_13] : memref<2x2x1x9x9x8xbf16, #tpu.memory_space<vmem>>, vector<1x1x1x8x8x8xbf16>
    %15 = vector.shape_cast %14 : vector<1x1x1x8x8x8xbf16> to vector<8x8x8xbf16>
    %16 = vector.shape_cast %15 : vector<8x8x8xbf16> to vector<64x8xbf16>
    %c1_14 = arith.constant 1 : index
    %c0_15 = arith.constant 0 : index
    %c0_16 = arith.constant 0 : index
    %17 = vector.load %arg3[%c1_14, %c0_15, %c0_16] : memref<16x8x128xbf16, #tpu.memory_space<vmem>>, vector<1x8x128xbf16>
    %18 = vector.shape_cast %17 : vector<1x8x128xbf16> to vector<8x128xbf16>
    %cst_17 = arith.constant dense<0.000000e+00> : vector<64x128xf32>
    %19 = tpu.matmul %16, %18, %cst_17 {dimension_numbers = #tpu.dot_dimension_numbers<[1], [0], [0], [1], [0, 0, 1, 1], [], []>} : vector<64x8xbf16>, vector<8x128xbf16>, vector<64x128xf32> -> vector<64x128xf32>
    %20 = arith.addf %10, %19 : vector<64x128xf32>
    %c8_i32_18 = arith.constant 8 : i32
    %21 = arith.muli %arg1, %c8_i32_18 : i32
    %c0_i32_19 = arith.constant 0 : i32
    %22 = arith.addi %21, %c0_i32_19 : i32
    %c0_20 = arith.constant 0 : index
    %c0_21 = arith.constant 0 : index
    %c0_22 = arith.constant 0 : index
    %23 = arith.index_cast %22 : i32 to index
    %c1_23 = arith.constant 1 : index
    %c0_24 = arith.constant 0 : index
    %24 = vector.load %arg2[%c0_20, %c0_21, %c0_22, %23, %c1_23, %c0_24] : memref<2x2x1x9x9x8xbf16, #tpu.memory_space<vmem>>, vector<1x1x1x8x8x8xbf16>
    %25 = vector.shape_cast %24 : vector<1x1x1x8x8x8xbf16> to vector<8x8x8xbf16>
    %26 = vector.shape_cast %25 : vector<8x8x8xbf16> to vector<64x8xbf16>
    %c2 = arith.constant 2 : index
    %c0_25 = arith.constant 0 : index
    %c0_26 = arith.constant 0 : index
    %27 = vector.load %arg3[%c2, %c0_25, %c0_26] : memref<16x8x128xbf16, #tpu.memory_space<vmem>>, vector<1x8x128xbf16>
    %28 = vector.shape_cast %27 : vector<1x8x128xbf16> to vector<8x128xbf16>
    %cst_27 = arith.constant dense<0.000000e+00> : vector<64x128xf32>
    %29 = tpu.matmul %26, %28, %cst_27 {dimension_numbers = #tpu.dot_dimension_numbers<[1], [0], [0], [1], [0, 0, 1, 1], [], []>} : vector<64x8xbf16>, vector<8x128xbf16>, vector<64x128xf32> -> vector<64x128xf32>
    %30 = arith.addf %20, %29 : vector<64x128xf32>
    %c8_i32_28 = arith.constant 8 : i32
    %31 = arith.muli %arg1, %c8_i32_28 : i32
    %c0_i32_29 = arith.constant 0 : i32
    %32 = arith.addi %31, %c0_i32_29 : i32
    %c0_30 = arith.constant 0 : index
    %c1_31 = arith.constant 1 : index
    %c0_32 = arith.constant 0 : index
    %33 = arith.index_cast %32 : i32 to index
    %c1_33 = arith.constant 1 : index
    %c0_34 = arith.constant 0 : index
    %34 = vector.load %arg2[%c0_30, %c1_31, %c0_32, %33, %c1_33, %c0_34] : memref<2x2x1x9x9x8xbf16, #tpu.memory_space<vmem>>, vector<1x1x1x8x8x8xbf16>
    %35 = vector.shape_cast %34 : vector<1x1x1x8x8x8xbf16> to vector<8x8x8xbf16>
    %36 = vector.shape_cast %35 : vector<8x8x8xbf16> to vector<64x8xbf16>
    %c3 = arith.constant 3 : index
    %c0_35 = arith.constant 0 : index
    %c0_36 = arith.constant 0 : index
    %37 = vector.load %arg3[%c3, %c0_35, %c0_36] : memref<16x8x128xbf16, #tpu.memory_space<vmem>>, vector<1x8x128xbf16>
    %38 = vector.shape_cast %37 : vector<1x8x128xbf16> to vector<8x128xbf16>
    %cst_37 = arith.constant dense<0.000000e+00> : vector<64x128xf32>
    %39 = tpu.matmul %36, %38, %cst_37 {dimension_numbers = #tpu.dot_dimension_numbers<[1], [0], [0], [1], [0, 0, 1, 1], [], []>} : vector<64x8xbf16>, vector<8x128xbf16>, vector<64x128xf32> -> vector<64x128xf32>
    %40 = arith.addf %30, %39 : vector<64x128xf32>
    %c8_i32_38 = arith.constant 8 : i32
    %41 = arith.muli %arg1, %c8_i32_38 : i32
    %c0_i32_39 = arith.constant 0 : i32
    %42 = arith.addi %41, %c0_i32_39 : i32
    %c1_40 = arith.constant 1 : index
    %c0_41 = arith.constant 0 : index
    %c0_42 = arith.constant 0 : index
    %43 = arith.index_cast %42 : i32 to index
    %c0_43 = arith.constant 0 : index
    %c0_44 = arith.constant 0 : index
    %44 = vector.load %arg2[%c1_40, %c0_41, %c0_42, %43, %c0_43, %c0_44] : memref<2x2x1x9x9x8xbf16, #tpu.memory_space<vmem>>, vector<1x1x1x8x8x8xbf16>
    %45 = vector.shape_cast %44 : vector<1x1x1x8x8x8xbf16> to vector<8x8x8xbf16>
    %46 = vector.shape_cast %45 : vector<8x8x8xbf16> to vector<64x8xbf16>
    %c4 = arith.constant 4 : index
    %c0_45 = arith.constant 0 : index
    %c0_46 = arith.constant 0 : index
    %47 = vector.load %arg3[%c4, %c0_45, %c0_46] : memref<16x8x128xbf16, #tpu.memory_space<vmem>>, vector<1x8x128xbf16>
    %48 = vector.shape_cast %47 : vector<1x8x128xbf16> to vector<8x128xbf16>
    %cst_47 = arith.constant dense<0.000000e+00> : vector<64x128xf32>
    %49 = tpu.matmul %46, %48, %cst_47 {dimension_numbers = #tpu.dot_dimension_numbers<[1], [0], [0], [1], [0, 0, 1, 1], [], []>} : vector<64x8xbf16>, vector<8x128xbf16>, vector<64x128xf32> -> vector<64x128xf32>
    %50 = arith.addf %40, %49 : vector<64x128xf32>
    %c8_i32_48 = arith.constant 8 : i32
    %51 = arith.muli %arg1, %c8_i32_48 : i32
    %c0_i32_49 = arith.constant 0 : i32
    %52 = arith.addi %51, %c0_i32_49 : i32
    %c1_50 = arith.constant 1 : index
    %c1_51 = arith.constant 1 : index
    %c0_52 = arith.constant 0 : index
    %53 = arith.index_cast %52 : i32 to index
    %c0_53 = arith.constant 0 : index
    %c0_54 = arith.constant 0 : index
    %54 = vector.load %arg2[%c1_50, %c1_51, %c0_52, %53, %c0_53, %c0_54] : memref<2x2x1x9x9x8xbf16, #tpu.memory_space<vmem>>, vector<1x1x1x8x8x8xbf16>
    %55 = vector.shape_cast %54 : vector<1x1x1x8x8x8xbf16> to vector<8x8x8xbf16>
    %56 = vector.shape_cast %55 : vector<8x8x8xbf16> to vector<64x8xbf16>
    %c5 = arith.constant 5 : index
    %c0_55 = arith.constant 0 : index
    %c0_56 = arith.constant 0 : index
    %57 = vector.load %arg3[%c5, %c0_55, %c0_56] : memref<16x8x128xbf16, #tpu.memory_space<vmem>>, vector<1x8x128xbf16>
    %58 = vector.shape_cast %57 : vector<1x8x128xbf16> to vector<8x128xbf16>
    %cst_57 = arith.constant dense<0.000000e+00> : vector<64x128xf32>
    %59 = tpu.matmul %56, %58, %cst_57 {dimension_numbers = #tpu.dot_dimension_numbers<[1], [0], [0], [1], [0, 0, 1, 1], [], []>} : vector<64x8xbf16>, vector<8x128xbf16>, vector<64x128xf32> -> vector<64x128xf32>
    %60 = arith.addf %50, %59 : vector<64x128xf32>
    %c8_i32_58 = arith.constant 8 : i32
    %61 = arith.muli %arg1, %c8_i32_58 : i32
    %c0_i32_59 = arith.constant 0 : i32
    %62 = arith.addi %61, %c0_i32_59 : i32
    %c1_60 = arith.constant 1 : index
    %c0_61 = arith.constant 0 : index
    %c0_62 = arith.constant 0 : index
    %63 = arith.index_cast %62 : i32 to index
    %c1_63 = arith.constant 1 : index
    %c0_64 = arith.constant 0 : index
    %64 = vector.load %arg2[%c1_60, %c0_61, %c0_62, %63, %c1_63, %c0_64] : memref<2x2x1x9x9x8xbf16, #tpu.memory_space<vmem>>, vector<1x1x1x8x8x8xbf16>
    %65 = vector.shape_cast %64 : vector<1x1x1x8x8x8xbf16> to vector<8x8x8xbf16>
    %66 = vector.shape_cast %65 : vector<8x8x8xbf16> to vector<64x8xbf16>
    %c6 = arith.constant 6 : index
    %c0_65 = arith.constant 0 : index
    %c0_66 = arith.constant 0 : index
    %67 = vector.load %arg3[%c6, %c0_65, %c0_66] : memref<16x8x128xbf16, #tpu.memory_space<vmem>>, vector<1x8x128xbf16>
    %68 = vector.shape_cast %67 : vector<1x8x128xbf16> to vector<8x128xbf16>
    %cst_67 = arith.constant dense<0.000000e+00> : vector<64x128xf32>
    %69 = tpu.matmul %66, %68, %cst_67 {dimension_numbers = #tpu.dot_dimension_numbers<[1], [0], [0], [1], [0, 0, 1, 1], [], []>} : vector<64x8xbf16>, vector<8x128xbf16>, vector<64x128xf32> -> vector<64x128xf32>
    %70 = arith.addf %60, %69 : vector<64x128xf32>
    %c8_i32_68 = arith.constant 8 : i32
    %71 = arith.muli %arg1, %c8_i32_68 : i32
    %c0_i32_69 = arith.constant 0 : i32
    %72 = arith.addi %71, %c0_i32_69 : i32
    %c1_70 = arith.constant 1 : index
    %c1_71 = arith.constant 1 : index
    %c0_72 = arith.constant 0 : index
    %73 = arith.index_cast %72 : i32 to index
    %c1_73 = arith.constant 1 : index
    %c0_74 = arith.constant 0 : index
    %74 = vector.load %arg2[%c1_70, %c1_71, %c0_72, %73, %c1_73, %c0_74] : memref<2x2x1x9x9x8xbf16, #tpu.memory_space<vmem>>, vector<1x1x1x8x8x8xbf16>
    %75 = vector.shape_cast %74 : vector<1x1x1x8x8x8xbf16> to vector<8x8x8xbf16>
    %76 = vector.shape_cast %75 : vector<8x8x8xbf16> to vector<64x8xbf16>
    %c7 = arith.constant 7 : index
    %c0_75 = arith.constant 0 : index
    %c0_76 = arith.constant 0 : index
    %77 = vector.load %arg3[%c7, %c0_75, %c0_76] : memref<16x8x128xbf16, #tpu.memory_space<vmem>>, vector<1x8x128xbf16>
    %78 = vector.shape_cast %77 : vector<1x8x128xbf16> to vector<8x128xbf16>
    %cst_77 = arith.constant dense<0.000000e+00> : vector<64x128xf32>
    %79 = tpu.matmul %76, %78, %cst_77 {dimension_numbers = #tpu.dot_dimension_numbers<[1], [0], [0], [1], [0, 0, 1, 1], [], []>} : vector<64x8xbf16>, vector<8x128xbf16>, vector<64x128xf32> -> vector<64x128xf32>
    %80 = arith.addf %70, %79 : vector<64x128xf32>
    %c8_i32_78 = arith.constant 8 : i32
    %81 = arith.muli %arg1, %c8_i32_78 : i32
    %c1_i32 = arith.constant 1 : i32
    %82 = arith.addi %81, %c1_i32 : i32
    %c0_79 = arith.constant 0 : index
    %c0_80 = arith.constant 0 : index
    %c0_81 = arith.constant 0 : index
    %83 = arith.index_cast %82 : i32 to index
    %c0_82 = arith.constant 0 : index
    %c0_83 = arith.constant 0 : index
    %84 = vector.load %arg2[%c0_79, %c0_80, %c0_81, %83, %c0_82, %c0_83] : memref<2x2x1x9x9x8xbf16, #tpu.memory_space<vmem>>, vector<1x1x1x8x8x8xbf16>
    %85 = vector.shape_cast %84 : vector<1x1x1x8x8x8xbf16> to vector<8x8x8xbf16>
    %86 = vector.shape_cast %85 : vector<8x8x8xbf16> to vector<64x8xbf16>
    %c8 = arith.constant 8 : index
    %c0_84 = arith.constant 0 : index
    %c0_85 = arith.constant 0 : index
    %87 = vector.load %arg3[%c8, %c0_84, %c0_85] : memref<16x8x128xbf16, #tpu.memory_space<vmem>>, vector<1x8x128xbf16>
    %88 = vector.shape_cast %87 : vector<1x8x128xbf16> to vector<8x128xbf16>
    %cst_86 = arith.constant dense<0.000000e+00> : vector<64x128xf32>
    %89 = tpu.matmul %86, %88, %cst_86 {dimension_numbers = #tpu.dot_dimension_numbers<[1], [0], [0], [1], [0, 0, 1, 1], [], []>} : vector<64x8xbf16>, vector<8x128xbf16>, vector<64x128xf32> -> vector<64x128xf32>
    %90 = arith.addf %80, %89 : vector<64x128xf32>
    %c8_i32_87 = arith.constant 8 : i32
    %91 = arith.muli %arg1, %c8_i32_87 : i32
    %c1_i32_88 = arith.constant 1 : i32
    %92 = arith.addi %91, %c1_i32_88 : i32
    %c0_89 = arith.constant 0 : index
    %c1_90 = arith.constant 1 : index
    %c0_91 = arith.constant 0 : index
    %93 = arith.index_cast %92 : i32 to index
    %c0_92 = arith.constant 0 : index
    %c0_93 = arith.constant 0 : index
    %94 = vector.load %arg2[%c0_89, %c1_90, %c0_91, %93, %c0_92, %c0_93] : memref<2x2x1x9x9x8xbf16, #tpu.memory_space<vmem>>, vector<1x1x1x8x8x8xbf16>
    %95 = vector.shape_cast %94 : vector<1x1x1x8x8x8xbf16> to vector<8x8x8xbf16>
    %96 = vector.shape_cast %95 : vector<8x8x8xbf16> to vector<64x8xbf16>
    %c9 = arith.constant 9 : index
    %c0_94 = arith.constant 0 : index
    %c0_95 = arith.constant 0 : index
    %97 = vector.load %arg3[%c9, %c0_94, %c0_95] : memref<16x8x128xbf16, #tpu.memory_space<vmem>>, vector<1x8x128xbf16>
    %98 = vector.shape_cast %97 : vector<1x8x128xbf16> to vector<8x128xbf16>
    %cst_96 = arith.constant dense<0.000000e+00> : vector<64x128xf32>
    %99 = tpu.matmul %96, %98, %cst_96 {dimension_numbers = #tpu.dot_dimension_numbers<[1], [0], [0], [1], [0, 0, 1, 1], [], []>} : vector<64x8xbf16>, vector<8x128xbf16>, vector<64x128xf32> -> vector<64x128xf32>
    %100 = arith.addf %90, %99 : vector<64x128xf32>
    %c8_i32_97 = arith.constant 8 : i32
    %101 = arith.muli %arg1, %c8_i32_97 : i32
    %c1_i32_98 = arith.constant 1 : i32
    %102 = arith.addi %101, %c1_i32_98 : i32
    %c0_99 = arith.constant 0 : index
    %c0_100 = arith.constant 0 : index
    %c0_101 = arith.constant 0 : index
    %103 = arith.index_cast %102 : i32 to index
    %c1_102 = arith.constant 1 : index
    %c0_103 = arith.constant 0 : index
    %104 = vector.load %arg2[%c0_99, %c0_100, %c0_101, %103, %c1_102, %c0_103] : memref<2x2x1x9x9x8xbf16, #tpu.memory_space<vmem>>, vector<1x1x1x8x8x8xbf16>
    %105 = vector.shape_cast %104 : vector<1x1x1x8x8x8xbf16> to vector<8x8x8xbf16>
    %106 = vector.shape_cast %105 : vector<8x8x8xbf16> to vector<64x8xbf16>
    %c10 = arith.constant 10 : index
    %c0_104 = arith.constant 0 : index
    %c0_105 = arith.constant 0 : index
    %107 = vector.load %arg3[%c10, %c0_104, %c0_105] : memref<16x8x128xbf16, #tpu.memory_space<vmem>>, vector<1x8x128xbf16>
    %108 = vector.shape_cast %107 : vector<1x8x128xbf16> to vector<8x128xbf16>
    %cst_106 = arith.constant dense<0.000000e+00> : vector<64x128xf32>
    %109 = tpu.matmul %106, %108, %cst_106 {dimension_numbers = #tpu.dot_dimension_numbers<[1], [0], [0], [1], [0, 0, 1, 1], [], []>} : vector<64x8xbf16>, vector<8x128xbf16>, vector<64x128xf32> -> vector<64x128xf32>
    %110 = arith.addf %100, %109 : vector<64x128xf32>
    %c8_i32_107 = arith.constant 8 : i32
    %111 = arith.muli %arg1, %c8_i32_107 : i32
    %c1_i32_108 = arith.constant 1 : i32
    %112 = arith.addi %111, %c1_i32_108 : i32
    %c0_109 = arith.constant 0 : index
    %c1_110 = arith.constant 1 : index
    %c0_111 = arith.constant 0 : index
    %113 = arith.index_cast %112 : i32 to index
    %c1_112 = arith.constant 1 : index
    %c0_113 = arith.constant 0 : index
    %114 = vector.load %arg2[%c0_109, %c1_110, %c0_111, %113, %c1_112, %c0_113] : memref<2x2x1x9x9x8xbf16, #tpu.memory_space<vmem>>, vector<1x1x1x8x8x8xbf16>
    %115 = vector.shape_cast %114 : vector<1x1x1x8x8x8xbf16> to vector<8x8x8xbf16>
    %116 = vector.shape_cast %115 : vector<8x8x8xbf16> to vector<64x8xbf16>
    %c11 = arith.constant 11 : index
    %c0_114 = arith.constant 0 : index
    %c0_115 = arith.constant 0 : index
    %117 = vector.load %arg3[%c11, %c0_114, %c0_115] : memref<16x8x128xbf16, #tpu.memory_space<vmem>>, vector<1x8x128xbf16>
    %118 = vector.shape_cast %117 : vector<1x8x128xbf16> to vector<8x128xbf16>
    %cst_116 = arith.constant dense<0.000000e+00> : vector<64x128xf32>
    %119 = tpu.matmul %116, %118, %cst_116 {dimension_numbers = #tpu.dot_dimension_numbers<[1], [0], [0], [1], [0, 0, 1, 1], [], []>} : vector<64x8xbf16>, vector<8x128xbf16>, vector<64x128xf32> -> vector<64x128xf32>
    %120 = arith.addf %110, %119 : vector<64x128xf32>
    %c8_i32_117 = arith.constant 8 : i32
    %121 = arith.muli %arg1, %c8_i32_117 : i32
    %c1_i32_118 = arith.constant 1 : i32
    %122 = arith.addi %121, %c1_i32_118 : i32
    %c1_119 = arith.constant 1 : index
    %c0_120 = arith.constant 0 : index
    %c0_121 = arith.constant 0 : index
    %123 = arith.index_cast %122 : i32 to index
    %c0_122 = arith.constant 0 : index
    %c0_123 = arith.constant 0 : index
    %124 = vector.load %arg2[%c1_119, %c0_120, %c0_121, %123, %c0_122, %c0_123] : memref<2x2x1x9x9x8xbf16, #tpu.memory_space<vmem>>, vector<1x1x1x8x8x8xbf16>
    %125 = vector.shape_cast %124 : vector<1x1x1x8x8x8xbf16> to vector<8x8x8xbf16>
    %126 = vector.shape_cast %125 : vector<8x8x8xbf16> to vector<64x8xbf16>
    %c12 = arith.constant 12 : index
    %c0_124 = arith.constant 0 : index
    %c0_125 = arith.constant 0 : index
    %127 = vector.load %arg3[%c12, %c0_124, %c0_125] : memref<16x8x128xbf16, #tpu.memory_space<vmem>>, vector<1x8x128xbf16>
    %128 = vector.shape_cast %127 : vector<1x8x128xbf16> to vector<8x128xbf16>
    %cst_126 = arith.constant dense<0.000000e+00> : vector<64x128xf32>
    %129 = tpu.matmul %126, %128, %cst_126 {dimension_numbers = #tpu.dot_dimension_numbers<[1], [0], [0], [1], [0, 0, 1, 1], [], []>} : vector<64x8xbf16>, vector<8x128xbf16>, vector<64x128xf32> -> vector<64x128xf32>
    %130 = arith.addf %120, %129 : vector<64x128xf32>
    %c8_i32_127 = arith.constant 8 : i32
    %131 = arith.muli %arg1, %c8_i32_127 : i32
    %c1_i32_128 = arith.constant 1 : i32
    %132 = arith.addi %131, %c1_i32_128 : i32
    %c1_129 = arith.constant 1 : index
    %c1_130 = arith.constant 1 : index
    %c0_131 = arith.constant 0 : index
    %133 = arith.index_cast %132 : i32 to index
    %c0_132 = arith.constant 0 : index
    %c0_133 = arith.constant 0 : index
    %134 = vector.load %arg2[%c1_129, %c1_130, %c0_131, %133, %c0_132, %c0_133] : memref<2x2x1x9x9x8xbf16, #tpu.memory_space<vmem>>, vector<1x1x1x8x8x8xbf16>
    %135 = vector.shape_cast %134 : vector<1x1x1x8x8x8xbf16> to vector<8x8x8xbf16>
    %136 = vector.shape_cast %135 : vector<8x8x8xbf16> to vector<64x8xbf16>
    %c13 = arith.constant 13 : index
    %c0_134 = arith.constant 0 : index
    %c0_135 = arith.constant 0 : index
    %137 = vector.load %arg3[%c13, %c0_134, %c0_135] : memref<16x8x128xbf16, #tpu.memory_space<vmem>>, vector<1x8x128xbf16>
    %138 = vector.shape_cast %137 : vector<1x8x128xbf16> to vector<8x128xbf16>
    %cst_136 = arith.constant dense<0.000000e+00> : vector<64x128xf32>
    %139 = tpu.matmul %136, %138, %cst_136 {dimension_numbers = #tpu.dot_dimension_numbers<[1], [0], [0], [1], [0, 0, 1, 1], [], []>} : vector<64x8xbf16>, vector<8x128xbf16>, vector<64x128xf32> -> vector<64x128xf32>
    %140 = arith.addf %130, %139 : vector<64x128xf32>
    %c8_i32_137 = arith.constant 8 : i32
    %141 = arith.muli %arg1, %c8_i32_137 : i32
    %c1_i32_138 = arith.constant 1 : i32
    %142 = arith.addi %141, %c1_i32_138 : i32
    %c1_139 = arith.constant 1 : index
    %c0_140 = arith.constant 0 : index
    %c0_141 = arith.constant 0 : index
    %143 = arith.index_cast %142 : i32 to index
    %c1_142 = arith.constant 1 : index
    %c0_143 = arith.constant 0 : index
    %144 = vector.load %arg2[%c1_139, %c0_140, %c0_141, %143, %c1_142, %c0_143] : memref<2x2x1x9x9x8xbf16, #tpu.memory_space<vmem>>, vector<1x1x1x8x8x8xbf16>
    %145 = vector.shape_cast %144 : vector<1x1x1x8x8x8xbf16> to vector<8x8x8xbf16>
    %146 = vector.shape_cast %145 : vector<8x8x8xbf16> to vector<64x8xbf16>
    %c14 = arith.constant 14 : index
    %c0_144 = arith.constant 0 : index
    %c0_145 = arith.constant 0 : index
    %147 = vector.load %arg3[%c14, %c0_144, %c0_145] : memref<16x8x128xbf16, #tpu.memory_space<vmem>>, vector<1x8x128xbf16>
    %148 = vector.shape_cast %147 : vector<1x8x128xbf16> to vector<8x128xbf16>
    %cst_146 = arith.constant dense<0.000000e+00> : vector<64x128xf32>
    %149 = tpu.matmul %146, %148, %cst_146 {dimension_numbers = #tpu.dot_dimension_numbers<[1], [0], [0], [1], [0, 0, 1, 1], [], []>} : vector<64x8xbf16>, vector<8x128xbf16>, vector<64x128xf32> -> vector<64x128xf32>
    %150 = arith.addf %140, %149 : vector<64x128xf32>
    %c8_i32_147 = arith.constant 8 : i32
    %151 = arith.muli %arg1, %c8_i32_147 : i32
    %c1_i32_148 = arith.constant 1 : i32
    %152 = arith.addi %151, %c1_i32_148 : i32
    %c1_149 = arith.constant 1 : index
    %c1_150 = arith.constant 1 : index
    %c0_151 = arith.constant 0 : index
    %153 = arith.index_cast %152 : i32 to index
    %c1_152 = arith.constant 1 : index
    %c0_153 = arith.constant 0 : index
    %154 = vector.load %arg2[%c1_149, %c1_150, %c0_151, %153, %c1_152, %c0_153] : memref<2x2x1x9x9x8xbf16, #tpu.memory_space<vmem>>, vector<1x1x1x8x8x8xbf16>
    %155 = vector.shape_cast %154 : vector<1x1x1x8x8x8xbf16> to vector<8x8x8xbf16>
    %156 = vector.shape_cast %155 : vector<8x8x8xbf16> to vector<64x8xbf16>
    %c15 = arith.constant 15 : index
    %c0_154 = arith.constant 0 : index
    %c0_155 = arith.constant 0 : index
    %157 = vector.load %arg3[%c15, %c0_154, %c0_155] : memref<16x8x128xbf16, #tpu.memory_space<vmem>>, vector<1x8x128xbf16>
    %158 = vector.shape_cast %157 : vector<1x8x128xbf16> to vector<8x128xbf16>
    %cst_156 = arith.constant dense<0.000000e+00> : vector<64x128xf32>
    %159 = tpu.matmul %156, %158, %cst_156 {dimension_numbers = #tpu.dot_dimension_numbers<[1], [0], [0], [1], [0, 0, 1, 1], [], []>} : vector<64x8xbf16>, vector<8x128xbf16>, vector<64x128xf32> -> vector<64x128xf32>
    %160 = arith.addf %150, %159 : vector<64x128xf32>
    %cst_157 = arith.constant 0.000000e+00 : f32
    %161 = vector.broadcast %cst_157 : f32 to vector<64x128xf32>
    %162 = arith.cmpf oge, %160, %161 : vector<64x128xf32>
    %cst_158 = arith.constant 2.000000e-01 : f32
    %163 = vector.broadcast %cst_158 : f32 to vector<64x128xf32>
    %164 = arith.mulf %163, %160 : vector<64x128xf32>
    %165 = arith.select %162, %160, %164 : vector<64x128xi1>, vector<64x128xf32>
    %166 = arith.truncf %165 : vector<64x128xf32> to vector<64x128xbf16>
    %c0_159 = arith.constant 0 : index
    %c0_160 = arith.constant 0 : index
    %c0_161 = arith.constant 0 : index
    %167 = vector.load %arg4[%c0_159, %c0_160, %c0_161] : memref<1x64x128xbf16, #tpu.memory_space<vmem>>, vector<1x64x128xbf16>
    %168 = vector.shape_cast %167 : vector<1x64x128xbf16> to vector<64x128xbf16>
    %169 = vector.shape_cast %166 : vector<64x128xbf16> to vector<1x64x128xbf16>
    tpu.vector_store %arg4[%c0_159, %c0_160, %c0_161], %169 {strides = array<i32>} : memref<1x64x128xbf16, #tpu.memory_space<vmem>>, vector<1x64x128xbf16>,
    return
  }
  func.func @transform_0(%arg0: i32, %arg1: i32) -> (i32, i32, i32, i32, i32, i32) {
    %c0_i32 = arith.constant 0 : i32
    %c0_i32_0 = arith.constant 0 : i32
    %c0_i32_1 = arith.constant 0 : i32
    %c0_i32_2 = arith.constant 0 : i32
    %c0_i32_3 = arith.constant 0 : i32
    %c0_i32_4 = arith.constant 0 : i32
    return %c0_i32, %c0_i32_0, %arg0, %c0_i32_1, %c0_i32_2, %c0_i32_3 : i32, i32, i32, i32, i32, i32
  }
  func.func @transform_1(%arg0: i32, %arg1: i32) -> (i32, i32, i32) {
    %c0_i32 = arith.constant 0 : i32
    %c0_i32_0 = arith.constant 0 : i32
    %c0_i32_1 = arith.constant 0 : i32
    %c0_i32_2 = arith.constant 0 : i32
    return %c0_i32, %c0_i32_0, %c0_i32_1 : i32, i32, i32
  }
  func.func @transform_2(%arg0: i32, %arg1: i32) -> (i32, i32, i32) {
    %c0_i32 = arith.constant 0 : i32
    %c0_i32_0 = arith.constant 0 : i32
    return %arg0, %arg1, %c0_i32 : i32, i32, i32
  }
}

module attributes {stable_mosaic.version = 11 : i64} {
  func.func @_fused_conv_kernel(%arg0: i32, %arg1: i32, %arg2: memref<2x2x1x5x5x8xbf16, #tpu.memory_space<vmem>>, %arg3: memref<16x8x128xbf16, #tpu.memory_space<vmem>>, %arg4: memref<1x16x128xbf16, #tpu.memory_space<vmem>>) attributes {dimension_semantics = [#tpu.dimension_semantics<parallel>, #tpu.dimension_semantics<parallel>], iteration_bounds = array<i64: 2, 1>, scalar_prefetch = 0 : i64, scratch_operands = 0 : i64, tpu.core_type = #tpu.core_type<tc>, window_params = [{transform_indices = @transform_0, window_bounds = array<i64: 2, 2, 1, 5, 5, 8>}, {pipeline_mode = #tpu.pipeline_mode<synchronous>, transform_indices = @transform_1, window_bounds = array<i64: 16, 8, 128>}, {transform_indices = @transform_2, window_bounds = array<i64: 1, 16, 128>}]} {
    %cst = arith.constant 0.000000e+00 : f32
    %0 = vector.broadcast %cst : f32 to vector<16x128xf32>
    %c4_i32 = arith.constant 4 : i32
    %1 = arith.muli %arg1, %c4_i32 : i32
    %c0_i32 = arith.constant 0 : i32
    %2 = arith.addi %1, %c0_i32 : i32
    %c0 = arith.constant 0 : index
    %c0_0 = arith.constant 0 : index
    %c0_1 = arith.constant 0 : index
    %3 = arith.index_cast %2 : i32 to index
    %c0_2 = arith.constant 0 : index
    %c0_3 = arith.constant 0 : index
    %4 = vector.load %arg2[%c0, %c0_0, %c0_1, %3, %c0_2, %c0_3] : memref<2x2x1x5x5x8xbf16, #tpu.memory_space<vmem>>, vector<1x1x1x4x4x8xbf16>
    %5 = vector.shape_cast %4 : vector<1x1x1x4x4x8xbf16> to vector<4x4x8xbf16>
    %6 = vector.shape_cast %5 : vector<4x4x8xbf16> to vector<16x8xbf16>
    %c0_4 = arith.constant 0 : index
    %c0_5 = arith.constant 0 : index
    %c0_6 = arith.constant 0 : index
    %7 = vector.load %arg3[%c0_4, %c0_5, %c0_6] : memref<16x8x128xbf16, #tpu.memory_space<vmem>>, vector<1x8x128xbf16>
    %8 = vector.shape_cast %7 : vector<1x8x128xbf16> to vector<8x128xbf16>
    %cst_7 = arith.constant dense<0.000000e+00> : vector<16x128xf32>
    %9 = tpu.matmul %6, %8, %cst_7 {dimension_numbers = #tpu.dot_dimension_numbers<[1], [0], [0], [1], [0, 0, 1, 1], [], []>} : vector<16x8xbf16>, vector<8x128xbf16>, vector<16x128xf32> -> vector<16x128xf32>
    %10 = arith.addf %0, %9 : vector<16x128xf32>
    %c4_i32_8 = arith.constant 4 : i32
    %11 = arith.muli %arg1, %c4_i32_8 : i32
    %c0_i32_9 = arith.constant 0 : i32
    %12 = arith.addi %11, %c0_i32_9 : i32
    %c0_10 = arith.constant 0 : index
    %c1 = arith.constant 1 : index
    %c0_11 = arith.constant 0 : index
    %13 = arith.index_cast %12 : i32 to index
    %c0_12 = arith.constant 0 : index
    %c0_13 = arith.constant 0 : index
    %14 = vector.load %arg2[%c0_10, %c1, %c0_11, %13, %c0_12, %c0_13] : memref<2x2x1x5x5x8xbf16, #tpu.memory_space<vmem>>, vector<1x1x1x4x4x8xbf16>
    %15 = vector.shape_cast %14 : vector<1x1x1x4x4x8xbf16> to vector<4x4x8xbf16>
    %16 = vector.shape_cast %15 : vector<4x4x8xbf16> to vector<16x8xbf16>
    %c1_14 = arith.constant 1 : index
    %c0_15 = arith.constant 0 : index
    %c0_16 = arith.constant 0 : index
    %17 = vector.load %arg3[%c1_14, %c0_15, %c0_16] : memref<16x8x128xbf16, #tpu.memory_space<vmem>>, vector<1x8x128xbf16>
    %18 = vector.shape_cast %17 : vector<1x8x128xbf16> to vector<8x128xbf16>
    %cst_17 = arith.constant dense<0.000000e+00> : vector<16x128xf32>
    %19 = tpu.matmul %16, %18, %cst_17 {dimension_numbers = #tpu.dot_dimension_numbers<[1], [0], [0], [1], [0, 0, 1, 1], [], []>} : vector<16x8xbf16>, vector<8x128xbf16>, vector<16x128xf32> -> vector<16x128xf32>
    %20 = arith.addf %10, %19 : vector<16x128xf32>
    %c4_i32_18 = arith.constant 4 : i32
    %21 = arith.muli %arg1, %c4_i32_18 : i32
    %c0_i32_19 = arith.constant 0 : i32
    %22 = arith.addi %21, %c0_i32_19 : i32
    %c0_20 = arith.constant 0 : index
    %c0_21 = arith.constant 0 : index
    %c0_22 = arith.constant 0 : index
    %23 = arith.index_cast %22 : i32 to index
    %c1_23 = arith.constant 1 : index
    %c0_24 = arith.constant 0 : index
    %24 = vector.load %arg2[%c0_20, %c0_21, %c0_22, %23, %c1_23, %c0_24] : memref<2x2x1x5x5x8xbf16, #tpu.memory_space<vmem>>, vector<1x1x1x4x4x8xbf16>
    %25 = vector.shape_cast %24 : vector<1x1x1x4x4x8xbf16> to vector<4x4x8xbf16>
    %26 = vector.shape_cast %25 : vector<4x4x8xbf16> to vector<16x8xbf16>
    %c2 = arith.constant 2 : index
    %c0_25 = arith.constant 0 : index
    %c0_26 = arith.constant 0 : index
    %27 = vector.load %arg3[%c2, %c0_25, %c0_26] : memref<16x8x128xbf16, #tpu.memory_space<vmem>>, vector<1x8x128xbf16>
    %28 = vector.shape_cast %27 : vector<1x8x128xbf16> to vector<8x128xbf16>
    %cst_27 = arith.constant dense<0.000000e+00> : vector<16x128xf32>
    %29 = tpu.matmul %26, %28, %cst_27 {dimension_numbers = #tpu.dot_dimension_numbers<[1], [0], [0], [1], [0, 0, 1, 1], [], []>} : vector<16x8xbf16>, vector<8x128xbf16>, vector<16x128xf32> -> vector<16x128xf32>
    %30 = arith.addf %20, %29 : vector<16x128xf32>
    %c4_i32_28 = arith.constant 4 : i32
    %31 = arith.muli %arg1, %c4_i32_28 : i32
    %c0_i32_29 = arith.constant 0 : i32
    %32 = arith.addi %31, %c0_i32_29 : i32
    %c0_30 = arith.constant 0 : index
    %c1_31 = arith.constant 1 : index
    %c0_32 = arith.constant 0 : index
    %33 = arith.index_cast %32 : i32 to index
    %c1_33 = arith.constant 1 : index
    %c0_34 = arith.constant 0 : index
    %34 = vector.load %arg2[%c0_30, %c1_31, %c0_32, %33, %c1_33, %c0_34] : memref<2x2x1x5x5x8xbf16, #tpu.memory_space<vmem>>, vector<1x1x1x4x4x8xbf16>
    %35 = vector.shape_cast %34 : vector<1x1x1x4x4x8xbf16> to vector<4x4x8xbf16>
    %36 = vector.shape_cast %35 : vector<4x4x8xbf16> to vector<16x8xbf16>
    %c3 = arith.constant 3 : index
    %c0_35 = arith.constant 0 : index
    %c0_36 = arith.constant 0 : index
    %37 = vector.load %arg3[%c3, %c0_35, %c0_36] : memref<16x8x128xbf16, #tpu.memory_space<vmem>>, vector<1x8x128xbf16>
    %38 = vector.shape_cast %37 : vector<1x8x128xbf16> to vector<8x128xbf16>
    %cst_37 = arith.constant dense<0.000000e+00> : vector<16x128xf32>
    %39 = tpu.matmul %36, %38, %cst_37 {dimension_numbers = #tpu.dot_dimension_numbers<[1], [0], [0], [1], [0, 0, 1, 1], [], []>} : vector<16x8xbf16>, vector<8x128xbf16>, vector<16x128xf32> -> vector<16x128xf32>
    %40 = arith.addf %30, %39 : vector<16x128xf32>
    %c4_i32_38 = arith.constant 4 : i32
    %41 = arith.muli %arg1, %c4_i32_38 : i32
    %c0_i32_39 = arith.constant 0 : i32
    %42 = arith.addi %41, %c0_i32_39 : i32
    %c1_40 = arith.constant 1 : index
    %c0_41 = arith.constant 0 : index
    %c0_42 = arith.constant 0 : index
    %43 = arith.index_cast %42 : i32 to index
    %c0_43 = arith.constant 0 : index
    %c0_44 = arith.constant 0 : index
    %44 = vector.load %arg2[%c1_40, %c0_41, %c0_42, %43, %c0_43, %c0_44] : memref<2x2x1x5x5x8xbf16, #tpu.memory_space<vmem>>, vector<1x1x1x4x4x8xbf16>
    %45 = vector.shape_cast %44 : vector<1x1x1x4x4x8xbf16> to vector<4x4x8xbf16>
    %46 = vector.shape_cast %45 : vector<4x4x8xbf16> to vector<16x8xbf16>
    %c4 = arith.constant 4 : index
    %c0_45 = arith.constant 0 : index
    %c0_46 = arith.constant 0 : index
    %47 = vector.load %arg3[%c4, %c0_45, %c0_46] : memref<16x8x128xbf16, #tpu.memory_space<vmem>>, vector<1x8x128xbf16>
    %48 = vector.shape_cast %47 : vector<1x8x128xbf16> to vector<8x128xbf16>
    %cst_47 = arith.constant dense<0.000000e+00> : vector<16x128xf32>
    %49 = tpu.matmul %46, %48, %cst_47 {dimension_numbers = #tpu.dot_dimension_numbers<[1], [0], [0], [1], [0, 0, 1, 1], [], []>} : vector<16x8xbf16>, vector<8x128xbf16>, vector<16x128xf32> -> vector<16x128xf32>
    %50 = arith.addf %40, %49 : vector<16x128xf32>
    %c4_i32_48 = arith.constant 4 : i32
    %51 = arith.muli %arg1, %c4_i32_48 : i32
    %c0_i32_49 = arith.constant 0 : i32
    %52 = arith.addi %51, %c0_i32_49 : i32
    %c1_50 = arith.constant 1 : index
    %c1_51 = arith.constant 1 : index
    %c0_52 = arith.constant 0 : index
    %53 = arith.index_cast %52 : i32 to index
    %c0_53 = arith.constant 0 : index
    %c0_54 = arith.constant 0 : index
    %54 = vector.load %arg2[%c1_50, %c1_51, %c0_52, %53, %c0_53, %c0_54] : memref<2x2x1x5x5x8xbf16, #tpu.memory_space<vmem>>, vector<1x1x1x4x4x8xbf16>
    %55 = vector.shape_cast %54 : vector<1x1x1x4x4x8xbf16> to vector<4x4x8xbf16>
    %56 = vector.shape_cast %55 : vector<4x4x8xbf16> to vector<16x8xbf16>
    %c5 = arith.constant 5 : index
    %c0_55 = arith.constant 0 : index
    %c0_56 = arith.constant 0 : index
    %57 = vector.load %arg3[%c5, %c0_55, %c0_56] : memref<16x8x128xbf16, #tpu.memory_space<vmem>>, vector<1x8x128xbf16>
    %58 = vector.shape_cast %57 : vector<1x8x128xbf16> to vector<8x128xbf16>
    %cst_57 = arith.constant dense<0.000000e+00> : vector<16x128xf32>
    %59 = tpu.matmul %56, %58, %cst_57 {dimension_numbers = #tpu.dot_dimension_numbers<[1], [0], [0], [1], [0, 0, 1, 1], [], []>} : vector<16x8xbf16>, vector<8x128xbf16>, vector<16x128xf32> -> vector<16x128xf32>
    %60 = arith.addf %50, %59 : vector<16x128xf32>
    %c4_i32_58 = arith.constant 4 : i32
    %61 = arith.muli %arg1, %c4_i32_58 : i32
    %c0_i32_59 = arith.constant 0 : i32
    %62 = arith.addi %61, %c0_i32_59 : i32
    %c1_60 = arith.constant 1 : index
    %c0_61 = arith.constant 0 : index
    %c0_62 = arith.constant 0 : index
    %63 = arith.index_cast %62 : i32 to index
    %c1_63 = arith.constant 1 : index
    %c0_64 = arith.constant 0 : index
    %64 = vector.load %arg2[%c1_60, %c0_61, %c0_62, %63, %c1_63, %c0_64] : memref<2x2x1x5x5x8xbf16, #tpu.memory_space<vmem>>, vector<1x1x1x4x4x8xbf16>
    %65 = vector.shape_cast %64 : vector<1x1x1x4x4x8xbf16> to vector<4x4x8xbf16>
    %66 = vector.shape_cast %65 : vector<4x4x8xbf16> to vector<16x8xbf16>
    %c6 = arith.constant 6 : index
    %c0_65 = arith.constant 0 : index
    %c0_66 = arith.constant 0 : index
    %67 = vector.load %arg3[%c6, %c0_65, %c0_66] : memref<16x8x128xbf16, #tpu.memory_space<vmem>>, vector<1x8x128xbf16>
    %68 = vector.shape_cast %67 : vector<1x8x128xbf16> to vector<8x128xbf16>
    %cst_67 = arith.constant dense<0.000000e+00> : vector<16x128xf32>
    %69 = tpu.matmul %66, %68, %cst_67 {dimension_numbers = #tpu.dot_dimension_numbers<[1], [0], [0], [1], [0, 0, 1, 1], [], []>} : vector<16x8xbf16>, vector<8x128xbf16>, vector<16x128xf32> -> vector<16x128xf32>
    %70 = arith.addf %60, %69 : vector<16x128xf32>
    %c4_i32_68 = arith.constant 4 : i32
    %71 = arith.muli %arg1, %c4_i32_68 : i32
    %c0_i32_69 = arith.constant 0 : i32
    %72 = arith.addi %71, %c0_i32_69 : i32
    %c1_70 = arith.constant 1 : index
    %c1_71 = arith.constant 1 : index
    %c0_72 = arith.constant 0 : index
    %73 = arith.index_cast %72 : i32 to index
    %c1_73 = arith.constant 1 : index
    %c0_74 = arith.constant 0 : index
    %74 = vector.load %arg2[%c1_70, %c1_71, %c0_72, %73, %c1_73, %c0_74] : memref<2x2x1x5x5x8xbf16, #tpu.memory_space<vmem>>, vector<1x1x1x4x4x8xbf16>
    %75 = vector.shape_cast %74 : vector<1x1x1x4x4x8xbf16> to vector<4x4x8xbf16>
    %76 = vector.shape_cast %75 : vector<4x4x8xbf16> to vector<16x8xbf16>
    %c7 = arith.constant 7 : index
    %c0_75 = arith.constant 0 : index
    %c0_76 = arith.constant 0 : index
    %77 = vector.load %arg3[%c7, %c0_75, %c0_76] : memref<16x8x128xbf16, #tpu.memory_space<vmem>>, vector<1x8x128xbf16>
    %78 = vector.shape_cast %77 : vector<1x8x128xbf16> to vector<8x128xbf16>
    %cst_77 = arith.constant dense<0.000000e+00> : vector<16x128xf32>
    %79 = tpu.matmul %76, %78, %cst_77 {dimension_numbers = #tpu.dot_dimension_numbers<[1], [0], [0], [1], [0, 0, 1, 1], [], []>} : vector<16x8xbf16>, vector<8x128xbf16>, vector<16x128xf32> -> vector<16x128xf32>
    %80 = arith.addf %70, %79 : vector<16x128xf32>
    %c4_i32_78 = arith.constant 4 : i32
    %81 = arith.muli %arg1, %c4_i32_78 : i32
    %c1_i32 = arith.constant 1 : i32
    %82 = arith.addi %81, %c1_i32 : i32
    %c0_79 = arith.constant 0 : index
    %c0_80 = arith.constant 0 : index
    %c0_81 = arith.constant 0 : index
    %83 = arith.index_cast %82 : i32 to index
    %c0_82 = arith.constant 0 : index
    %c0_83 = arith.constant 0 : index
    %84 = vector.load %arg2[%c0_79, %c0_80, %c0_81, %83, %c0_82, %c0_83] : memref<2x2x1x5x5x8xbf16, #tpu.memory_space<vmem>>, vector<1x1x1x4x4x8xbf16>
    %85 = vector.shape_cast %84 : vector<1x1x1x4x4x8xbf16> to vector<4x4x8xbf16>
    %86 = vector.shape_cast %85 : vector<4x4x8xbf16> to vector<16x8xbf16>
    %c8 = arith.constant 8 : index
    %c0_84 = arith.constant 0 : index
    %c0_85 = arith.constant 0 : index
    %87 = vector.load %arg3[%c8, %c0_84, %c0_85] : memref<16x8x128xbf16, #tpu.memory_space<vmem>>, vector<1x8x128xbf16>
    %88 = vector.shape_cast %87 : vector<1x8x128xbf16> to vector<8x128xbf16>
    %cst_86 = arith.constant dense<0.000000e+00> : vector<16x128xf32>
    %89 = tpu.matmul %86, %88, %cst_86 {dimension_numbers = #tpu.dot_dimension_numbers<[1], [0], [0], [1], [0, 0, 1, 1], [], []>} : vector<16x8xbf16>, vector<8x128xbf16>, vector<16x128xf32> -> vector<16x128xf32>
    %90 = arith.addf %80, %89 : vector<16x128xf32>
    %c4_i32_87 = arith.constant 4 : i32
    %91 = arith.muli %arg1, %c4_i32_87 : i32
    %c1_i32_88 = arith.constant 1 : i32
    %92 = arith.addi %91, %c1_i32_88 : i32
    %c0_89 = arith.constant 0 : index
    %c1_90 = arith.constant 1 : index
    %c0_91 = arith.constant 0 : index
    %93 = arith.index_cast %92 : i32 to index
    %c0_92 = arith.constant 0 : index
    %c0_93 = arith.constant 0 : index
    %94 = vector.load %arg2[%c0_89, %c1_90, %c0_91, %93, %c0_92, %c0_93] : memref<2x2x1x5x5x8xbf16, #tpu.memory_space<vmem>>, vector<1x1x1x4x4x8xbf16>
    %95 = vector.shape_cast %94 : vector<1x1x1x4x4x8xbf16> to vector<4x4x8xbf16>
    %96 = vector.shape_cast %95 : vector<4x4x8xbf16> to vector<16x8xbf16>
    %c9 = arith.constant 9 : index
    %c0_94 = arith.constant 0 : index
    %c0_95 = arith.constant 0 : index
    %97 = vector.load %arg3[%c9, %c0_94, %c0_95] : memref<16x8x128xbf16, #tpu.memory_space<vmem>>, vector<1x8x128xbf16>
    %98 = vector.shape_cast %97 : vector<1x8x128xbf16> to vector<8x128xbf16>
    %cst_96 = arith.constant dense<0.000000e+00> : vector<16x128xf32>
    %99 = tpu.matmul %96, %98, %cst_96 {dimension_numbers = #tpu.dot_dimension_numbers<[1], [0], [0], [1], [0, 0, 1, 1], [], []>} : vector<16x8xbf16>, vector<8x128xbf16>, vector<16x128xf32> -> vector<16x128xf32>
    %100 = arith.addf %90, %99 : vector<16x128xf32>
    %c4_i32_97 = arith.constant 4 : i32
    %101 = arith.muli %arg1, %c4_i32_97 : i32
    %c1_i32_98 = arith.constant 1 : i32
    %102 = arith.addi %101, %c1_i32_98 : i32
    %c0_99 = arith.constant 0 : index
    %c0_100 = arith.constant 0 : index
    %c0_101 = arith.constant 0 : index
    %103 = arith.index_cast %102 : i32 to index
    %c1_102 = arith.constant 1 : index
    %c0_103 = arith.constant 0 : index
    %104 = vector.load %arg2[%c0_99, %c0_100, %c0_101, %103, %c1_102, %c0_103] : memref<2x2x1x5x5x8xbf16, #tpu.memory_space<vmem>>, vector<1x1x1x4x4x8xbf16>
    %105 = vector.shape_cast %104 : vector<1x1x1x4x4x8xbf16> to vector<4x4x8xbf16>
    %106 = vector.shape_cast %105 : vector<4x4x8xbf16> to vector<16x8xbf16>
    %c10 = arith.constant 10 : index
    %c0_104 = arith.constant 0 : index
    %c0_105 = arith.constant 0 : index
    %107 = vector.load %arg3[%c10, %c0_104, %c0_105] : memref<16x8x128xbf16, #tpu.memory_space<vmem>>, vector<1x8x128xbf16>
    %108 = vector.shape_cast %107 : vector<1x8x128xbf16> to vector<8x128xbf16>
    %cst_106 = arith.constant dense<0.000000e+00> : vector<16x128xf32>
    %109 = tpu.matmul %106, %108, %cst_106 {dimension_numbers = #tpu.dot_dimension_numbers<[1], [0], [0], [1], [0, 0, 1, 1], [], []>} : vector<16x8xbf16>, vector<8x128xbf16>, vector<16x128xf32> -> vector<16x128xf32>
    %110 = arith.addf %100, %109 : vector<16x128xf32>
    %c4_i32_107 = arith.constant 4 : i32
    %111 = arith.muli %arg1, %c4_i32_107 : i32
    %c1_i32_108 = arith.constant 1 : i32
    %112 = arith.addi %111, %c1_i32_108 : i32
    %c0_109 = arith.constant 0 : index
    %c1_110 = arith.constant 1 : index
    %c0_111 = arith.constant 0 : index
    %113 = arith.index_cast %112 : i32 to index
    %c1_112 = arith.constant 1 : index
    %c0_113 = arith.constant 0 : index
    %114 = vector.load %arg2[%c0_109, %c1_110, %c0_111, %113, %c1_112, %c0_113] : memref<2x2x1x5x5x8xbf16, #tpu.memory_space<vmem>>, vector<1x1x1x4x4x8xbf16>
    %115 = vector.shape_cast %114 : vector<1x1x1x4x4x8xbf16> to vector<4x4x8xbf16>
    %116 = vector.shape_cast %115 : vector<4x4x8xbf16> to vector<16x8xbf16>
    %c11 = arith.constant 11 : index
    %c0_114 = arith.constant 0 : index
    %c0_115 = arith.constant 0 : index
    %117 = vector.load %arg3[%c11, %c0_114, %c0_115] : memref<16x8x128xbf16, #tpu.memory_space<vmem>>, vector<1x8x128xbf16>
    %118 = vector.shape_cast %117 : vector<1x8x128xbf16> to vector<8x128xbf16>
    %cst_116 = arith.constant dense<0.000000e+00> : vector<16x128xf32>
    %119 = tpu.matmul %116, %118, %cst_116 {dimension_numbers = #tpu.dot_dimension_numbers<[1], [0], [0], [1], [0, 0, 1, 1], [], []>} : vector<16x8xbf16>, vector<8x128xbf16>, vector<16x128xf32> -> vector<16x128xf32>
    %120 = arith.addf %110, %119 : vector<16x128xf32>
    %c4_i32_117 = arith.constant 4 : i32
    %121 = arith.muli %arg1, %c4_i32_117 : i32
    %c1_i32_118 = arith.constant 1 : i32
    %122 = arith.addi %121, %c1_i32_118 : i32
    %c1_119 = arith.constant 1 : index
    %c0_120 = arith.constant 0 : index
    %c0_121 = arith.constant 0 : index
    %123 = arith.index_cast %122 : i32 to index
    %c0_122 = arith.constant 0 : index
    %c0_123 = arith.constant 0 : index
    %124 = vector.load %arg2[%c1_119, %c0_120, %c0_121, %123, %c0_122, %c0_123] : memref<2x2x1x5x5x8xbf16, #tpu.memory_space<vmem>>, vector<1x1x1x4x4x8xbf16>
    %125 = vector.shape_cast %124 : vector<1x1x1x4x4x8xbf16> to vector<4x4x8xbf16>
    %126 = vector.shape_cast %125 : vector<4x4x8xbf16> to vector<16x8xbf16>
    %c12 = arith.constant 12 : index
    %c0_124 = arith.constant 0 : index
    %c0_125 = arith.constant 0 : index
    %127 = vector.load %arg3[%c12, %c0_124, %c0_125] : memref<16x8x128xbf16, #tpu.memory_space<vmem>>, vector<1x8x128xbf16>
    %128 = vector.shape_cast %127 : vector<1x8x128xbf16> to vector<8x128xbf16>
    %cst_126 = arith.constant dense<0.000000e+00> : vector<16x128xf32>
    %129 = tpu.matmul %126, %128, %cst_126 {dimension_numbers = #tpu.dot_dimension_numbers<[1], [0], [0], [1], [0, 0, 1, 1], [], []>} : vector<16x8xbf16>, vector<8x128xbf16>, vector<16x128xf32> -> vector<16x128xf32>
    %130 = arith.addf %120, %129 : vector<16x128xf32>
    %c4_i32_127 = arith.constant 4 : i32
    %131 = arith.muli %arg1, %c4_i32_127 : i32
    %c1_i32_128 = arith.constant 1 : i32
    %132 = arith.addi %131, %c1_i32_128 : i32
    %c1_129 = arith.constant 1 : index
    %c1_130 = arith.constant 1 : index
    %c0_131 = arith.constant 0 : index
    %133 = arith.index_cast %132 : i32 to index
    %c0_132 = arith.constant 0 : index
    %c0_133 = arith.constant 0 : index
    %134 = vector.load %arg2[%c1_129, %c1_130, %c0_131, %133, %c0_132, %c0_133] : memref<2x2x1x5x5x8xbf16, #tpu.memory_space<vmem>>, vector<1x1x1x4x4x8xbf16>
    %135 = vector.shape_cast %134 : vector<1x1x1x4x4x8xbf16> to vector<4x4x8xbf16>
    %136 = vector.shape_cast %135 : vector<4x4x8xbf16> to vector<16x8xbf16>
    %c13 = arith.constant 13 : index
    %c0_134 = arith.constant 0 : index
    %c0_135 = arith.constant 0 : index
    %137 = vector.load %arg3[%c13, %c0_134, %c0_135] : memref<16x8x128xbf16, #tpu.memory_space<vmem>>, vector<1x8x128xbf16>
    %138 = vector.shape_cast %137 : vector<1x8x128xbf16> to vector<8x128xbf16>
    %cst_136 = arith.constant dense<0.000000e+00> : vector<16x128xf32>
    %139 = tpu.matmul %136, %138, %cst_136 {dimension_numbers = #tpu.dot_dimension_numbers<[1], [0], [0], [1], [0, 0, 1, 1], [], []>} : vector<16x8xbf16>, vector<8x128xbf16>, vector<16x128xf32> -> vector<16x128xf32>
    %140 = arith.addf %130, %139 : vector<16x128xf32>
    %c4_i32_137 = arith.constant 4 : i32
    %141 = arith.muli %arg1, %c4_i32_137 : i32
    %c1_i32_138 = arith.constant 1 : i32
    %142 = arith.addi %141, %c1_i32_138 : i32
    %c1_139 = arith.constant 1 : index
    %c0_140 = arith.constant 0 : index
    %c0_141 = arith.constant 0 : index
    %143 = arith.index_cast %142 : i32 to index
    %c1_142 = arith.constant 1 : index
    %c0_143 = arith.constant 0 : index
    %144 = vector.load %arg2[%c1_139, %c0_140, %c0_141, %143, %c1_142, %c0_143] : memref<2x2x1x5x5x8xbf16, #tpu.memory_space<vmem>>, vector<1x1x1x4x4x8xbf16>
    %145 = vector.shape_cast %144 : vector<1x1x1x4x4x8xbf16> to vector<4x4x8xbf16>
    %146 = vector.shape_cast %145 : vector<4x4x8xbf16> to vector<16x8xbf16>
    %c14 = arith.constant 14 : index
    %c0_144 = arith.constant 0 : index
    %c0_145 = arith.constant 0 : index
    %147 = vector.load %arg3[%c14, %c0_144, %c0_145] : memref<16x8x128xbf16, #tpu.memory_space<vmem>>, vector<1x8x128xbf16>
    %148 = vector.shape_cast %147 : vector<1x8x128xbf16> to vector<8x128xbf16>
    %cst_146 = arith.constant dense<0.000000e+00> : vector<16x128xf32>
    %149 = tpu.matmul %146, %148, %cst_146 {dimension_numbers = #tpu.dot_dimension_numbers<[1], [0], [0], [1], [0, 0, 1, 1], [], []>} : vector<16x8xbf16>, vector<8x128xbf16>, vector<16x128xf32> -> vector<16x128xf32>
    %150 = arith.addf %140, %149 : vector<16x128xf32>
    %c4_i32_147 = arith.constant 4 : i32
    %151 = arith.muli %arg1, %c4_i32_147 : i32
    %c1_i32_148 = arith.constant 1 : i32
    %152 = arith.addi %151, %c1_i32_148 : i32
    %c1_149 = arith.constant 1 : index
    %c1_150 = arith.constant 1 : index
    %c0_151 = arith.constant 0 : index
    %153 = arith.index_cast %152 : i32 to index
    %c1_152 = arith.constant 1 : index
    %c0_153 = arith.constant 0 : index
    %154 = vector.load %arg2[%c1_149, %c1_150, %c0_151, %153, %c1_152, %c0_153] : memref<2x2x1x5x5x8xbf16, #tpu.memory_space<vmem>>, vector<1x1x1x4x4x8xbf16>
    %155 = vector.shape_cast %154 : vector<1x1x1x4x4x8xbf16> to vector<4x4x8xbf16>
    %156 = vector.shape_cast %155 : vector<4x4x8xbf16> to vector<16x8xbf16>
    %c15 = arith.constant 15 : index
    %c0_154 = arith.constant 0 : index
    %c0_155 = arith.constant 0 : index
    %157 = vector.load %arg3[%c15, %c0_154, %c0_155] : memref<16x8x128xbf16, #tpu.memory_space<vmem>>, vector<1x8x128xbf16>
    %158 = vector.shape_cast %157 : vector<1x8x128xbf16> to vector<8x128xbf16>
    %cst_156 = arith.constant dense<0.000000e+00> : vector<16x128xf32>
    %159 = tpu.matmul %156, %158, %cst_156 {dimension_numbers = #tpu.dot_dimension_numbers<[1], [0], [0], [1], [0, 0, 1, 1], [], []>} : vector<16x8xbf16>, vector<8x128xbf16>, vector<16x128xf32> -> vector<16x128xf32>
    %160 = arith.addf %150, %159 : vector<16x128xf32>
    %cst_157 = arith.constant 0.000000e+00 : f32
    %161 = vector.broadcast %cst_157 : f32 to vector<16x128xf32>
    %162 = arith.cmpf oge, %160, %161 : vector<16x128xf32>
    %cst_158 = arith.constant 2.000000e-01 : f32
    %163 = vector.broadcast %cst_158 : f32 to vector<16x128xf32>
    %164 = arith.mulf %163, %160 : vector<16x128xf32>
    %165 = arith.select %162, %160, %164 : vector<16x128xi1>, vector<16x128xf32>
    %166 = arith.truncf %165 : vector<16x128xf32> to vector<16x128xbf16>
    %c0_159 = arith.constant 0 : index
    %c0_160 = arith.constant 0 : index
    %c0_161 = arith.constant 0 : index
    %167 = vector.load %arg4[%c0_159, %c0_160, %c0_161] : memref<1x16x128xbf16, #tpu.memory_space<vmem>>, vector<1x16x128xbf16>
    %168 = vector.shape_cast %167 : vector<1x16x128xbf16> to vector<16x128xbf16>
    %169 = vector.shape_cast %166 : vector<16x128xbf16> to vector<1x16x128xbf16>
    tpu.vector_store %arg4[%c0_159, %c0_160, %c0_161], %169 {strides = array<i32>} : memref<1x16x128xbf16, #tpu.memory_space<vmem>>, vector<1x16x128xbf16>,
    return
  }
  func.func @transform_0(%arg0: i32, %arg1: i32) -> (i32, i32, i32, i32, i32, i32) {
    %c0_i32 = arith.constant 0 : i32
    %c0_i32_0 = arith.constant 0 : i32
    %c0_i32_1 = arith.constant 0 : i32
    %c0_i32_2 = arith.constant 0 : i32
    %c0_i32_3 = arith.constant 0 : i32
    %c0_i32_4 = arith.constant 0 : i32
    return %c0_i32, %c0_i32_0, %arg0, %c0_i32_1, %c0_i32_2, %c0_i32_3 : i32, i32, i32, i32, i32, i32
  }
  func.func @transform_1(%arg0: i32, %arg1: i32) -> (i32, i32, i32) {
    %c0_i32 = arith.constant 0 : i32
    %c0_i32_0 = arith.constant 0 : i32
    %c0_i32_1 = arith.constant 0 : i32
    %c0_i32_2 = arith.constant 0 : i32
    return %c0_i32, %c0_i32_0, %c0_i32_1 : i32, i32, i32
  }
  func.func @transform_2(%arg0: i32, %arg1: i32) -> (i32, i32, i32) {
    %c0_i32 = arith.constant 0 : i32
    %c0_i32_0 = arith.constant 0 : i32
    return %arg0, %arg1, %c0_i32 : i32, i32, i32
  }
}

module attributes {stable_mosaic.version = 11 : i64} {
  func.func @_fused_conv_kernel(%arg0: i32, %arg1: i32, %arg2: memref<1x6x6x16xbf16, #tpu.memory_space<vmem>>, %arg3: memref<9x16x128xbf16, #tpu.memory_space<vmem>>, %arg4: memref<1xf32, #tpu.memory_space<smem>>, %arg5: memref<1x16x128xf32, #tpu.memory_space<vmem>>) attributes {dimension_semantics = [#tpu.dimension_semantics<parallel>, #tpu.dimension_semantics<parallel>], iteration_bounds = array<i64: 2, 1>, scalar_prefetch = 0 : i64, scratch_operands = 0 : i64, tpu.core_type = #tpu.core_type<tc>, window_params = [{transform_indices = @transform_0, window_bounds = array<i64: 1, 6, 6, 16>}, {pipeline_mode = #tpu.pipeline_mode<synchronous>, transform_indices = @transform_1, window_bounds = array<i64: 9, 16, 128>}, {transform_indices = @transform_2, window_bounds = array<i64: 1>}, {transform_indices = @transform_3, window_bounds = array<i64: 1, 16, 128>}]} {
    %cst = arith.constant 0.000000e+00 : f32
    %0 = vector.broadcast %cst : f32 to vector<16x128xf32>
    %c4_i32 = arith.constant 4 : i32
    %1 = arith.muli %arg1, %c4_i32 : i32
    %c0_i32 = arith.constant 0 : i32
    %2 = arith.addi %1, %c0_i32 : i32
    %c0 = arith.constant 0 : index
    %3 = arith.index_cast %2 : i32 to index
    %c0_0 = arith.constant 0 : index
    %c0_1 = arith.constant 0 : index
    %4 = vector.load %arg2[%c0, %3, %c0_0, %c0_1] : memref<1x6x6x16xbf16, #tpu.memory_space<vmem>>, vector<1x4x4x16xbf16>
    %5 = vector.shape_cast %4 : vector<1x4x4x16xbf16> to vector<4x4x16xbf16>
    %6 = vector.shape_cast %5 : vector<4x4x16xbf16> to vector<16x16xbf16>
    %c0_2 = arith.constant 0 : index
    %c0_3 = arith.constant 0 : index
    %c0_4 = arith.constant 0 : index
    %7 = vector.load %arg3[%c0_2, %c0_3, %c0_4] : memref<9x16x128xbf16, #tpu.memory_space<vmem>>, vector<1x16x128xbf16>
    %8 = vector.shape_cast %7 : vector<1x16x128xbf16> to vector<16x128xbf16>
    %cst_5 = arith.constant dense<0.000000e+00> : vector<16x128xf32>
    %9 = tpu.matmul %6, %8, %cst_5 {dimension_numbers = #tpu.dot_dimension_numbers<[1], [0], [0], [1], [0, 0, 1, 1], [], []>} : vector<16x16xbf16>, vector<16x128xbf16>, vector<16x128xf32> -> vector<16x128xf32>
    %10 = arith.addf %0, %9 : vector<16x128xf32>
    %c4_i32_6 = arith.constant 4 : i32
    %11 = arith.muli %arg1, %c4_i32_6 : i32
    %c0_i32_7 = arith.constant 0 : i32
    %12 = arith.addi %11, %c0_i32_7 : i32
    %c0_8 = arith.constant 0 : index
    %13 = arith.index_cast %12 : i32 to index
    %c1 = arith.constant 1 : index
    %c0_9 = arith.constant 0 : index
    %14 = vector.load %arg2[%c0_8, %13, %c1, %c0_9] : memref<1x6x6x16xbf16, #tpu.memory_space<vmem>>, vector<1x4x4x16xbf16>
    %15 = vector.shape_cast %14 : vector<1x4x4x16xbf16> to vector<4x4x16xbf16>
    %16 = vector.shape_cast %15 : vector<4x4x16xbf16> to vector<16x16xbf16>
    %c1_10 = arith.constant 1 : index
    %c0_11 = arith.constant 0 : index
    %c0_12 = arith.constant 0 : index
    %17 = vector.load %arg3[%c1_10, %c0_11, %c0_12] : memref<9x16x128xbf16, #tpu.memory_space<vmem>>, vector<1x16x128xbf16>
    %18 = vector.shape_cast %17 : vector<1x16x128xbf16> to vector<16x128xbf16>
    %cst_13 = arith.constant dense<0.000000e+00> : vector<16x128xf32>
    %19 = tpu.matmul %16, %18, %cst_13 {dimension_numbers = #tpu.dot_dimension_numbers<[1], [0], [0], [1], [0, 0, 1, 1], [], []>} : vector<16x16xbf16>, vector<16x128xbf16>, vector<16x128xf32> -> vector<16x128xf32>
    %20 = arith.addf %10, %19 : vector<16x128xf32>
    %c4_i32_14 = arith.constant 4 : i32
    %21 = arith.muli %arg1, %c4_i32_14 : i32
    %c0_i32_15 = arith.constant 0 : i32
    %22 = arith.addi %21, %c0_i32_15 : i32
    %c0_16 = arith.constant 0 : index
    %23 = arith.index_cast %22 : i32 to index
    %c2 = arith.constant 2 : index
    %c0_17 = arith.constant 0 : index
    %24 = vector.load %arg2[%c0_16, %23, %c2, %c0_17] : memref<1x6x6x16xbf16, #tpu.memory_space<vmem>>, vector<1x4x4x16xbf16>
    %25 = vector.shape_cast %24 : vector<1x4x4x16xbf16> to vector<4x4x16xbf16>
    %26 = vector.shape_cast %25 : vector<4x4x16xbf16> to vector<16x16xbf16>
    %c2_18 = arith.constant 2 : index
    %c0_19 = arith.constant 0 : index
    %c0_20 = arith.constant 0 : index
    %27 = vector.load %arg3[%c2_18, %c0_19, %c0_20] : memref<9x16x128xbf16, #tpu.memory_space<vmem>>, vector<1x16x128xbf16>
    %28 = vector.shape_cast %27 : vector<1x16x128xbf16> to vector<16x128xbf16>
    %cst_21 = arith.constant dense<0.000000e+00> : vector<16x128xf32>
    %29 = tpu.matmul %26, %28, %cst_21 {dimension_numbers = #tpu.dot_dimension_numbers<[1], [0], [0], [1], [0, 0, 1, 1], [], []>} : vector<16x16xbf16>, vector<16x128xbf16>, vector<16x128xf32> -> vector<16x128xf32>
    %30 = arith.addf %20, %29 : vector<16x128xf32>
    %c4_i32_22 = arith.constant 4 : i32
    %31 = arith.muli %arg1, %c4_i32_22 : i32
    %c1_i32 = arith.constant 1 : i32
    %32 = arith.addi %31, %c1_i32 : i32
    %c0_23 = arith.constant 0 : index
    %33 = arith.index_cast %32 : i32 to index
    %c0_24 = arith.constant 0 : index
    %c0_25 = arith.constant 0 : index
    %34 = vector.load %arg2[%c0_23, %33, %c0_24, %c0_25] : memref<1x6x6x16xbf16, #tpu.memory_space<vmem>>, vector<1x4x4x16xbf16>
    %35 = vector.shape_cast %34 : vector<1x4x4x16xbf16> to vector<4x4x16xbf16>
    %36 = vector.shape_cast %35 : vector<4x4x16xbf16> to vector<16x16xbf16>
    %c3 = arith.constant 3 : index
    %c0_26 = arith.constant 0 : index
    %c0_27 = arith.constant 0 : index
    %37 = vector.load %arg3[%c3, %c0_26, %c0_27] : memref<9x16x128xbf16, #tpu.memory_space<vmem>>, vector<1x16x128xbf16>
    %38 = vector.shape_cast %37 : vector<1x16x128xbf16> to vector<16x128xbf16>
    %cst_28 = arith.constant dense<0.000000e+00> : vector<16x128xf32>
    %39 = tpu.matmul %36, %38, %cst_28 {dimension_numbers = #tpu.dot_dimension_numbers<[1], [0], [0], [1], [0, 0, 1, 1], [], []>} : vector<16x16xbf16>, vector<16x128xbf16>, vector<16x128xf32> -> vector<16x128xf32>
    %40 = arith.addf %30, %39 : vector<16x128xf32>
    %c4_i32_29 = arith.constant 4 : i32
    %41 = arith.muli %arg1, %c4_i32_29 : i32
    %c1_i32_30 = arith.constant 1 : i32
    %42 = arith.addi %41, %c1_i32_30 : i32
    %c0_31 = arith.constant 0 : index
    %43 = arith.index_cast %42 : i32 to index
    %c1_32 = arith.constant 1 : index
    %c0_33 = arith.constant 0 : index
    %44 = vector.load %arg2[%c0_31, %43, %c1_32, %c0_33] : memref<1x6x6x16xbf16, #tpu.memory_space<vmem>>, vector<1x4x4x16xbf16>
    %45 = vector.shape_cast %44 : vector<1x4x4x16xbf16> to vector<4x4x16xbf16>
    %46 = vector.shape_cast %45 : vector<4x4x16xbf16> to vector<16x16xbf16>
    %c4 = arith.constant 4 : index
    %c0_34 = arith.constant 0 : index
    %c0_35 = arith.constant 0 : index
    %47 = vector.load %arg3[%c4, %c0_34, %c0_35] : memref<9x16x128xbf16, #tpu.memory_space<vmem>>, vector<1x16x128xbf16>
    %48 = vector.shape_cast %47 : vector<1x16x128xbf16> to vector<16x128xbf16>
    %cst_36 = arith.constant dense<0.000000e+00> : vector<16x128xf32>
    %49 = tpu.matmul %46, %48, %cst_36 {dimension_numbers = #tpu.dot_dimension_numbers<[1], [0], [0], [1], [0, 0, 1, 1], [], []>} : vector<16x16xbf16>, vector<16x128xbf16>, vector<16x128xf32> -> vector<16x128xf32>
    %50 = arith.addf %40, %49 : vector<16x128xf32>
    %c4_i32_37 = arith.constant 4 : i32
    %51 = arith.muli %arg1, %c4_i32_37 : i32
    %c1_i32_38 = arith.constant 1 : i32
    %52 = arith.addi %51, %c1_i32_38 : i32
    %c0_39 = arith.constant 0 : index
    %53 = arith.index_cast %52 : i32 to index
    %c2_40 = arith.constant 2 : index
    %c0_41 = arith.constant 0 : index
    %54 = vector.load %arg2[%c0_39, %53, %c2_40, %c0_41] : memref<1x6x6x16xbf16, #tpu.memory_space<vmem>>, vector<1x4x4x16xbf16>
    %55 = vector.shape_cast %54 : vector<1x4x4x16xbf16> to vector<4x4x16xbf16>
    %56 = vector.shape_cast %55 : vector<4x4x16xbf16> to vector<16x16xbf16>
    %c5 = arith.constant 5 : index
    %c0_42 = arith.constant 0 : index
    %c0_43 = arith.constant 0 : index
    %57 = vector.load %arg3[%c5, %c0_42, %c0_43] : memref<9x16x128xbf16, #tpu.memory_space<vmem>>, vector<1x16x128xbf16>
    %58 = vector.shape_cast %57 : vector<1x16x128xbf16> to vector<16x128xbf16>
    %cst_44 = arith.constant dense<0.000000e+00> : vector<16x128xf32>
    %59 = tpu.matmul %56, %58, %cst_44 {dimension_numbers = #tpu.dot_dimension_numbers<[1], [0], [0], [1], [0, 0, 1, 1], [], []>} : vector<16x16xbf16>, vector<16x128xbf16>, vector<16x128xf32> -> vector<16x128xf32>
    %60 = arith.addf %50, %59 : vector<16x128xf32>
    %c4_i32_45 = arith.constant 4 : i32
    %61 = arith.muli %arg1, %c4_i32_45 : i32
    %c2_i32 = arith.constant 2 : i32
    %62 = arith.addi %61, %c2_i32 : i32
    %c0_46 = arith.constant 0 : index
    %63 = arith.index_cast %62 : i32 to index
    %c0_47 = arith.constant 0 : index
    %c0_48 = arith.constant 0 : index
    %64 = vector.load %arg2[%c0_46, %63, %c0_47, %c0_48] : memref<1x6x6x16xbf16, #tpu.memory_space<vmem>>, vector<1x4x4x16xbf16>
    %65 = vector.shape_cast %64 : vector<1x4x4x16xbf16> to vector<4x4x16xbf16>
    %66 = vector.shape_cast %65 : vector<4x4x16xbf16> to vector<16x16xbf16>
    %c6 = arith.constant 6 : index
    %c0_49 = arith.constant 0 : index
    %c0_50 = arith.constant 0 : index
    %67 = vector.load %arg3[%c6, %c0_49, %c0_50] : memref<9x16x128xbf16, #tpu.memory_space<vmem>>, vector<1x16x128xbf16>
    %68 = vector.shape_cast %67 : vector<1x16x128xbf16> to vector<16x128xbf16>
    %cst_51 = arith.constant dense<0.000000e+00> : vector<16x128xf32>
    %69 = tpu.matmul %66, %68, %cst_51 {dimension_numbers = #tpu.dot_dimension_numbers<[1], [0], [0], [1], [0, 0, 1, 1], [], []>} : vector<16x16xbf16>, vector<16x128xbf16>, vector<16x128xf32> -> vector<16x128xf32>
    %70 = arith.addf %60, %69 : vector<16x128xf32>
    %c4_i32_52 = arith.constant 4 : i32
    %71 = arith.muli %arg1, %c4_i32_52 : i32
    %c2_i32_53 = arith.constant 2 : i32
    %72 = arith.addi %71, %c2_i32_53 : i32
    %c0_54 = arith.constant 0 : index
    %73 = arith.index_cast %72 : i32 to index
    %c1_55 = arith.constant 1 : index
    %c0_56 = arith.constant 0 : index
    %74 = vector.load %arg2[%c0_54, %73, %c1_55, %c0_56] : memref<1x6x6x16xbf16, #tpu.memory_space<vmem>>, vector<1x4x4x16xbf16>
    %75 = vector.shape_cast %74 : vector<1x4x4x16xbf16> to vector<4x4x16xbf16>
    %76 = vector.shape_cast %75 : vector<4x4x16xbf16> to vector<16x16xbf16>
    %c7 = arith.constant 7 : index
    %c0_57 = arith.constant 0 : index
    %c0_58 = arith.constant 0 : index
    %77 = vector.load %arg3[%c7, %c0_57, %c0_58] : memref<9x16x128xbf16, #tpu.memory_space<vmem>>, vector<1x16x128xbf16>
    %78 = vector.shape_cast %77 : vector<1x16x128xbf16> to vector<16x128xbf16>
    %cst_59 = arith.constant dense<0.000000e+00> : vector<16x128xf32>
    %79 = tpu.matmul %76, %78, %cst_59 {dimension_numbers = #tpu.dot_dimension_numbers<[1], [0], [0], [1], [0, 0, 1, 1], [], []>} : vector<16x16xbf16>, vector<16x128xbf16>, vector<16x128xf32> -> vector<16x128xf32>
    %80 = arith.addf %70, %79 : vector<16x128xf32>
    %c4_i32_60 = arith.constant 4 : i32
    %81 = arith.muli %arg1, %c4_i32_60 : i32
    %c2_i32_61 = arith.constant 2 : i32
    %82 = arith.addi %81, %c2_i32_61 : i32
    %c0_62 = arith.constant 0 : index
    %83 = arith.index_cast %82 : i32 to index
    %c2_63 = arith.constant 2 : index
    %c0_64 = arith.constant 0 : index
    %84 = vector.load %arg2[%c0_62, %83, %c2_63, %c0_64] : memref<1x6x6x16xbf16, #tpu.memory_space<vmem>>, vector<1x4x4x16xbf16>
    %85 = vector.shape_cast %84 : vector<1x4x4x16xbf16> to vector<4x4x16xbf16>
    %86 = vector.shape_cast %85 : vector<4x4x16xbf16> to vector<16x16xbf16>
    %c8 = arith.constant 8 : index
    %c0_65 = arith.constant 0 : index
    %c0_66 = arith.constant 0 : index
    %87 = vector.load %arg3[%c8, %c0_65, %c0_66] : memref<9x16x128xbf16, #tpu.memory_space<vmem>>, vector<1x16x128xbf16>
    %88 = vector.shape_cast %87 : vector<1x16x128xbf16> to vector<16x128xbf16>
    %cst_67 = arith.constant dense<0.000000e+00> : vector<16x128xf32>
    %89 = tpu.matmul %86, %88, %cst_67 {dimension_numbers = #tpu.dot_dimension_numbers<[1], [0], [0], [1], [0, 0, 1, 1], [], []>} : vector<16x16xbf16>, vector<16x128xbf16>, vector<16x128xf32> -> vector<16x128xf32>
    %90 = arith.addf %80, %89 : vector<16x128xf32>
    %c0_68 = arith.constant 0 : index
    %91 = memref.load %arg4[%c0_68] : memref<1xf32, #tpu.memory_space<smem>>
    %92 = vector.broadcast %91 : f32 to vector<16x128xf32>
    %93 = arith.addf %90, %92 : vector<16x128xf32>
    %94 = arith.negf %93 : vector<16x128xf32>
    %95 = math.exp %94 : vector<16x128xf32>
    %cst_69 = arith.constant 1.000000e+00 : f32
    %96 = vector.broadcast %cst_69 : f32 to vector<16x128xf32>
    %97 = arith.addf %96, %95 : vector<16x128xf32>
    %98 = arith.divf %96, %97 : vector<16x128xf32>
    %c0_70 = arith.constant 0 : index
    %c0_71 = arith.constant 0 : index
    %c0_72 = arith.constant 0 : index
    %99 = vector.load %arg5[%c0_70, %c0_71, %c0_72] : memref<1x16x128xf32, #tpu.memory_space<vmem>>, vector<1x16x128xf32>
    %100 = vector.shape_cast %99 : vector<1x16x128xf32> to vector<16x128xf32>
    %101 = vector.shape_cast %98 : vector<16x128xf32> to vector<1x16x128xf32>
    tpu.vector_store %arg5[%c0_70, %c0_71, %c0_72], %101 {strides = array<i32>} : memref<1x16x128xf32, #tpu.memory_space<vmem>>, vector<1x16x128xf32>,
    return
  }
  func.func @transform_0(%arg0: i32, %arg1: i32) -> (i32, i32, i32, i32) {
    %c0_i32 = arith.constant 0 : i32
    %c0_i32_0 = arith.constant 0 : i32
    %c0_i32_1 = arith.constant 0 : i32
    %c0_i32_2 = arith.constant 0 : i32
    return %arg0, %c0_i32, %c0_i32_0, %c0_i32_1 : i32, i32, i32, i32
  }
  func.func @transform_1(%arg0: i32, %arg1: i32) -> (i32, i32, i32) {
    %c0_i32 = arith.constant 0 : i32
    %c0_i32_0 = arith.constant 0 : i32
    %c0_i32_1 = arith.constant 0 : i32
    %c0_i32_2 = arith.constant 0 : i32
    return %c0_i32, %c0_i32_0, %c0_i32_1 : i32, i32, i32
  }
  func.func @transform_2(%arg0: i32, %arg1: i32) -> i32 {
    %c0_i32 = arith.constant 0 : i32
    %c0_i32_0 = arith.constant 0 : i32
    return %c0_i32 : i32
  }
  func.func @transform_3(%arg0: i32, %arg1: i32) -> (i32, i32, i32) {
    %c0_i32 = arith.constant 0 : i32
    %c0_i32_0 = arith.constant 0 : i32
    return %arg0, %arg1, %c0_i32 : i32, i32, i32
  }
}

</mosaic_0001>

<bundles_post_ra>
// kernel: seg_d_net_forward.5
= control target key start
LH: loop header
LB: loop body
LE: loop exit
PB: predicated region body
PF: predicated region fallthrough
CT: control target
= control target key end

     0   :  { %s1738_s14 = smov 0   ;;  %s1740_s15 = smov 0   ;;  %s1934_s0 = inlined_call_operand.vmem [shape: bf16[2,6,6,16], index: 0, kind: input, shape index: {}]   ;;  %s1935_s1 = inlined_call_operand.vmem [shape: bf16[9,16,128], index: 1, kind: input, shape index: {}]   ;;  %s1936_s2 = inlined_call_operand.<no memory space> [shape: f32[1], index: 2, kind: input, shape index: {}]   ;;  %s1937_s3 = inlined_call_operand.vmem [shape: f32[2,16,128], index: 3, kind: output, shape index: {}]  }
   0x1   :  { %8 = sst [smem:[#allocation2]] %s1936_s2  ;;  %s1742_s16 = smov 0  }
   0x2 LB: > { %s26_s2 = sadd.s32 1, %s1706_s15  ;;  %p1456_p0 = scmp.ge.s32.totalorder %s1710_s16, 1  ;;  %s1710_s16 = sphi %s1742_s16, %s14_s16   ;;  %s1706_s15 = sphi %s1740_s15, %s1945_s15   ;;  %s1702_s14 = sphi %s1738_s14, %s1944_s14  }
   0x3   : > { %p28_p1 = scmp.ge.s32.totalorder %s26_s2, 2  ;;  %p152_p2 = scmp.lt.s32.totalorder %s1710_s16, 3 }
   0x5   : > { %s1947_s2 = smov (%p28_p1, %s26_s2), 0  ;;  %p153_p3 = pnand %p1456_p0, %p152_p2 }
   0x6   : > { %v1659_v0 = vld [vmem:[%s1935_s1 + $0x8] sm:$0xff] (!%p153_p3)   ;;  %v1712_v1 = vmov (!%p153_p3), 0.0   ;;  %v1660_v2 = vld [vmem:[%s1935_s1] sm:$0xff] (!%p153_p3)   ;;  %vm1713_vm0 = vmmov (!%p153_p3), 0   ;;  %p180_p4 = scmp.lt.s32.totalorder (!%p153_p3), %s1702_s14, 1  ;;  %v316_v3 = vlaneseq (!%p153_p3)  ;;  %vm490_vm6 = vcmask (!%p153_p3), 1040384  }
   0x7   : > { %156 = sbr.rel (%p153_p3) target bundleno = 319 (0x13f), region = 32  ;;  %1577 = vmatprep.subr.bf16.mxu0 (!%p153_p3), %v1712_v1  ;;  %1583 = vmatprep.subr.bf16.mxu1 (!%p153_p3), %v1712_v1  ;;  %v1714_v4 = vmov (!%p153_p3), 1983009808   ;;  %vm245_vm1 = vsmask.f32 (!%p153_p3), 1280  ;;  %vm491_vm7 = vcmask (!%p153_p3), 1042434  }
   0x8   : > { %1578 = vmatpush3.bf16.msra.mxu0 (!%p153_p3), %v1659_v0  ;;  %1579 = vmatprep.mubr.msk.bf16.mxu0 (!%p153_p3), %vm1713_vm0, %v1712_v1  ;;  %v314_v5 = vunpack.c.l.s4 (!%p153_p3), %v1714_v4  ;;  %vm246_vm2 = vsmask.f32 (!%p153_p3), 3336  ;;  %vm248_vm3 = vsmask.f32 (!%p153_p3), 5392  ;;  %v317_v6 = vshrl.u32 (!%p153_p3), %v316_v3, 7  ;;  %vm1792_vm13 = vmor (!%p153_p3), %vm490_vm6, %vm491_vm7  ;;  %v1664_v52 = vld [vmem:[%s1935_s1 + $0x18] sm:$0xff] (!%p153_p3)  }
   0x9   : > { %1584 = vmatpush3.bf16.msra.mxu1 (!%p153_p3), %v1660_v2  ;;  %1585 = vmatprep.mubr.msk.bf16.mxu1 (!%p153_p3), %vm1713_vm0, %v1712_v1  ;;  %vm250_vm4 = vsmask.f32 (!%p153_p3), 7448  ;;  %vm247_vm5 = vmor (!%p153_p3), %vm245_vm1, %vm246_vm2  ;;  %vm493_vm8 = vcmask (!%p153_p3), 1044484   ;;  %vm495_vm9 = vcmask (!%p153_p3), 1046534   ;;  %vm334_vm11 = vcmask (!%p153_p3), 130048   ;;  %s1343_s12 = sld [smem:[#allocation2]] (!%p153_p3) }
   0xa   : > { %1589 = vmatprep.subr.bf16.mxu0 (!%p153_p3), %v1712_v1  ;;  %1595 = vmatprep.subr.bf16.mxu1 (!%p153_p3), %v1712_v1  ;;  %v315_v7 = vunpack.c.0.s8 (!%p153_p3), %v314_v5  ;;  %vm249_vm10 = vmor (!%p153_p3), %vm247_vm5, %vm248_vm3 }
   0xb   : > { %vm1786_vm12 = vmor (!%p153_p3), %vm249_vm10, %vm250_vm4 }
   0xc   : > { %v1783_v21 = vsub.s32 (!%p153_p3), %v315_v7, %v317_v6  ;;  %vm494_vm14 = vmor (!%p153_p3), %vm1792_vm13, %vm493_vm8 }
   0xd   : > { %vm1815_vm15 = vmor (!%p153_p3), %vm494_vm14, %vm495_vm9 }
   0xe   : > { %s1949_s14 = smov (!%p180_p4, %s1702_s14), 1 }
   0xf   : > { %s1631_s21 = smul.u32 24, %s1949_s14  ;;  %s1558_s13 = sshll.u32 %s1949_s14, 4 }
  0x10   : > { %s193_s19 = scalar_lea.vmem %s1937_s3, %s1558_s13 }
  0x11   : > { %s1776_s24 = scalar_lea.vmem %s1934_s0, %s1631_s21 }
  0x12   : > { %v1460_v8 = vld.sshfl [vmem:[%s1776_s24] sm:$0x13 pattern:$0x76325410] }
  0x13   : > { %v1461_v9 = vld.sshfl [vmem:[%s1776_s24 + $0x4] sm:$0x13 pattern:$0x76325410]  ;;  %v220_v10 = vcombine.high %v1460_v8, %v1460_v8  ;;  %v253_v11 = vshrl.u32 %v1460_v8, 16  ;;  %v256_v12 = vshll.u32 %v1460_v8, 16 }
  0x14   : > { %v1462_v13 = vld.sshfl [vmem:[%s1776_s24 + $0x8] sm:$0x13 pattern:$0x76325410]  ;;  %v228_v14 = vcombine.high %v1461_v9, %v1461_v9  ;;  %v267_v15 = vshrl.u32 %v1461_v9, 16  ;;  %v270_v16 = vshll.u32 %v1461_v9, 16 }
  0x15   : > { %v1463_v17 = vld.sshfl [vmem:[%s1776_s24 + $0xc] sm:$0x13 pattern:$0x76325410]  ;;  %v236_v18 = vcombine.high %v1462_v13, %v1462_v13  ;;  %v255_v19 = vrot.slane %v253_v11, 6  ;;  %v258_v20 = vrot.slane %v256_v12, 7 }
  0x16   : > { %v244_v22 = vcombine.high %v1463_v17, %v1463_v17  ;;  %v262_v23 = vshll.u32 %v220_v10, 16  ;;  %v269_v24 = vrot.slane %v267_v15, 6  ;;  %v272_v25 = vrot.slane %v270_v16, 7 }
  0x17   : > { %v259_v27 = vor.u32 %v258_v20, %v255_v19  ;;  %v276_v28 = vshll.u32 %v228_v14, 16  ;;  %v281_v29 = vshrl.u32 %v1462_v13, 16  ;;  %v284_v30 = vshll.u32 %v1462_v13, 16 }
  0x18   : > { %v264_v31 = vrot.slane %v262_v23, 7  ;;  %v273_v32 = vor.u32 %v272_v25, %v269_v24  ;;  %v290_v33 = vshll.u32 %v236_v18, 16  ;;  %v295_v34 = vshrl.u32 %v1463_v17, 16  ;;  %v1668_v23 = vld [vmem:[%s1935_s1 + $0x28] sm:$0xff]  }
  0x19   : > { %v260_v36 = vrot.slane %v259_v27, 2  ;;  %v278_v37 = vrot.slane %v276_v28, 7  ;;  %v283_v38 = vrot.slane %v281_v29, 6  ;;  %v286_v39 = vrot.slane %v284_v30, 7 }
  0x1a   : > { %v1682_v40 = vld.sshfl [vmem:[%s1776_s24] sm:$0xf pattern:$0x76325410]  ;;  %v274_v41 = vrot.slane %v273_v32, 2  ;;  %v292_v42 = vrot.slane %v290_v33, 7 }
  0x1b   : > { %v297_v43 = vrot.slane %v295_v34, 6  ;;  %v298_v44 = vshll.u32 %v1463_v17, 16  ;;  %v1683_v45 = vld.sshfl [vmem:[%s1776_s24 + $0x8] sm:$0xf pattern:$0x76325410]  ;;  %v265_v46 = vsel %vm1786_vm12, %v260_v36, %v264_v31  ;;  %v287_v47 = vor.u32 %v286_v39, %v283_v38 }
  0x1c   : > { %v304_v48 = vshll.u32 %v244_v22, 16  ;;  %v1470_v49 = vld.sshfl [vmem:[%s1776_s24] sm:$0x12 pattern:$0x76325410]  ;;  %v1806_v50 = vsel %vm1786_vm12, %v274_v41, %v278_v37  ;;  %v399_v60 = vcombine.low %v1682_v40, %v1683_v45  ;;  %v1663_v33 = vld [vmem:[%s1935_s1 + $0x10] sm:$0xff]  }
  0x1d   : > { %v300_v51 = vrot.slane %v298_v44, 7  ;;  %v1471_v53 = vld.sshfl [vmem:[%s1776_s24 + $0x4] sm:$0x12 pattern:$0x76325410]  ;;  %v465_v54 = vcombine.high %v1470_v49, %v1470_v49  ;;  %v288_v55 = vrot.slane %v287_v47, 2  ;;  %v311_v3 = vcombine.low %v265_v46, %v1806_v50 }
  0x1e   : > { %v306_v56 = vrot.slane %v304_v48, 7  ;;  %v1472_v57 = vld.sshfl [vmem:[%s1776_s24 + $0x8] sm:$0x12 pattern:$0x76325410]  ;;  %v473_v58 = vcombine.high %v1471_v53, %v1471_v53  ;;  %v1474_v0 = vrot.slane %v1470_v49, 9  ;;  %1586 = vmatmul.mubr.msk.bf16.vlgmr.msra.gmra.mrb[0].mxu1 %vm334_vm11, %v399_v60 }
  0x1f   : > { %v301_v59 = vor.u32 %v300_v51, %v297_v43  ;;  %v1473_v61 = vld.sshfl [vmem:[%s1776_s24 + $0xc] sm:$0x12 pattern:$0x76325410]  ;;  %v481_v62 = vcombine.high %v1472_v57, %v1472_v57  ;;  %v1821_v2 = vsel %vm1786_vm12, %v288_v55, %v292_v42  ;;  %v499_v5 = vrot.slane %v465_v54, 7  ;;  %1596 = vmatpush3.bf16.msra.mxu1 %v1664_v52  ;;  %1597 = vmatprep.mubr.msk.bf16.mxu1 %vm1713_vm0, %v1712_v1 }
  0x20   : > { %v489_v4 = vcombine.high %v1473_v61, %v1473_v61  ;;  %v1475_v7 = vrot.slane %v1471_v53, 9  ;;  %v503_v8 = vrot.slane %v473_v58, 7  ;;  %v1476_v9 = vrot.slane %v1472_v57, 9  ;;  %1607 = vmatprep.subr.bf16.mxu1 %v1712_v1 }
  0x21   : > { %v302_v6 = vrot.slane %v301_v59, 2  ;;  %v500_v10 = vsel %vm1815_vm15, %v1474_v0, %v499_v5  ;;  %v507_v11 = vrot.slane %v481_v62, 7  ;;  %v1477_v12 = vrot.slane %v1473_v61, 9  ;;  %v1665_v61 = vld [vmem:[%s1935_s1 + $0x20] sm:$0xff]  }
  0x22   : > { %v511_v13 = vrot.slane %v489_v4, 7  ;;  %v504_v15 = vsel %vm1815_vm15, %v1475_v7, %v503_v8  ;;  %v1684_v16 = vld.sshfl [vmem:[%s1776_s24 + $0x4] sm:$0xf pattern:$0x76325410]  ;;  %v319_v19 = vrot.slane %v311_v3, %v1783_v21  ;;  %v767_v53 = vcombine.low %v1806_v50, %v1821_v2  ;;  %v1670_v4 = vld [vmem:[%s1935_s1 + $0x38] sm:$0xff]  }
  0x23   : > { %v1831_v14 = vsel %vm1786_vm12, %v302_v6, %v306_v56  ;;  %v1685_v17 = vld.sshfl [vmem:[%s1776_s24 + $0xc] sm:$0xf pattern:$0x76325410]  ;;  %v508_v20 = vsel %vm1815_vm15, %v1476_v9, %v507_v11  ;;  %v516_v25 = vcombine.low %v500_v10, %v504_v15 }
  0x24   : > { %v312_v18 = vcombine.low %v1821_v2, %v1831_v14  ;;  %v512_v22 = vsel %vm1815_vm15, %v1477_v12, %v511_v13  ;;  %v1497_v24 = vld.sshfl [vmem:[%s1776_s24 + $0x10] sm:$0x13 pattern:$0x76325410]  ;;  %v615_v34 = vcombine.low %v1684_v16, %v1685_v17  ;;  %v895_v42 = vcombine.low %v504_v15, %v508_v20 }
  0x25   : > { %v707_v27 = vcombine.high %v1497_v24, %v1497_v24  ;;  %v1509_v28 = vld.sshfl [vmem:[%s1776_s24 + $0x10] sm:$0x12 pattern:$0x76325410]  ;;  %v517_v30 = vcombine.low %v508_v20, %v512_v22  ;;  %v751_v31 = vshrl.u32 %v1497_v24, 16  ;;  %v754_v32 = vshll.u32 %v1497_v24, 16 }
  0x26   : > { %v1851_v29 = vrot.slane %v312_v18, %v1783_v21  ;;  %v875_v39 = vcombine.high %v1509_v28, %v1509_v28  ;;  %v524_v40 = vrot.slane %v516_v25, %v1783_v21  ;;  %1598 = vmatmul.mubr.msk.bf16.vlgmr.msra.gmra.mrb[4].mxu1 %vm334_vm11, %v615_v34  ;;  %v1513_v41 = vrot.slane %v1509_v28, 9  ;;  %v1533_v47 = vld.sshfl [vmem:[%s1776_s24 + $0x14] sm:$0x13 pattern:$0x76325410]  ;;  %v1673_v24 = vld [vmem:[%s1935_s1 + $0x40] sm:$0xff]  }
  0x27   : > { %v760_v35 = vshll.u32 %v707_v27, 16  ;;  %v753_v37 = vrot.slane %v751_v31, 6  ;;  %v756_v38 = vrot.slane %v754_v32, 7  ;;  %v1861_v43 = vrot.slane %v517_v30, %v1783_v21  ;;  %1608 = vmatpush3.bf16.msra.mxu1 %v1668_v23  ;;  %1609 = vmatprep.mubr.msk.bf16.mxu1 %vm1713_vm0, %v1712_v1  ;;  %v1669_v16 = vld [vmem:[%s1935_s1 + $0x30] sm:$0xff]  }
  0x28   : > { %v327_v36 = vcombine.low %v319_v19, %v1851_v29  ;;  %v890_v46 = vrot.slane %v875_v39, 7  ;;  %v1086_v51 = vcombine.high %v1533_v47, %v1533_v47  ;;  %v1130_v52 = vshrl.u32 %v1533_v47, 16  ;;  %1619 = vmatprep.subr.bf16.mxu1 %v1712_v1  ;;  %v1545_v2 = vld.sshfl [vmem:[%s1776_s24 + $0x14] sm:$0x12 pattern:$0x76325410] }
  0x29   : > { %v757_v44 = vor.u32 %v756_v38, %v753_v37  ;;  %v762_v45 = vrot.slane %v760_v35, 7  ;;  %v903_v55 = vrot.slane %v895_v42, %v1783_v21  ;;  %v1133_v56 = vshll.u32 %v1533_v47, 16  ;;  %v1686_v13 = vld.sshfl [vmem:[%s1776_s24 + $0x8] sm:$0xf pattern:$0x76325410] }
  0x2a   : > { %1580 = vmatmul.mubr.msk.bf16.vlgmr.msra.gmra.mrb[0].mxu0 %vm334_vm11, %v327_v36  ;;  %v891_v49 = vsel %vm1815_vm15, %v1513_v41, %v890_v46  ;;  %v532_v57 = vcombine.low %v524_v40, %v1861_v43  ;;  %v1132_v59 = vrot.slane %v1130_v52, 6  ;;  %v1139_v60 = vshll.u32 %v1086_v51, 16 }
  0x2b   : > { %1590 = vmatpush3.bf16.msra.mxu0 %v1663_v33  ;;  %1591 = vmatprep.mubr.msk.bf16.mxu0 %vm1713_vm0, %v1712_v1  ;;  %v758_v48 = vrot.slane %v757_v44, 2  ;;  %v896_v54 = vcombine.low %v512_v22, %v891_v49  ;;  %v1135_v0 = vrot.slane %v1133_v56, 7  ;;  %v775_v7 = vrot.slane %v767_v53, %v1783_v21 }
  0x2c   : > { %1601 = vmatprep.subr.bf16.mxu0 %v1712_v1  ;;  %v1141_v6 = vrot.slane %v1139_v60, 7  ;;  %v1254_v10 = vcombine.high %v1545_v2, %v1545_v2  ;;  %v1549_v17 = vrot.slane %v1545_v2, 9 }
  0x2d   : > { %v763_v58 = vsel %vm1786_vm12, %v758_v48, %v762_v45  ;;  %v910_v50 = vrot.slane %v896_v54, %v1783_v21  ;;  %v1136_v5 = vor.u32 %v1135_v0, %v1132_v59 }
  0x2e   : > { %v768_v62 = vcombine.low %v1831_v14, %v763_v58  ;;  %v1687_v14 = vld.sshfl [vmem:[%s1776_s24 + $0x10] sm:$0xf pattern:$0x76325410]  ;;  %v1269_v18 = vrot.slane %v1254_v10, 7  ;;  %v1344_v10 = vstv %s1343_s12 }
  0x2f   : > { %v911_v3 = vcombine.low %v903_v55, %v910_v50  ;;  %v1137_v9 = vrot.slane %v1136_v5, 2  ;;  %v994_v22 = vcombine.low %v1686_v13, %v1687_v14 }
  0x30   : > { %v782_v8 = vrot.slane %v768_v62, %v1783_v21  ;;  %v1270_v26 = vsel %vm1815_vm15, %v1549_v17, %v1269_v18 }
  0x31   : > { %1610 = vmatmul.mubr.msk.bf16.vlgmr.msra.gmra.mrb[8].mxu1 %vm334_vm11, %v911_v3  ;;  %v1142_v11 = vsel %vm1786_vm12, %v1137_v9, %v1141_v6  ;;  %v1275_v23 = vcombine.low %v891_v49, %v1270_v26 }
  0x32   : > { %1592 = vmatmul.mubr.msk.bf16.vlgmr.msra.gmra.mrb[4].mxu0 %vm334_vm11, %v532_v57  ;;  %1620 = vmatpush3.bf16.msra.mxu1 %v1670_v4  ;;  %v783_v12 = vcombine.low %v775_v7, %v782_v8  ;;  %v1147_v15 = vcombine.low %v763_v58, %v1142_v11 }
  0x33   : > { %1602 = vmatpush3.bf16.msra.mxu0 %v1665_v61  ;;  %1603 = vmatprep.mubr.msk.bf16.mxu0 %vm1713_vm0, %v1712_v1  ;;  %v1289_v25 = vrot.slane %v1275_v23, %v1783_v21 }
  0x34   : > { %1613 = vmatprep.subr.bf16.mxu0 %v1712_v1  ;;  %1621 = vmatprep.mubr.msk.bf16.mxu1 %vm1713_vm0, %v1712_v1  ;;  %v1161_v19 = vrot.slane %v1147_v15, %v1783_v21 }
  0x35   : > { %v1290_v63 = vcombine.low %v1861_v43, %v1289_v25 }
  0x36   : > { %v1162_v20 = vcombine.low %v1851_v29, %v1161_v19 }
  0x39   : > { %1622 = vmatmul.mubr.msk.bf16.vlgmr.msra.gmra.mrb[12].mxu1 %vm334_vm11, %v1162_v20 }
  0x3a   : > { %1604 = vmatmul.mubr.msk.bf16.vlgmr.msra.gmra.mrb[8].mxu0 %vm334_vm11, %v783_v12 }
  0x3b   : > { %1614 = vmatpush3.bf16.msra.mxu0 %v1669_v16  ;;  %1615 = vmatprep.mubr.msk.bf16.mxu0 %vm1713_vm0, %v1712_v1 }
  0x3c   : > { %1625 = vmatprep.subr.bf16.mxu0 %v1712_v1 }
  0x42   : > { %1616 = vmatmul.mubr.msk.bf16.vlgmr.msra.gmra.mrb[12].mxu0 %vm334_vm11, %v994_v22 }
  0x43   : > { %1626 = vmatpush3.bf16.msra.mxu0 %v1673_v24  ;;  %1627 = vmatprep.mubr.msk.bf16.mxu0 %vm1713_vm0, %v1712_v1 }
  0x4a   : > { %1628 = vmatmul.mubr.msk.bf16.vlgmr.msra.gmra.mrb[16].mxu0 %vm334_vm11, %v1290_v63 }
  0xf1   : > { %v443_v27 = vpop.f32.mrb[0].mxu1 }
  0xf2   : > { %v1587_v28 = vpop.f32.mrb[1].mxu1 }
  0xf3   : > { %v446_v29 = vpop.f32.mrb[2].mxu1 }
  0xf4   : > { %v1588_v30 = vpop.f32.mrb[3].mxu1 }
  0xf9   : > { %v659_v31 = vpop.f32.mrb[4].mxu1 }
  0xfa   : > { %v1599_v33 = vpop.f32.mrb[5].mxu1 }
  0xfb   : > { %v662_v36 = vpop.f32.mrb[6].mxu1 }
  0xfc   : > { %v1600_v21 = vpop.f32.mrb[7].mxu1 }
  0xfd   : > { %v372_v32 = vpop.f32.mrb[0].mxu0 }
  0xfe   : > { %v444_v34 = vadd.f32 %v443_v27, %v372_v32  ;;  %v1581_v35 = vpop.f32.mrb[1].mxu0 }
  0xff   : > { %v375_v37 = vpop.f32.mrb[2].mxu0 }
 0x100   : > { %v447_v38 = vadd.f32 %v446_v29, %v375_v37  ;;  %v1582_v39 = vpop.f32.mrb[3].mxu0 }
 0x104   : > { %v955_v43 = vpop.f32.mrb[8].mxu1 }
 0x105   : > { %v576_v40 = vpop.f32.mrb[4].mxu0  ;;  %v1611_v47 = vpop.f32.mrb[9].mxu1 }
 0x106   : > { %v583_v1 = vadd.f32 %v576_v40, %v444_v34  ;;  %v1593_v41 = vpop.f32.mrb[5].mxu0  ;;  %v958_v48 = vpop.f32.mrb[10].mxu1 }
 0x107   : > { %v579_v42 = vpop.f32.mrb[6].mxu0  ;;  %v1612_v51 = vpop.f32.mrb[11].mxu1 }
 0x108   : > { %v584_v44 = vadd.f32 %v579_v42, %v447_v38  ;;  %v666_v45 = vadd.f32 %v659_v31, %v583_v1  ;;  %v1594_v46 = vpop.f32.mrb[7].mxu0 }
 0x10a   : > { %v667_v49 = vadd.f32 %v662_v36, %v584_v44 }
 0x10c   : > { %v1206_v56 = vpop.f32.mrb[12].mxu1 }
 0x10d   : > { %v827_v52 = vpop.f32.mrb[8].mxu0  ;;  %v1623_v60 = vpop.f32.mrb[13].mxu1 }
 0x10e   : > { %v834_v53 = vadd.f32 %v827_v52, %v666_v45  ;;  %v1605_v54 = vpop.f32.mrb[9].mxu0  ;;  %v1209_v61 = vpop.f32.mrb[14].mxu1 }
 0x10f   : > { %v830_v55 = vpop.f32.mrb[10].mxu0  ;;  %v1624_v50 = vpop.f32.mrb[15].mxu1 }
 0x110   : > { %v835_v57 = vadd.f32 %v830_v55, %v667_v49  ;;  %v962_v58 = vadd.f32 %v955_v43, %v834_v53  ;;  %v1606_v59 = vpop.f32.mrb[11].mxu0 }
 0x112   : > { %v963_v62 = vadd.f32 %v958_v48, %v835_v57 }
 0x115   : > { %v1038_v0 = vpop.f32.mrb[12].mxu0 }
 0x116   : > { %v1045_v2 = vadd.f32 %v1038_v0, %v962_v58  ;;  %v1617_v3 = vpop.f32.mrb[13].mxu0 }
 0x117   : > { %v1041_v4 = vpop.f32.mrb[14].mxu0 }
 0x118   : > { %v1046_v5 = vadd.f32 %v1041_v4, %v963_v62  ;;  %v1213_v6 = vadd.f32 %v1206_v56, %v1045_v2  ;;  %v1618_v7 = vpop.f32.mrb[15].mxu0 }
 0x11a   : > { %v1214_v8 = vadd.f32 %v1209_v61, %v1046_v5 }
 0x11d   : > { %v1334_v9 = vpop.f32.mrb[16].mxu0 }
 0x11e   : > { %v1341_v11 = vadd.f32 %v1334_v9, %v1213_v6  ;;  %v1629_v12 = vpop.f32.mrb[17].mxu0 }
 0x11f   : > { %v1337_v13 = vpop.f32.mrb[18].mxu0 }
 0x120   : > { %v1345_v14 = vadd.f32 %v1344_v10, %v1341_v11  ;;  %v1342_v15 = vadd.f32 %v1337_v13, %v1214_v8  ;;  %v1630_v16 = vpop.f32.mrb[19].mxu0 }
 0x122   : > { %v1554_v17 = vmul.f32 -1.442695, %v1345_v14  ;;  %v1346_v18 = vadd.f32 %v1344_v10, %v1342_v15 }
 0x124   : > { %1674 = vpow2.f32 %v1554_v17  ;;  %v1555_v19 = vmul.f32 -1.442695, %v1346_v18 }
 0x126   : > { %1676 = vpow2.f32 %v1555_v19 }
 0x12e   : > { %v1675_v20 = vpop.eup %1674 }
 0x12f   : > { %v1353_v26 = vadd.f32 1.0, %v1675_v20 }
 0x130   : > { %v1677_v22 = vpop.eup %1676 }
 0x131   : > { %1678 = vrcp.f32 %v1353_v26  ;;  %v1354_v23 = vadd.f32 1.0, %v1677_v22 }
 0x133   : > { %1680 = vrcp.f32 %v1354_v23 }
 0x13b   : > { %v1679_v24 = vpop.eup %1678 }
 0x13c   : > { %1359 = vst [vmem:[%s193_s19] sm:$0xff] %v1679_v24 }
 0x13d   : > { %v1681_v25 = vpop.eup %1680 }
 0x13e   : > { %1360 = vst [vmem:[%s193_s19 + $0x8] sm:$0xff] %v1681_v25 }
 0x13f PF: > { %s14_s16 = sadd.s32 1, %s1710_s16   ;;  %s1944_s14 = smov %s1706_s15 }
 0x140   : > { %p11_p5 = scmp.ge.s32.totalorder %s14_s16, 4   ;;  %s1945_s15 = smov %s1947_s2 }
 0x142   :  { %13 = sbr.rel (!%p11_p5) target bundleno = 2 (0x2), region = 73 }

// kernel: seg_d_net_forward.4
= control target key start
LH: loop header
LB: loop body
LE: loop exit
PB: predicated region body
PF: predicated region fallthrough
CT: control target
= control target key end

     0   :  { %s2828_s9 = smov 0   ;;  %s2830_s10 = smov 0   ;;  %s3171_s0 = inlined_call_operand.vmem [shape: bf16[2,2,2,5,5,8], index: 0, kind: input, shape index: {}]   ;;  %s3172_s1 = inlined_call_operand.vmem [shape: bf16[16,8,128], index: 1, kind: input, shape index: {}]   ;;  %s3173_s2 = inlined_call_operand.vmem [shape: bf16[2,16,128], index: 2, kind: output, shape index: {}]  }
   0x1   :  { %s2832_s11 = smov 0   ;;  %s2834_s12 = smov 0  }
   0x2   :  { %s2836_s13 = smov 0  }
   0x3 LB: > { %s24_s14 = sadd.s32 1, %s2804_s12  ;;  %p38_p1 = scmp.ne.s32.totalorder %s2796_s10, %s2792_s9  ;;  %s2808_s13 = sphi %s2836_s13, %s12_s13   ;;  %s2804_s12 = sphi %s2834_s12, %s3179_s12   ;;  %s2800_s11 = sphi %s2832_s11, %s3178_s11   ;;  %s2796_s10 = sphi %s2830_s10, %s3177_s10   ;;  %s2792_s9 = sphi %s2828_s9, %s3176_s9  }
   0x4   : > { %p26_p0 = scmp.ge.s32.totalorder %s24_s14, 2  ;;  %p39_p2 = scmp.eq.s32.totalorder %s2808_s13, 0 }
   0x5   : > { %s31_s16 = sadd.s32 1, %s2796_s10  ;;  %p2370_p5 = scmp.ge.s32.totalorder %s2808_s13, 2 }
   0x6   : > { %s3181_s14 = smov (%p26_p0, %s24_s14), 0  ;;  %p40_p3 = por %p39_p2, %p38_p1 }
   0x7   : > { %s28_s15 = ssub.s32 %s2804_s12, %s3181_s14  ;;  %116 = sbr.rel (%p2370_p5) target bundleno = 25 (0x19), region = 20 }
   0x8   : > { %p29_p4 = scmp.eq.s32.totalorder %s28_s15, 0 }
   0xa   : > { %s2863_s17 = scalar_select %p29_p4, %s2796_s10, %s31_s16  }
   0xe   : > { %119 = sbr.rel (!%p40_p3) target bundleno = 25 (0x19), region = 24  ;;  %s121_s18 = sand.u32 (%p40_p3), 1, %s2796_s10  }
   0xf   : > { %s2693_s19 = smul.u32 (%p40_p3), 20, %s2804_s12 }
  0x10   : > { %s2692_s20 = smul.u32 (%p40_p3), 80, %s121_s18 }
  0x11   : > { %s126_s23 = scalar_lea.vmem (%p40_p3), %s3171_s0, %s2693_s19 }
  0x12   : > { %v142_v0 = vld [vmem:[%s126_s23] sm:$0xff] (%p40_p3)   ;;  %v146_v1 = vld [vmem:[%s126_s23 + $0x8] sm:$0xff] (%p40_p3)   ;;  %v150_v2 = vld [vmem:[%s126_s23 + $0x10] sm:$0xf] (%p40_p3)  ;;  %s123_s24 = scalar_lea.vmem (%p40_p3), [#allocation2], %s2692_s20 }
  0x13   : > { %143 = vst [vmem:[%s123_s24] sm:$0xff] (%p40_p3), %v142_v0   ;;  %147 = vst [vmem:[%s123_s24 + $0x8] sm:$0xff] (%p40_p3), %v146_v1   ;;  %v152_v3 = vld [vmem:[%s126_s23 + $0x28] sm:$0xff] (%p40_p3)   ;;  %v156_v4 = vld [vmem:[%s126_s23 + $0x30] sm:$0xff] (%p40_p3)  }
  0x14   : > { %151 = vst [vmem:[%s123_s24 + $0x10] sm:$0xf] (%p40_p3), %v150_v2  ;;  %v160_v5 = vld [vmem:[%s126_s23 + $0x38] sm:$0xf] (%p40_p3)  ;;  %153 = vst [vmem:[%s123_s24 + $0x14] sm:$0xff] (%p40_p3), %v152_v3   ;;  %v162_v6 = vld [vmem:[%s126_s23 + $0x50] sm:$0xff] (%p40_p3)  }
  0x15   : > { %157 = vst [vmem:[%s123_s24 + $0x1c] sm:$0xff] %v156_v4   ;;  %161 = vst [vmem:[%s123_s24 + $0x24] sm:$0xf] %v160_v5  ;;  %v166_v7 = vld [vmem:[%s126_s23 + $0x58] sm:$0xff]   ;;  %v170_v8 = vld [vmem:[%s126_s23 + $0x60] sm:$0xf] }
  0x16   : > { %163 = vst [vmem:[%s123_s24 + $0x28] sm:$0xff] %v162_v6   ;;  %167 = vst [vmem:[%s123_s24 + $0x30] sm:$0xff] %v166_v7   ;;  %v172_v9 = vld [vmem:[%s126_s23 + $0x78] sm:$0xff]   ;;  %v176_v10 = vld [vmem:[%s126_s23 + $0x80] sm:$0xff]  }
  0x17   : > { %171 = vst [vmem:[%s123_s24 + $0x38] sm:$0xf] %v170_v8  ;;  %v180_v11 = vld [vmem:[%s126_s23 + $0x88] sm:$0xf]  ;;  %173 = vst [vmem:[%s123_s24 + $0x3c] sm:$0xff] %v172_v9  }
  0x18   : > { %177 = vst [vmem:[%s123_s24 + $0x44] sm:$0xff] %v176_v10   ;;  %181 = vst [vmem:[%s123_s24 + $0x4c] sm:$0xf] %v180_v11 }
  0x19 PF: > { %p2372_p6 = scmp.ge.s32.totalorder %s2808_s13, 1  ;;  %p243_p7 = scmp.lt.s32.totalorder %s2808_s13, 3 }
  0x1b   : > { %p244_p8 = pnand %p2372_p6, %p243_p7 }
  0x1c   : > { %v2379_v12 = vld [vmem:[%s3172_s1 + $0x4] sm:$0xf] (!%p244_p8)  ;;  %vm328_vm0 = vcmask (!%p244_p8), 1043456   ;;  %v2434_v13 = vld [vmem:[%s3172_s1 + $0x20] sm:$0xf] (!%p244_p8)  ;;  %v312_v14 = vlaneseq (!%p244_p8)  ;;  %v2810_v15 = vmov (!%p244_p8), 0.0  }
  0x1d   : > { %247 = sbr.rel (%p244_p8) target bundleno = 353 (0x161), region = 65  ;;  %2538 = vmatprep.subr.bf16.mxu1 (!%p244_p8), %v2810_v15  ;;  %2586 = vmatprep.subr.bf16.mxu0 (!%p244_p8), %v2810_v15  ;;  %v330_v16 = vsel (!%p244_p8), %vm328_vm0, %v2379_v12, 0  ;;  %v1296_v17 = vsel (!%p244_p8), %vm328_vm0, %v2434_v13, 0  ;;  %s250_s29 = sand.u32 (!%p244_p8), 1, %s2792_s9   ;;  %v2811_v18 = vmov (!%p244_p8), 1983009808  }
  0x1e   : > { %2539 = vmatpush3.bf16.msra.mxu1 (!%p244_p8), %v330_v16  ;;  %2587 = vmatpush3.bf16.msra.mxu0 (!%p244_p8), %v1296_v17  ;;  %s2694_s30 = smul.u32 (!%p244_p8), 80, %s250_s29  ;;  %v310_v19 = vunpack.c.l.s4 (!%p244_p8), %v2811_v18  ;;  %v313_v20 = vshrl.u32 (!%p244_p8), %v312_v14, 7  ;;  %v293_v21 = vld [vmem:[%s3172_s1] sm:$0xf] (!%p244_p8)  ;;  %vm2812_vm1 = vmmov (!%p244_p8), 0   ;;  %vm324_vm2 = vcmask (!%p244_p8), 64512  }
  0x1f   : > { %2540 = vmatprep.mubr.msk.bf16.mxu1 (!%p244_p8), %vm2812_vm1, %v2810_v15  ;;  %2544 = vmatprep.subr.bf16.mxu1 (!%p244_p8), %v2810_v15  ;;  %v2440_v22 = vld [vmem:[%s3172_s1 + $0x24] sm:$0xf] (!%p244_p8)  ;;  %v398_v24 = vsel (!%p244_p8), %vm328_vm0, %v293_v21, 0  ;;  %v2386_v31 = vld [vmem:[%s3172_s1 + $0x8] sm:$0xf] (!%p244_p8)  ;;  %p276_p9 = scmp.lt.s32.totalorder (!%p244_p8), %s2800_s11, 1 }
  0x20   : > { %2588 = vmatprep.mubr.msk.bf16.mxu0 (!%p244_p8), %vm2812_vm1, %v2810_v15  ;;  %2592 = vmatprep.subr.bf16.mxu0 (!%p244_p8), %v2810_v15  ;;  %v311_v23 = vunpack.c.0.s8 (!%p244_p8), %v310_v19  ;;  %v1375_v25 = vsel (!%p244_p8), %vm328_vm0, %v2440_v22, 0  ;;  %s2898_s7 = scalar_lea.vmem (!%p244_p8), [#allocation2], %s2694_s30  ;;  %v567_v38 = vsel (!%p244_p8), %vm328_vm0, %v2386_v31, 0  ;;  %vm481_vm3 = vsmask.f32 (!%p244_p8), 1280 }
  0x21   : > { %v2754_v26 = vld.sshfl [vmem:[%s2898_s7 + $0x14] sm:$0xf pattern:$0x76325410] (!%p244_p8)  ;;  %vm482_vm4 = vsmask.f32 (!%p244_p8), 3336 }
  0x22   : > { %v2755_v27 = vld.sshfl [vmem:[%s2898_s7 + $0x1c] sm:$0xf pattern:$0x76325410] (!%p244_p8)  ;;  %v2902_v28 = vsub.s32 (!%p244_p8), %v311_v23, %v313_v20  ;;  %vm483_vm5 = vmor (!%p244_p8), %vm481_vm3, %vm482_vm4  ;;  %vm484_vm6 = vsmask.f32 (!%p244_p8), 5392 }
  0x23   : > { %v2756_v29 = vld.sshfl [vmem:[%s2898_s7 + $0x4] sm:$0xf pattern:$0x76325410] (!%p244_p8)  ;;  %v323_v32 = vcombine.low (!%p244_p8), %v2754_v26, %v2755_v27  ;;  %vm486_vm7 = vsmask.f32 (!%p244_p8), 7448  ;;  %vm485_vm8 = vmor (!%p244_p8), %vm483_vm5, %vm484_vm6 }
  0x24   : > { %v2757_v30 = vld.sshfl [vmem:[%s2898_s7 + $0xc] sm:$0xf pattern:$0x76325410]  ;;  %v2450_v55 = vld [vmem:[%s3172_s1 + $0x28] sm:$0xf]  ;;  %vm2939_vm9 = vmor %vm485_vm8, %vm486_vm7 }
  0x25   : > { %v2758_v33 = vld.sshfl [vmem:[%s2898_s7] sm:$0xf pattern:$0x76325410]  ;;  %2541 = vmatmul.mubr.msk.bf16.vlgmr.msra.gmra.mrb[0].mxu1 %vm324_vm2, %v323_v32  ;;  %v1291_v35 = vcombine.low %v2756_v29, %v2757_v30  ;;  %v2396_v0 = vld [vmem:[%s3172_s1 + $0xc] sm:$0xf] }
  0x26   : > { %v2759_v34 = vld.sshfl [vmem:[%s2898_s7 + $0x8] sm:$0xf pattern:$0x76325410]  ;;  %2545 = vmatpush3.bf16.msra.mxu1 %v398_v24  ;;  %2546 = vmatprep.mubr.msk.bf16.mxu1 %vm2812_vm1, %v2810_v15  ;;  %v1539_v10 = vsel %vm328_vm0, %v2450_v55, 0  ;;  %v2946_v18 = vsel %vm328_vm0, %v2396_v0, 0 }
  0x27   : > { %v2913_v36 = vld.sshfl [vmem:[%s2898_s7 + $0x18] sm:$0xf pattern:$0x76325410]  ;;  %2589 = vmatmul.mubr.msk.bf16.vlgmr.msra.gmra.mrb[0].mxu0 %vm324_vm2, %v1291_v35  ;;  %2550 = vmatprep.subr.bf16.mxu1 %v2810_v15  ;;  %v393_v44 = vcombine.low %v2758_v33, %v2759_v34  ;;  %s3183_s11 = smov (!%p276_p9, %s2800_s11), 1 }
  0x28   : > { %v2916_v37 = vld.sshfl [vmem:[%s2898_s7 + $0x20] sm:$0xf pattern:$0x76325410]  ;;  %2593 = vmatpush3.bf16.msra.mxu0 %v1375_v25  ;;  %2594 = vmatprep.mubr.msk.bf16.mxu0 %vm2812_vm1, %v2810_v15  ;;  %s2498_s15 = sshll.u32 %s3183_s11, 3 }
  0x29   : > { %v2382_v39 = vld.sshfl [vmem:[%s2898_s7] sm:$0x13 pattern:$0x76325410]  ;;  %2598 = vmatprep.subr.bf16.mxu0 %v2810_v15  ;;  %v1370_v45 = vcombine.low %v2913_v36, %v2916_v37  ;;  %s283_s19 = scalar_lea.vmem %s3173_s2, %s2498_s15 }
  0x2a   : > { %v2383_v40 = vld.sshfl [vmem:[%s2898_s7 + $0x4] sm:$0x13 pattern:$0x76325410]  ;;  %v456_v42 = vcombine.high %v2382_v39, %v2382_v39  ;;  %v489_v49 = vshrl.u32 %v2382_v39, 16  ;;  %v492_v50 = vshll.u32 %v2382_v39, 16 }
  0x2b   : > { %v2384_v41 = vld.sshfl [vmem:[%s2898_s7 + $0x8] sm:$0x13 pattern:$0x76325410]  ;;  %v464_v43 = vcombine.high %v2383_v40, %v2383_v40  ;;  %v503_v52 = vshrl.u32 %v2383_v40, 16  ;;  %v506_v53 = vshll.u32 %v2383_v40, 16 }
  0x2c   : > { %v2385_v46 = vld.sshfl [vmem:[%s2898_s7 + $0xc] sm:$0x13 pattern:$0x76325410]  ;;  %v472_v47 = vcombine.high %v2384_v41, %v2384_v41  ;;  %v498_v51 = vshll.u32 %v456_v42, 16  ;;  %v491_v56 = vrot.slane %v489_v49, 6 }
  0x2d   : > { %v480_v48 = vcombine.high %v2385_v46, %v2385_v46  ;;  %v512_v54 = vshll.u32 %v464_v43, 16  ;;  %v494_v57 = vrot.slane %v492_v50, 7  ;;  %v517_v58 = vshrl.u32 %v2384_v41, 16 }
  0x2e   : > { %v520_v59 = vshll.u32 %v2384_v41, 16  ;;  %v500_v60 = vrot.slane %v498_v51, 7  ;;  %v505_v61 = vrot.slane %v503_v52, 6  ;;  %v508_v62 = vrot.slane %v506_v53, 7 }
  0x2f   : > { %v514_v63 = vrot.slane %v512_v54, 7  ;;  %v495_v1 = vor.u32 %v494_v57, %v491_v56  ;;  %v519_v2 = vrot.slane %v517_v58, 6  ;;  %v526_v4 = vshll.u32 %v472_v47, 16 }
  0x30   : > { %v522_v3 = vrot.slane %v520_v59, 7  ;;  %v509_v6 = vor.u32 %v508_v62, %v505_v61  ;;  %v531_v7 = vshrl.u32 %v2385_v46, 16  ;;  %v534_v8 = vshll.u32 %v2385_v46, 16 }
  0x31   : > { %v540_v9 = vshll.u32 %v480_v48, 16  ;;  %v496_v11 = vrot.slane %v495_v1, 2  ;;  %v528_v13 = vrot.slane %v526_v4, 7  ;;  %2547 = vmatmul.mubr.msk.bf16.vlgmr.msra.gmra.mrb[0].mxu1 %vm324_vm2, %v393_v44 }
  0x32   : > { %v523_v12 = vor.u32 %v522_v3, %v519_v2  ;;  %v510_v14 = vrot.slane %v509_v6, 2  ;;  %v533_v16 = vrot.slane %v531_v7, 6  ;;  %v536_v17 = vrot.slane %v534_v8, 7  ;;  %2551 = vmatpush3.bf16.msra.mxu1 %v567_v38  ;;  %2552 = vmatprep.mubr.msk.bf16.mxu1 %vm2812_vm1, %v2810_v15  ;;  %v2460_v6 = vld [vmem:[%s3172_s1 + $0x2c] sm:$0xf] }
  0x33   : > { %v501_v19 = vsel %vm2939_vm9, %v496_v11, %v500_v60  ;;  %v542_v21 = vrot.slane %v540_v9, 7  ;;  %v2449_v22 = vld.sshfl [vmem:[%s2898_s7 + $0x10] sm:$0x13 pattern:$0x76325410]  ;;  %2595 = vmatmul.mubr.msk.bf16.vlgmr.msra.gmra.mrb[0].mxu0 %vm324_vm2, %v1370_v45  ;;  %2556 = vmatprep.subr.bf16.mxu1 %v2810_v15 }
  0x34   : > { %v524_v20 = vrot.slane %v523_v12, 2  ;;  %v515_v23 = vsel %vm2939_vm9, %v510_v14, %v514_v63  ;;  %v537_v24 = vor.u32 %v536_v17, %v533_v16  ;;  %v1459_v25 = vcombine.high %v2449_v22, %v2449_v22  ;;  %v2392_v27 = vld.sshfl [vmem:[%s2898_s7 + $0x14] sm:$0x13 pattern:$0x76325410]  ;;  %2599 = vmatpush3.bf16.msra.mxu0 %v1539_v10  ;;  %2600 = vmatprep.mubr.msk.bf16.mxu0 %vm2812_vm1, %v2810_v15 }
  0x35   : > { %v1503_v26 = vshrl.u32 %v2449_v22, 16  ;;  %v546_v30 = vcombine.low %v501_v19, %v515_v23  ;;  %v1506_v31 = vshll.u32 %v2449_v22, 16  ;;  %v2393_v32 = vld.sshfl [vmem:[%s2898_s7 + $0x18] sm:$0x13 pattern:$0x76325410]  ;;  %v627_v33 = vcombine.high %v2392_v27, %v2392_v27  ;;  %2604 = vmatprep.subr.bf16.mxu0 %v2810_v15 }
  0x36   : > { %v529_v29 = vsel %vm2939_vm9, %v524_v20, %v528_v13  ;;  %v538_v34 = vrot.slane %v537_v24, 2  ;;  %v1512_v36 = vshll.u32 %v1459_v25, 16  ;;  %v2394_v40 = vld.sshfl [vmem:[%s2898_s7 + $0x1c] sm:$0x13 pattern:$0x76325410]  ;;  %v635_v41 = vcombine.high %v2393_v32, %v2393_v32 }
  0x37   : > { %v1505_v35 = vrot.slane %v1503_v26, 6  ;;  %v1518_v37 = vcombine.low %v515_v23, %v529_v29  ;;  %v554_v38 = vrot.slane %v546_v30, %v2902_v28  ;;  %v1508_v39 = vrot.slane %v1506_v31, 7  ;;  %v2395_v46 = vld.sshfl [vmem:[%s2898_s7 + $0x20] sm:$0x13 pattern:$0x76325410] }
  0x38   : > { %v653_v42 = vshrl.u32 %v2392_v27, 16  ;;  %v543_v43 = vsel %vm2939_vm9, %v538_v34, %v542_v21  ;;  %v1514_v44 = vrot.slane %v1512_v36, 7  ;;  %v643_v47 = vcombine.high %v2394_v40, %v2394_v40  ;;  %v2459_v14 = vld.sshfl [vmem:[%s2898_s7 + $0x24] sm:$0x13 pattern:$0x76325410] }
  0x39   : > { %v1526_v45 = vrot.slane %v1518_v37, %v2902_v28  ;;  %v547_v48 = vcombine.low %v529_v29, %v543_v43  ;;  %v1509_v49 = vor.u32 %v1508_v39, %v1505_v35  ;;  %v651_v50 = vcombine.high %v2395_v46, %v2395_v46 }
  0x3a   : > { %v655_v51 = vrot.slane %v653_v42, 6  ;;  %v656_v52 = vshll.u32 %v2392_v27, 16  ;;  %v662_v53 = vshll.u32 %v627_v33, 16  ;;  %v667_v54 = vshrl.u32 %v2393_v32, 16 }
  0x3b   : > { %v670_v55 = vshll.u32 %v2393_v32, 16  ;;  %v561_v56 = vrot.slane %v547_v48, %v2902_v28  ;;  %v1510_v57 = vrot.slane %v1509_v49, 2  ;;  %v676_v58 = vshll.u32 %v635_v41, 16  ;;  %v2466_v48 = vld [vmem:[%s3172_s1 + $0x30] sm:$0xf] }
  0x3c   : > { %v681_v59 = vshrl.u32 %v2394_v40, 16  ;;  %v658_v60 = vrot.slane %v656_v52, 7  ;;  %v664_v61 = vrot.slane %v662_v53, 7  ;;  %v669_v62 = vrot.slane %v667_v54, 6 }
  0x3d   : > { %v672_v63 = vrot.slane %v670_v55, 7  ;;  %v562_v0 = vcombine.low %v554_v38, %v561_v56  ;;  %v1515_v1 = vsel %vm2939_vm9, %v1510_v57, %v1514_v44  ;;  %v678_v2 = vrot.slane %v676_v58, 7  ;;  %v2402_v44 = vld [vmem:[%s3172_s1 + $0x10] sm:$0xf] }
  0x3e   : > { %v683_v3 = vrot.slane %v681_v59, 6  ;;  %v1519_v4 = vcombine.low %v543_v43, %v1515_v1  ;;  %v659_v7 = vor.u32 %v658_v60, %v655_v51  ;;  %v684_v9 = vshll.u32 %v2394_v40, 16  ;;  %v3004_v49 = vld.sshfl [vmem:[%s2898_s7 + $0x28] sm:$0xf pattern:$0x76325410] }
  0x3f   : > { %v673_v8 = vor.u32 %v672_v63, %v669_v62  ;;  %2553 = vmatmul.mubr.msk.bf16.vlgmr.msra.gmra.mrb[0].mxu1 %vm324_vm2, %v562_v0  ;;  %v690_v10 = vshll.u32 %v643_v47, 16  ;;  %v695_v11 = vshrl.u32 %v2395_v46, 16  ;;  %v698_v12 = vshll.u32 %v2395_v46, 16  ;;  %v2408_v1 = vld [vmem:[%s3172_s1 + $0x14] sm:$0xf] }
  0x40   : > { %v704_v13 = vshll.u32 %v651_v50, 16  ;;  %2557 = vmatpush3.bf16.msra.mxu1 %v2946_v18  ;;  %v1533_v16 = vrot.slane %v1519_v4, %v2902_v28  ;;  %2558 = vmatprep.mubr.msk.bf16.mxu1 %vm2812_vm1, %v2810_v15  ;;  %v660_v17 = vrot.slane %v659_v7, 2  ;;  %v686_v20 = vrot.slane %v684_v9, 7 }
  0x41   : > { %v674_v19 = vrot.slane %v673_v8, 2  ;;  %v1703_v21 = vsel %vm328_vm0, %v2460_v6, 0  ;;  %2562 = vmatprep.subr.bf16.mxu1 %v2810_v15  ;;  %v692_v22 = vrot.slane %v690_v10, 7  ;;  %v697_v23 = vrot.slane %v695_v11, 6 }
  0x42   : > { %v700_v24 = vrot.slane %v698_v12, 7  ;;  %v1534_v25 = vcombine.low %v1526_v45, %v1533_v16  ;;  %v665_v26 = vsel %vm2939_vm9, %v660_v17, %v664_v61  ;;  %v687_v27 = vor.u32 %v686_v20, %v683_v3  ;;  %v2414_v52 = vld.sshfl [vmem:[%s2898_s7 + $0x28] sm:$0x13 pattern:$0x76325410] }
  0x43   : > { %v679_v18 = vsel %vm2939_vm9, %v674_v19, %v678_v2  ;;  %v706_v30 = vrot.slane %v704_v13, 7  ;;  %v1623_v31 = vcombine.high %v2459_v14, %v2459_v14  ;;  %v1667_v34 = vshrl.u32 %v2459_v14, 16  ;;  %v2415_v54 = vld.sshfl [vmem:[%s2898_s7 + $0x2c] sm:$0x13 pattern:$0x76325410] }
  0x44   : > { %v701_v29 = vor.u32 %v700_v24, %v697_v23  ;;  %2601 = vmatmul.mubr.msk.bf16.vlgmr.msra.gmra.mrb[0].mxu0 %vm324_vm2, %v1534_v25  ;;  %v688_v32 = vrot.slane %v687_v27, 2  ;;  %v710_v33 = vcombine.low %v665_v26, %v679_v18  ;;  %v1670_v35 = vshll.u32 %v2459_v14, 16  ;;  %v2416_v58 = vld.sshfl [vmem:[%s2898_s7 + $0x30] sm:$0x13 pattern:$0x76325410] }
  0x45   : > { %2605 = vmatpush3.bf16.msra.mxu0 %v1703_v21  ;;  %2606 = vmatprep.mubr.msk.bf16.mxu0 %vm2812_vm1, %v2810_v15  ;;  %v1676_v37 = vshll.u32 %v1623_v31, 16  ;;  %v1669_v39 = vrot.slane %v1667_v34, 6  ;;  %v810_v53 = vsel %vm328_vm0, %v2402_v44, 0  ;;  %v1782_v57 = vsel %vm328_vm0, %v2466_v48, 0  ;;  %v2472_v48 = vld [vmem:[%s3172_s1 + $0x34] sm:$0xf] }
  0x46   : > { %v702_v36 = vrot.slane %v701_v29, 2  ;;  %2610 = vmatprep.subr.bf16.mxu0 %v2810_v15  ;;  %v693_v38 = vsel %vm2939_vm9, %v688_v32, %v692_v22  ;;  %v1672_v40 = vrot.slane %v1670_v35, 7  ;;  %v718_v43 = vrot.slane %v710_v33, %v2902_v28  ;;  %v2417_v62 = vld.sshfl [vmem:[%s2898_s7 + $0x34] sm:$0x13 pattern:$0x76325410] }
  0x47   : > { %v1678_v46 = vrot.slane %v1676_v37, 7  ;;  %v1682_v47 = vcombine.low %v679_v18, %v693_v38  ;;  %v949_v59 = vcombine.high %v2414_v52, %v2414_v52  ;;  %v957_v63 = vcombine.high %v2415_v54, %v2415_v54  ;;  %v2763_v0 = vld.sshfl [vmem:[%s2898_s7 + $0x30] sm:$0xf pattern:$0x76325410] }
  0x48   : > { %v707_v41 = vsel %vm2939_vm9, %v702_v36, %v706_v30  ;;  %v1673_v45 = vor.u32 %v1672_v40, %v1669_v39  ;;  %v965_v2 = vcombine.high %v2416_v58, %v2416_v58  ;;  %v973_v3 = vcombine.high %v2417_v62, %v2417_v62  ;;  %v3026_v11 = vld.sshfl [vmem:[%s2898_s7 + $0x2c] sm:$0xf pattern:$0x76325410] }
  0x49   : > { %v711_v42 = vcombine.low %v693_v38, %v707_v41  ;;  %v1690_v61 = vrot.slane %v1682_v47, %v2902_v28  ;;  %v975_v4 = vshrl.u32 %v2414_v52, 16  ;;  %v978_v6 = vshll.u32 %v2414_v52, 16  ;;  %v3030_v20 = vld.sshfl [vmem:[%s2898_s7 + $0x34] sm:$0xf pattern:$0x76325410] }
  0x4a   : > { %v1674_v51 = vrot.slane %v1673_v45, 2  ;;  %v984_v8 = vshll.u32 %v949_v59, 16  ;;  %v989_v9 = vshrl.u32 %v2415_v54, 16  ;;  %v992_v10 = vshll.u32 %v2415_v54, 16 }
  0x4b   : > { %v725_v50 = vrot.slane %v711_v42, %v2902_v28  ;;  %v977_v12 = vrot.slane %v975_v4, 6  ;;  %v980_v13 = vrot.slane %v978_v6, 7  ;;  %v998_v14 = vshll.u32 %v957_v63, 16 }
  0x4c   : > { %v1679_v56 = vsel %vm2939_vm9, %v1674_v51, %v1678_v46  ;;  %v1003_v16 = vshrl.u32 %v2416_v58, 16  ;;  %v889_v19 = vsel %vm328_vm0, %v2408_v1, 0  ;;  %v3033_v21 = vld.sshfl [vmem:[%s2898_s7 + $0x3c] sm:$0xf pattern:$0x76325410] }
  0x4d   : > { %v726_v55 = vcombine.low %v718_v43, %v725_v50  ;;  %v1683_v60 = vcombine.low %v707_v41, %v1679_v56  ;;  %v991_v22 = vrot.slane %v989_v9, 6  ;;  %v994_v23 = vrot.slane %v992_v10, 7  ;;  %v3036_v24 = vld.sshfl [vmem:[%s2898_s7 + $0x44] sm:$0xf pattern:$0x76325410] }
  0x4e   : > { %v981_v25 = vor.u32 %v980_v13, %v977_v12  ;;  %v1005_v26 = vrot.slane %v1003_v16, 6  ;;  %v1006_v18 = vshll.u32 %v2416_v58, 16  ;;  %v2481_v27 = vld.sshfl [vmem:[%s2898_s7 + $0x38] sm:$0x13 pattern:$0x76325410]  ;;  %v805_v43 = vcombine.low %v3004_v49, %v2763_v0 }
  0x4f   : > { %2559 = vmatmul.mubr.msk.bf16.vlgmr.msra.gmra.mrb[0].mxu1 %vm324_vm2, %v726_v55  ;;  %v1697_v7 = vrot.slane %v1683_v60, %v2902_v28  ;;  %v3041_v29 = vld.sshfl [vmem:[%s2898_s7 + $0x40] sm:$0xf pattern:$0x76325410]  ;;  %v986_v30 = vrot.slane %v984_v8, 7  ;;  %v995_v31 = vor.u32 %v994_v23, %v991_v22  ;;  %v1017_v32 = vshrl.u32 %v2417_v62, 16 }
  0x50   : > { %2563 = vmatpush3.bf16.msra.mxu1 %v810_v53  ;;  %2564 = vmatprep.mubr.msk.bf16.mxu1 %vm2812_vm1, %v2810_v15  ;;  %v1020_v33 = vshll.u32 %v2417_v62, 16  ;;  %v3046_v34 = vld.sshfl [vmem:[%s2898_s7 + $0x48] sm:$0xf pattern:$0x76325410]  ;;  %v1000_v35 = vrot.slane %v998_v14, 7  ;;  %v1945_v54 = vcombine.high %v2481_v27, %v2481_v27  ;;  %v1777_v60 = vcombine.low %v3026_v11, %v3030_v20 }
  0x51   : > { %2568 = vmatprep.subr.bf16.mxu1 %v2810_v15  ;;  %v1698_v17 = vcombine.low %v1690_v61, %v1697_v7  ;;  %v1008_v36 = vrot.slane %v1006_v18, 7  ;;  %v1012_v37 = vshll.u32 %v965_v2, 16  ;;  %v1026_v38 = vshll.u32 %v973_v3, 16  ;;  %v2418_v50 = vld [vmem:[%s3172_s1 + $0x18] sm:$0xf] }
  0x52   : > { %v982_v39 = vrot.slane %v981_v25, 2  ;;  %v996_v40 = vrot.slane %v995_v31, 2  ;;  %v1019_v41 = vrot.slane %v1017_v32, 6  ;;  %v1022_v42 = vrot.slane %v1020_v33, 7 }
  0x53   : > { %2607 = vmatmul.mubr.msk.bf16.vlgmr.msra.gmra.mrb[0].mxu0 %vm324_vm2, %v1698_v17  ;;  %v1009_v44 = vor.u32 %v1008_v36, %v1005_v26  ;;  %v1989_v45 = vshrl.u32 %v2481_v27, 16  ;;  %v1992_v47 = vshll.u32 %v2481_v27, 16  ;;  %v1014_v51 = vrot.slane %v1012_v37, 7 }
  0x54   : > { %2611 = vmatpush3.bf16.msra.mxu0 %v1782_v57  ;;  %2612 = vmatprep.mubr.msk.bf16.mxu0 %vm2812_vm1, %v2810_v15  ;;  %v1023_v46 = vor.u32 %v1022_v42, %v1019_v41  ;;  %v3058_v52 = vsel %vm2939_vm9, %v982_v39, %v986_v30  ;;  %v3062_v49 = vsel %vm2939_vm9, %v996_v40, %v1000_v35  ;;  %v1028_v53 = vrot.slane %v1026_v38, 7  ;;  %v2425_v55 = vld.sshfl [vmem:[%s2898_s7 + $0x40] sm:$0x13 pattern:$0x76325410] }
  0x55   : > { %2616 = vmatprep.subr.bf16.mxu0 %v2810_v15  ;;  %v1010_v56 = vrot.slane %v1009_v44, 2  ;;  %v1991_v58 = vrot.slane %v1989_v45, 6  ;;  %v1994_v59 = vrot.slane %v1992_v47, 7  ;;  %v1861_v61 = vsel %vm328_vm0, %v2472_v48, 0  ;;  %v2482_v47 = vld [vmem:[%s3172_s1 + $0x38] sm:$0xf] }
  0x56   : > { %v1024_v57 = vrot.slane %v1023_v46, 2  ;;  %v2424_v62 = vld.sshfl [vmem:[%s2898_s7 + $0x3c] sm:$0x13 pattern:$0x76325410]  ;;  %v884_v63 = vcombine.low %v3033_v21, %v3036_v24  ;;  %v1053_v0 = vsel %vm328_vm0, %v2418_v50, 0  ;;  %v1856_v1 = vcombine.low %v3041_v29, %v3046_v34 }
  0x57   : > { %v2426_v2 = vld.sshfl [vmem:[%s2898_s7 + $0x44] sm:$0x13 pattern:$0x76325410]  ;;  %v1121_v3 = vcombine.high %v2425_v55, %v2425_v55  ;;  %v1032_v4 = vcombine.low %v3058_v52, %v3062_v49  ;;  %v1998_v6 = vshll.u32 %v1945_v54, 16  ;;  %v1153_v8 = vshrl.u32 %v2425_v55, 16 }
  0x58   : > { %v1129_v7 = vcombine.high %v2426_v2, %v2426_v2  ;;  %v3083_v9 = vsel %vm2939_vm9, %v1010_v56, %v1014_v51  ;;  %v3087_v10 = vsel %vm2939_vm9, %v1024_v57, %v1028_v53  ;;  %v1995_v11 = vor.u32 %v1994_v59, %v1991_v58  ;;  %v2427_v12 = vld.sshfl [vmem:[%s2898_s7 + $0x48] sm:$0x13 pattern:$0x76325410]  ;;  %v2428_v29 = vld [vmem:[%s3172_s1 + $0x1c] sm:$0xf] }
  0x59   : > { %v1156_v13 = vshll.u32 %v2425_v55, 16  ;;  %v1139_v14 = vshrl.u32 %v2424_v62, 16  ;;  %v1142_v16 = vshll.u32 %v2424_v62, 16  ;;  %v1155_v17 = vrot.slane %v1153_v8, 6 }
  0x5a   : > { %v1113_v20 = vcombine.high %v2424_v62, %v2424_v62  ;;  %v1137_v21 = vcombine.high %v2427_v12, %v2427_v12  ;;  %v1162_v23 = vshll.u32 %v1121_v3, 16  ;;  %v2000_v24 = vrot.slane %v1998_v6, 7  ;;  %v2491_v33 = vld.sshfl [vmem:[%s2898_s7 + $0x4c] sm:$0x13 pattern:$0x76325410] }
  0x5b   : > { %2565 = vmatmul.mubr.msk.bf16.vlgmr.msra.gmra.mrb[0].mxu1 %vm324_vm2, %v805_v43  ;;  %v1158_v22 = vrot.slane %v1156_v13, 7  ;;  %v1170_v26 = vshll.u32 %v2426_v2, 16  ;;  %v1176_v18 = vshll.u32 %v1129_v7, 16  ;;  %v1033_v27 = vcombine.low %v3083_v9, %v3087_v10 }
  0x5c   : > { %2569 = vmatpush3.bf16.msra.mxu1 %v889_v19  ;;  %2570 = vmatprep.mubr.msk.bf16.mxu1 %vm2812_vm1, %v2810_v15  ;;  %v1167_v19 = vshrl.u32 %v2426_v2, 16  ;;  %v1996_v30 = vrot.slane %v1995_v11, 2  ;;  %v1181_v32 = vshrl.u32 %v2427_v12, 16  ;;  %v1141_v35 = vrot.slane %v1139_v14, 6 }
  0x5d   : > { %2574 = vmatprep.subr.bf16.mxu1 %v2810_v15  ;;  %v1159_v31 = vor.u32 %v1158_v22, %v1155_v17  ;;  %v1144_v36 = vrot.slane %v1142_v16, 7  ;;  %v1172_v37 = vrot.slane %v1170_v26, 7  ;;  %v1184_v38 = vshll.u32 %v2427_v12, 16 }
  0x5e   : > { %v1169_v25 = vrot.slane %v1167_v19, 6  ;;  %v1164_v40 = vrot.slane %v1162_v23, 7  ;;  %v1183_v41 = vrot.slane %v1181_v32, 6  ;;  %v1190_v42 = vshll.u32 %v1137_v21, 16  ;;  %v2492_v21 = vld [vmem:[%s3172_s1 + $0x3c] sm:$0xf] }
  0x5f   : > { %2613 = vmatmul.mubr.msk.bf16.vlgmr.msra.gmra.mrb[0].mxu0 %vm324_vm2, %v1777_v60  ;;  %v1160_v39 = vrot.slane %v1159_v31, 2  ;;  %v1178_v44 = vrot.slane %v1176_v18, 7  ;;  %v1186_v45 = vrot.slane %v1184_v38, 7  ;;  %v2109_v46 = vcombine.high %v2491_v33, %v2491_v33 }
  0x60   : > { %2617 = vmatpush3.bf16.msra.mxu0 %v1861_v61  ;;  %2618 = vmatprep.mubr.msk.bf16.mxu0 %vm2812_vm1, %v2810_v15  ;;  %v1173_v43 = vor.u32 %v1172_v37, %v1169_v25  ;;  %v2001_v48 = vsel %vm2939_vm9, %v1996_v30, %v2000_v24  ;;  %v1148_v50 = vshll.u32 %v1113_v20, 16  ;;  %v2153_v51 = vshrl.u32 %v2491_v33, 16 }
  0x61   : > { %2622 = vmatprep.subr.bf16.mxu0 %v2810_v15  ;;  %v2156_v52 = vshll.u32 %v2491_v33, 16  ;;  %v1145_v53 = vor.u32 %v1144_v36, %v1141_v35  ;;  %v1187_v55 = vor.u32 %v1186_v45, %v1183_v41  ;;  %v2162_v56 = vshll.u32 %v2109_v46, 16 }
  0x62   : > { %v1174_v54 = vrot.slane %v1173_v43, 2  ;;  %v1165_v57 = vsel %vm2939_vm9, %v1160_v39, %v1164_v40  ;;  %v1192_v58 = vrot.slane %v1190_v42, 7  ;;  %v2155_v59 = vrot.slane %v2153_v51, 6 }
  0x63   : > { %v2158_v60 = vrot.slane %v2156_v52, 7  ;;  %v2025_v61 = vsel %vm328_vm0, %v2482_v47, 0  ;;  %v1040_v62 = vrot.slane %v1032_v4, %v2902_v28  ;;  %v1047_v2 = vrot.slane %v1033_v27, %v2902_v28 }
  0x64   : > { %v2004_v3 = vcombine.low %v3062_v49, %v3083_v9  ;;  %v2164_v7 = vrot.slane %v2162_v56, 7  ;;  %v2005_v8 = vcombine.low %v3087_v10, %v2001_v48  ;;  %v1146_v11 = vrot.slane %v1145_v53, 2 }
  0x65   : > { %v2159_v6 = vor.u32 %v2158_v60, %v2155_v59  ;;  %v1150_v4 = vrot.slane %v1148_v50, 7  ;;  %v1048_v34 = vcombine.low %v1040_v62, %v1047_v2  ;;  %v1217_v19 = vsel %vm328_vm0, %v2428_v29, 0 }
  0x66   : > { %v2019_v10 = vrot.slane %v2005_v8, %v2902_v28  ;;  %v2189_v25 = vsel %vm328_vm0, %v2492_v21, 0 }
  0x67   : > { %2571 = vmatmul.mubr.msk.bf16.vlgmr.msra.gmra.mrb[0].mxu1 %vm324_vm2, %v884_v63  ;;  %v1179_v63 = vsel %vm2939_vm9, %v1174_v54, %v1178_v44  ;;  %v2160_v49 = vrot.slane %v2159_v6, 2  ;;  %v1151_v14 = vsel %vm2939_vm9, %v1146_v11, %v1150_v4 }
  0x68   : > { %2575 = vmatpush3.bf16.msra.mxu1 %v1053_v0  ;;  %2576 = vmatprep.mubr.msk.bf16.mxu1 %vm2812_vm1, %v2810_v15  ;;  %v1188_v0 = vrot.slane %v1187_v55, 2  ;;  %v2168_v12 = vcombine.low %v1165_v57, %v1179_v63  ;;  %v1196_v22 = vcombine.low %v1151_v14, %v1165_v57 }
  0x69   : > { %2580 = vmatprep.subr.bf16.mxu1 %v2810_v15  ;;  %v2165_v9 = vsel %vm2939_vm9, %v2160_v49, %v2164_v7 }
  0x6a   : > { %v1193_v13 = vsel %vm2939_vm9, %v1188_v0, %v1192_v58  ;;  %v2176_v17 = vrot.slane %v2168_v12, %v2902_v28  ;;  %v1204_v26 = vrot.slane %v1196_v22, %v2902_v28 }
  0x6b   : > { %2619 = vmatmul.mubr.msk.bf16.vlgmr.msra.gmra.mrb[0].mxu0 %vm324_vm2, %v1856_v1  ;;  %v2012_v1 = vrot.slane %v2004_v3, %v2902_v28  ;;  %v2169_v16 = vcombine.low %v1193_v13, %v2165_v9  ;;  %v1197_v23 = vcombine.low %v1179_v63, %v1193_v13 }
  0x6c   : > { %2623 = vmatpush3.bf16.msra.mxu0 %v2025_v61  ;;  %2624 = vmatprep.mubr.msk.bf16.mxu0 %vm2812_vm1, %v2810_v15 }
  0x6d   : > { %2628 = vmatprep.subr.bf16.mxu0 %v2810_v15  ;;  %v2183_v20 = vrot.slane %v2169_v16, %v2902_v28  ;;  %v2020_v24 = vcombine.low %v2012_v1, %v2019_v10  ;;  %v1211_v18 = vrot.slane %v1197_v23, %v2902_v28 }
  0x6f   : > { %v2184_v5 = vcombine.low %v2176_v17, %v2183_v20  ;;  %v1212_v27 = vcombine.low %v1204_v26, %v1211_v18 }
  0x73   : > { %2577 = vmatmul.mubr.msk.bf16.vlgmr.msra.gmra.mrb[0].mxu1 %vm324_vm2, %v1048_v34 }
  0x74   : > { %2581 = vmatpush3.bf16.msra.mxu1 %v1217_v19  ;;  %2582 = vmatprep.mubr.msk.bf16.mxu1 %vm2812_vm1, %v2810_v15 }
  0x77   : > { %2625 = vmatmul.mubr.msk.bf16.vlgmr.msra.gmra.mrb[0].mxu0 %vm324_vm2, %v2020_v24 }
  0x78   : > { %2629 = vmatpush3.bf16.msra.mxu0 %v2189_v25  ;;  %2630 = vmatprep.mubr.msk.bf16.mxu0 %vm2812_vm1, %v2810_v15 }
  0x7f   : > { %2583 = vmatmul.mubr.msk.bf16.vlgmr.msra.gmra.mrb[0].mxu1 %vm324_vm2, %v1212_v27 }
  0x83   : > { %2631 = vmatmul.mubr.msk.bf16.vlgmr.msra.gmra.mrb[0].mxu0 %vm324_vm2, %v2184_v5 }
 0x152   : > { %v1253_v30 = vpop.f32.mrb[0].mxu1 }
 0x153   : > { %v2584_v31 = vpop.f32.mrb[1].mxu1 }
 0x154   : > { %v1256_v32 = vpop.f32.mrb[2].mxu1 }
 0x155   : > { %v2585_v33 = vpop.f32.mrb[3].mxu1 }
 0x156   : > { %v2225_v35 = vpop.f32.mrb[0].mxu0 }
 0x157   : > { %v2634_v36 = vadd.f32 %v2225_v35, %v1253_v30  ;;  %v2632_v28 = vpop.f32.mrb[1].mxu0 }
 0x158   : > { %v2228_v37 = vpop.f32.mrb[2].mxu0 }
 0x159   : > { %v2236_v38 = vmul.f32 0.2, %v2634_v36  ;;  %v2635_v39 = vadd.f32 %v2228_v37, %v1256_v32  ;;  %v2633_v40 = vpop.f32.mrb[3].mxu0  ;;  %vm2234_vm10 = vcmp.ge.f32.partialorder %v2634_v36, 0.0 }
 0x15b   : > { %vm2235_vm11 = vcmp.ge.f32.partialorder %v2635_v39, 0.0  ;;  %v2237_v15 = vmul.f32 0.2, %v2635_v39  ;;  %v2238_v41 = vsel %vm2234_vm10, %v2634_v36, %v2236_v38 }
 0x15d   : > { %v2239_v42 = vsel %vm2235_vm11, %v2635_v39, %v2237_v15 }
 0x15e   : > { %v2504_v43 = vpack.c.bf16 %v2239_v42, %v2238_v41 }
 0x160   : > { %2505 = vst [vmem:[%s283_s19] sm:$0xff] %v2504_v43  }
 0x161 PF: > { %s12_s13 = sadd.s32 1, %s2808_s13   ;;  %s3176_s9 = smov %s2796_s10 }
 0x162   : > { %p9_p10 = scmp.ge.s32.totalorder %s12_s13, 4   ;;  %s3177_s10 = smov %s2863_s17 }
 0x163   : > { %s3178_s11 = smov %s2804_s12  ;;  %s3179_s12 = smov %s3181_s14 }
 0x164   :  { %11 = sbr.rel (!%p9_p10) target bundleno = 3 (0x3), region = 127 }

// kernel: seg_d_net_forward.3
= control target key start
LH: loop header
LB: loop body
LE: loop exit
PB: predicated region body
PF: predicated region fallthrough
CT: control target
= control target key end

     0   :  { %s4343_s9 = smov 0   ;;  %s4345_s10 = smov 0   ;;  %s4986_s0 = inlined_call_operand.vmem [shape: bf16[2,2,2,9,9,8], index: 0, kind: input, shape index: {}]   ;;  %s4987_s1 = inlined_call_operand.vmem [shape: bf16[16,8,128], index: 1, kind: input, shape index: {}]   ;;  %s4988_s2 = inlined_call_operand.vmem [shape: bf16[2,64,128], index: 2, kind: output, shape index: {}]  }
   0x1   :  { %s4347_s11 = smov 0   ;;  %s4349_s12 = smov 0  }
   0x2   :  { %s4351_s13 = smov 0  }
   0x3 LB: > { %s24_s14 = sadd.s32 1, %s4322_s12  ;;  %p38_p1 = scmp.ne.s32.totalorder %s4314_s10, %s4310_s9  ;;  %s4326_s13 = sphi %s4351_s13, %s12_s13   ;;  %s4322_s12 = sphi %s4349_s12, %s4994_s12   ;;  %s4318_s11 = sphi %s4347_s11, %s4993_s11   ;;  %s4314_s10 = sphi %s4345_s10, %s4992_s10   ;;  %s4310_s9 = sphi %s4343_s9, %s4991_s9  }
   0x4   : > { %p26_p0 = scmp.ge.s32.totalorder %s24_s14, 2  ;;  %p39_p2 = scmp.eq.s32.totalorder %s4326_s13, 0 }
   0x5   : > { %s31_s16 = sadd.s32 1, %s4314_s10  ;;  %p3479_p5 = scmp.ge.s32.totalorder %s4326_s13, 2 }
   0x6   : > { %s4996_s14 = smov (%p26_p0, %s24_s14), 0  ;;  %p40_p3 = por %p39_p2, %p38_p1 }
   0x7   : > { %s28_s15 = ssub.s32 %s4322_s12, %s4996_s14  ;;  %116 = sbr.rel (%p3479_p5) target bundleno = 37 (0x25), region = 20 }
   0x8   : > { %p29_p4 = scmp.eq.s32.totalorder %s28_s15, 0 }
   0xa   : > { %s4378_s17 = scalar_select %p29_p4, %s4314_s10, %s31_s16  }
   0xe   : > { %119 = sbr.rel (!%p40_p3) target bundleno = 37 (0x25), region = 24  ;;  %s121_s18 = sand.u32 (%p40_p3), 1, %s4314_s10  }
   0xf   : > { %s4214_s19 = smul.u32 (%p40_p3), 72, %s4322_s12 }
  0x10   : > { %s4213_s20 = smul.u32 (%p40_p3), 288, %s121_s18 }
  0x11   : > { %s4386_s23 = scalar_lea.vmem (%p40_p3), %s4986_s0, %s4214_s19 }
  0x12   : > { %v142_v0 = vld [vmem:[%s4386_s23] sm:$0xff] (%p40_p3)   ;;  %v146_v1 = vld [vmem:[%s4386_s23 + $0x8] sm:$0xff] (%p40_p3)   ;;  %v150_v2 = vld [vmem:[%s4386_s23 + $0x10] sm:$0xff] (%p40_p3)   ;;  %s4391_s24 = scalar_lea.vmem (%p40_p3), [#allocation2], %s4213_s20 }
  0x13   : > { %143 = vst [vmem:[%s4391_s24] sm:$0xff] (%p40_p3), %v142_v0   ;;  %147 = vst [vmem:[%s4391_s24 + $0x8] sm:$0xff] (%p40_p3), %v146_v1   ;;  %v154_v3 = vld [vmem:[%s4386_s23 + $0x18] sm:$0xff] (%p40_p3)   ;;  %v158_v4 = vld [vmem:[%s4386_s23 + $0x20] sm:$0xff] (%p40_p3)  }
  0x14   : > { %151 = vst [vmem:[%s4391_s24 + $0x10] sm:$0xff] (%p40_p3), %v150_v2   ;;  %v162_v5 = vld [vmem:[%s4386_s23 + $0x28] sm:$0xff] (%p40_p3)   ;;  %155 = vst [vmem:[%s4391_s24 + $0x18] sm:$0xff] (%p40_p3), %v154_v3   ;;  %v166_v6 = vld [vmem:[%s4386_s23 + $0x30] sm:$0xff] (%p40_p3)  }
  0x15   : > { %159 = vst [vmem:[%s4391_s24 + $0x20] sm:$0xff] %v158_v4   ;;  %163 = vst [vmem:[%s4391_s24 + $0x28] sm:$0xff] %v162_v5   ;;  %v170_v7 = vld [vmem:[%s4386_s23 + $0x38] sm:$0xff]   ;;  %v174_v8 = vld [vmem:[%s4386_s23 + $0x40] sm:$0xff]  }
  0x16   : > { %167 = vst [vmem:[%s4391_s24 + $0x30] sm:$0xff] %v166_v6   ;;  %171 = vst [vmem:[%s4391_s24 + $0x38] sm:$0xff] %v170_v7   ;;  %v178_v9 = vld [vmem:[%s4386_s23 + $0x90] sm:$0xff]   ;;  %v182_v10 = vld [vmem:[%s4386_s23 + $0x98] sm:$0xff]  }
  0x17   : > { %175 = vst [vmem:[%s4391_s24 + $0x40] sm:$0xff] %v174_v8   ;;  %v186_v11 = vld [vmem:[%s4386_s23 + $0xa0] sm:$0xff]   ;;  %179 = vst [vmem:[%s4391_s24 + $0x48] sm:$0xff] %v178_v9   ;;  %v190_v12 = vld [vmem:[%s4386_s23 + $0xa8] sm:$0xff]  }
  0x18   : > { %183 = vst [vmem:[%s4391_s24 + $0x50] sm:$0xff] %v182_v10   ;;  %187 = vst [vmem:[%s4391_s24 + $0x58] sm:$0xff] %v186_v11   ;;  %v194_v13 = vld [vmem:[%s4386_s23 + $0xb0] sm:$0xff]   ;;  %v198_v14 = vld [vmem:[%s4386_s23 + $0xb8] sm:$0xff]  }
  0x19   : > { %191 = vst [vmem:[%s4391_s24 + $0x60] sm:$0xff] %v190_v12   ;;  %195 = vst [vmem:[%s4391_s24 + $0x68] sm:$0xff] %v194_v13   ;;  %v202_v15 = vld [vmem:[%s4386_s23 + $0xc0] sm:$0xff]   ;;  %v206_v16 = vld [vmem:[%s4386_s23 + $0xc8] sm:$0xff]  }
  0x1a   : > { %199 = vst [vmem:[%s4391_s24 + $0x70] sm:$0xff] %v198_v14   ;;  %v210_v17 = vld [vmem:[%s4386_s23 + $0xd0] sm:$0xff]   ;;  %203 = vst [vmem:[%s4391_s24 + $0x78] sm:$0xff] %v202_v15   ;;  %v214_v18 = vld [vmem:[%s4386_s23 + $0x120] sm:$0xff]  }
  0x1b   : > { %207 = vst [vmem:[%s4391_s24 + $0x80] sm:$0xff] %v206_v16   ;;  %211 = vst [vmem:[%s4391_s24 + $0x88] sm:$0xff] %v210_v17   ;;  %v218_v19 = vld [vmem:[%s4386_s23 + $0x128] sm:$0xff]   ;;  %v222_v20 = vld [vmem:[%s4386_s23 + $0x130] sm:$0xff]  }
  0x1c   : > { %215 = vst [vmem:[%s4391_s24 + $0x90] sm:$0xff] %v214_v18   ;;  %219 = vst [vmem:[%s4391_s24 + $0x98] sm:$0xff] %v218_v19   ;;  %v226_v21 = vld [vmem:[%s4386_s23 + $0x138] sm:$0xff]   ;;  %v230_v22 = vld [vmem:[%s4386_s23 + $0x140] sm:$0xff]  }
  0x1d   : > { %223 = vst [vmem:[%s4391_s24 + $0xa0] sm:$0xff] %v222_v20   ;;  %v234_v23 = vld [vmem:[%s4386_s23 + $0x148] sm:$0xff]   ;;  %227 = vst [vmem:[%s4391_s24 + $0xa8] sm:$0xff] %v226_v21   ;;  %v238_v24 = vld [vmem:[%s4386_s23 + $0x150] sm:$0xff]  }
  0x1e   : > { %231 = vst [vmem:[%s4391_s24 + $0xb0] sm:$0xff] %v230_v22   ;;  %235 = vst [vmem:[%s4391_s24 + $0xb8] sm:$0xff] %v234_v23   ;;  %v242_v25 = vld [vmem:[%s4386_s23 + $0x158] sm:$0xff]   ;;  %v246_v26 = vld [vmem:[%s4386_s23 + $0x160] sm:$0xff]  }
  0x1f   : > { %239 = vst [vmem:[%s4391_s24 + $0xc0] sm:$0xff] %v238_v24   ;;  %243 = vst [vmem:[%s4391_s24 + $0xc8] sm:$0xff] %v242_v25   ;;  %v250_v27 = vld [vmem:[%s4386_s23 + $0x1b0] sm:$0xff]   ;;  %v254_v28 = vld [vmem:[%s4386_s23 + $0x1b8] sm:$0xff]  }
  0x20   : > { %247 = vst [vmem:[%s4391_s24 + $0xd0] sm:$0xff] %v246_v26   ;;  %v258_v29 = vld [vmem:[%s4386_s23 + $0x1c0] sm:$0xff]   ;;  %251 = vst [vmem:[%s4391_s24 + $0xd8] sm:$0xff] %v250_v27   ;;  %v262_v30 = vld [vmem:[%s4386_s23 + $0x1c8] sm:$0xff]  }
  0x21   : > { %255 = vst [vmem:[%s4391_s24 + $0xe0] sm:$0xff] %v254_v28   ;;  %259 = vst [vmem:[%s4391_s24 + $0xe8] sm:$0xff] %v258_v29   ;;  %v266_v31 = vld [vmem:[%s4386_s23 + $0x1d0] sm:$0xff]   ;;  %v270_v32 = vld [vmem:[%s4386_s23 + $0x1d8] sm:$0xff]  }
  0x22   : > { %263 = vst [vmem:[%s4391_s24 + $0xf0] sm:$0xff] %v262_v30   ;;  %267 = vst [vmem:[%s4391_s24 + $0xf8] sm:$0xff] %v266_v31   ;;  %v274_v33 = vld [vmem:[%s4386_s23 + $0x1e0] sm:$0xff]   ;;  %v278_v34 = vld [vmem:[%s4386_s23 + $0x1e8] sm:$0xff]  }
  0x23   : > { %271 = vst [vmem:[%s4391_s24 + $0x100] sm:$0xff] %v270_v32   ;;  %v282_v35 = vld [vmem:[%s4386_s23 + $0x1f0] sm:$0xff]   ;;  %275 = vst [vmem:[%s4391_s24 + $0x108] sm:$0xff] %v274_v33  }
  0x24   : > { %279 = vst [vmem:[%s4391_s24 + $0x110] sm:$0xff] %v278_v34   ;;  %283 = vst [vmem:[%s4391_s24 + $0x118] sm:$0xff] %v282_v35  }
  0x25 PF: > { %p3481_p6 = scmp.ge.s32.totalorder %s4326_s13, 1  ;;  %p451_p7 = scmp.lt.s32.totalorder %s4326_s13, 3 }
  0x27   : > { %p452_p8 = pnand %p3481_p6, %p451_p7 }
  0x28   : > { %v3492_v36 = vld [vmem:[%s4987_s1 + $0x4] sm:$0xf] (!%p452_p8)  ;;  %vm553_vm0 = vcmask (!%p452_p8), 1043456   ;;  %v3635_v37 = vld [vmem:[%s4987_s1 + $0x20] sm:$0xf] (!%p452_p8)  ;;  %s458_s29 = sand.u32 (!%p452_p8), 1, %s4310_s9  }
  0x29   : > { %455 = sbr.rel (%p452_p8) target bundleno = 436 (0x1b4), region = 65  ;;  %4197 = vmatprep.subr.msk.bf16.mxu1 (!%p452_p8), %vm553_vm0, %v3492_v36  ;;  %4205 = vmatprep.subr.msk.bf16.mxu0 (!%p452_p8), %vm553_vm0, %v3635_v37  ;;  %v555_v38 = vsel (!%p452_p8), %vm553_vm0, %v3492_v36, 0  ;;  %v1934_v39 = vsel (!%p452_p8), %vm553_vm0, %v3635_v37, 0  ;;  %v506_v40 = vld [vmem:[%s4987_s1] sm:$0xf] (!%p452_p8)  ;;  %vm540_vm1 = vcmask (!%p452_p8), 64512  }
  0x2a   : > { %s4215_s30 = smul.u32 (!%p452_p8), 288, %s458_s29  ;;  %3918 = vmatpush3.bf16.msra.mxu1 (!%p452_p8), %v555_v38  ;;  %3998 = vmatpush3.bf16.msra.mxu0 (!%p452_p8), %v1934_v39  ;;  %v3652_v41 = vld [vmem:[%s4987_s1 + $0x24] sm:$0xf] (!%p452_p8)  ;;  %v655_v42 = vsel (!%p452_p8), %vm553_vm0, %v506_v40, 0  ;;  %v3509_v47 = vld [vmem:[%s4987_s1 + $0x8] sm:$0xf] (!%p452_p8) }
  0x2b   : > { %4198 = vmatprep.subr.msk.bf16.mxu1 (!%p452_p8), %vm553_vm0, %v506_v40  ;;  %4206 = vmatprep.subr.msk.bf16.mxu0 (!%p452_p8), %vm553_vm0, %v3652_v41  ;;  %v2055_v43 = vsel (!%p452_p8), %vm553_vm0, %v3652_v41, 0  ;;  %v3677_v49 = vld [vmem:[%s4987_s1 + $0x28] sm:$0xf] (!%p452_p8)  ;;  %v880_v56 = vsel (!%p452_p8), %vm553_vm0, %v3509_v47, 0  ;;  %vm738_vm2 = vsmask.f32 (!%p452_p8), 3328 }
  0x2c   : > { %s4485_s7 = scalar_lea.vmem (!%p452_p8), [#allocation2], %s4215_s30  ;;  %vm739_vm3 = vsmask.f32 (!%p452_p8), 7440  ;;  %v2285_v4 = vsel (!%p452_p8), %vm553_vm0, %v3677_v49, 0  ;;  %v3534_v8 = vld [vmem:[%s4987_s1 + $0xc] sm:$0xf] (!%p452_p8) }
  0x2d   : > { %v4256_v44 = vld [vmem:[%s4485_s7 + $0x48] ss:$8 sps:$4 sm:$0xff] (!%p452_p8)   ;;  %v4258_v46 = vld [vmem:[%s4485_s7 + $0x58] ss:$8 sps:$4 sm:$0xff] (!%p452_p8)   ;;  %v723_v61 = vld [vmem:[%s4485_s7 + $0x4] sm:$0x1] (!%p452_p8) }
  0x2e   : > { %v4257_v45 = vld [vmem:[%s4485_s7 + $0x8] ss:$8 sps:$4 sm:$0xff] (!%p452_p8)   ;;  %3919 = vmatprep.mubr.msk.bf16.mxu1 (!%p452_p8), %vm540_vm1, %v4256_v44  ;;  %v4259_v48 = vld [vmem:[%s4485_s7 + $0x18] ss:$8 sps:$4 sm:$0xff] (!%p452_p8)   ;;  %v725_v0 = vld [vmem:[%s4485_s7 + $0xc] sm:$0x1] (!%p452_p8) }
  0x2f   : > { %3999 = vmatprep.mubr.msk.bf16.mxu0 (!%p452_p8), %vm540_vm1, %v4257_v45  ;;  %3920 = vmatmul.mubr.msk.bf16.vlgmr.msra.gmra.mrb[0].mxu1 (!%p452_p8), %vm540_vm1, %v4258_v46  ;;  %v4260_v50 = vld [vmem:[%s4485_s7 + $0x68] ss:$8 sps:$4 sm:$0xff] (!%p452_p8)   ;;  %v4262_v52 = vld [vmem:[%s4485_s7 + $0x78] ss:$8 sps:$4 sm:$0xff] (!%p452_p8)   ;;  %v751_v3 = vshll.u32 (!%p452_p8), %v723_v61, 16  ;;  %v765_v7 = vshll.u32 (!%p452_p8), %v725_v0, 16  ;;  %vm4543_vm4 = vmor (!%p452_p8), %vm738_vm2, %vm739_vm3 }
  0x30   : > { %3928 = vmatpush3.bf16.msra.mxu1 %v655_v42  ;;  %4000 = vmatmul.mubr.msk.bf16.vlgmr.msra.gmra.mrb[0].mxu0 %vm540_vm1, %v4259_v48  ;;  %v4261_v51 = vld [vmem:[%s4485_s7 + $0x28] ss:$8 sps:$4 sm:$0xff]   ;;  %v4263_v53 = vld [vmem:[%s4485_s7 + $0x38] ss:$8 sps:$4 sm:$0xff]   ;;  %v4531_v13 = vsel %vm553_vm0, %v3534_v8, 0  ;;  %p484_p9 = scmp.lt.s32.totalorder %s4318_s11, 1 }
  0x31   : > { %4008 = vmatpush3.bf16.msra.mxu0 %v2055_v43  ;;  %3923 = vmatprep.mubr.msk.bf16.mxu1 %vm540_vm1, %v4260_v50  ;;  %v4264_v54 = vld [vmem:[%s4485_s7] ss:$8 sps:$4 sm:$0xff]   ;;  %v4265_v55 = vld [vmem:[%s4485_s7 + $0x50] ss:$8 sps:$4 sm:$0xff]   ;;  %v753_v11 = vrot.slane %v751_v3, 5  ;;  %v767_v16 = vrot.slane %v765_v7, 5 }
  0x32   : > { %4003 = vmatprep.mubr.msk.bf16.mxu0 %vm540_vm1, %v4261_v51  ;;  %4199 = vmatprep.subr.msk.bf16.mxu1 %vm553_vm0, %v3509_v47  ;;  %v4266_v57 = vld [vmem:[%s4485_s7 + $0x10] ss:$8 sps:$4 sm:$0xff]   ;;  %v4267_v58 = vld [vmem:[%s4485_s7 + $0x60] ss:$8 sps:$4 sm:$0xff]   ;;  %v3662_v17 = vld [vmem:[%s4485_s7 + $0xc] sm:$0x1] }
  0x33   : > { %4207 = vmatprep.subr.msk.bf16.mxu0 %vm553_vm0, %v3677_v49  ;;  %v4268_v59 = vld [vmem:[%s4485_s7 + $0x20] ss:$8 sps:$4 sm:$0xff]   ;;  %v4269_v62 = vld [vmem:[%s4485_s7 + $0x70] ss:$8 sps:$4 sm:$0xff]   ;;  %v3664_v22 = vld [vmem:[%s4485_s7 + $0x14] sm:$0x1] }
  0x34   : > { %v722_v60 = vld [vmem:[%s4485_s7] sm:$0xf]  ;;  %v724_v63 = vld [vmem:[%s4485_s7 + $0x8] sm:$0xf]  ;;  %v4270_v19 = vld [vmem:[%s4485_s7 + $0x30] ss:$8 sps:$4 sm:$0xff]  }
  0x35   : > { %v742_v1 = vshrl.u32 %v722_v60, 16  ;;  %v745_v2 = vshll.u32 %v722_v60, 16  ;;  %v756_v5 = vshrl.u32 %v724_v63, 16  ;;  %v759_v6 = vshll.u32 %v724_v63, 16  ;;  %v3661_v12 = vld [vmem:[%s4485_s7 + $0x8] sm:$0xf] }
  0x36   : > { %v2147_v18 = vshrl.u32 %v3661_v12, 16  ;;  %v3663_v21 = vld [vmem:[%s4485_s7 + $0x10] sm:$0xf]  ;;  %v2150_v23 = vshll.u32 %v3661_v12, 16  ;;  %v2156_v24 = vshll.u32 %v3662_v17, 16  ;;  %v2170_v35 = vshll.u32 %v3664_v22, 16 }
  0x37   : > { %3924 = vmatmul.mubr.msk.bf16.gmra.mrb[4].mxu1 %vm540_vm1, %v4262_v52  ;;  %v744_v9 = vrot.slane %v742_v1, 4  ;;  %v747_v10 = vrot.slane %v745_v2, 5  ;;  %v758_v14 = vrot.slane %v756_v5, 4  ;;  %v761_v15 = vrot.slane %v759_v6, 5  ;;  %v4271_v25 = vld [vmem:[%s4485_s7 + $0x80] ss:$8 sps:$4 sm:$0xff]  }
  0x38   : > { %4004 = vmatmul.mubr.msk.bf16.gmra.mrb[4].mxu0 %vm540_vm1, %v4263_v53  ;;  %3929 = vmatprep.mubr.msk.bf16.mxu1 %vm540_vm1, %v4264_v54  ;;  %v2149_v28 = vrot.slane %v2147_v18, 4  ;;  %v2161_v29 = vshrl.u32 %v3663_v21, 16  ;;  %v2164_v30 = vshll.u32 %v3663_v21, 16  ;;  %v3702_v31 = vld [vmem:[%s4987_s1 + $0x2c] sm:$0xf]  ;;  %v2152_v33 = vrot.slane %v2150_v23, 5 }
  0x39   : > { %4009 = vmatprep.mubr.msk.bf16.mxu0 %vm540_vm1, %v4265_v55  ;;  %v748_v20 = vor.u32 %v747_v10, %v744_v9  ;;  %v762_v27 = vor.u32 %v761_v15, %v758_v14  ;;  %v2158_v34 = vrot.slane %v2156_v24, 5  ;;  %v726_v36 = vld [vmem:[%s4485_s7 + $0x10] sm:$0xf]  ;;  %v727_v40 = vld [vmem:[%s4485_s7 + $0x14] sm:$0x1]  ;;  %v2172_v44 = vrot.slane %v2170_v35, 5 }
  0x3a   : > { %v2163_v38 = vrot.slane %v2161_v29, 4  ;;  %v2166_v39 = vrot.slane %v2164_v30, 5  ;;  %v770_v41 = vshrl.u32 %v726_v36, 16  ;;  %v2153_v43 = vor.u32 %v2152_v33, %v2149_v28  ;;  %v728_v45 = vld [vmem:[%s4485_s7 + $0x18] sm:$0xf]  ;;  %s4998_s11 = smov (!%p484_p9, %s4318_s11), 1 }
  0x3b   : > { %v749_v32 = vrot.slane %v748_v20, 4  ;;  %v763_v37 = vrot.slane %v762_v27, 4  ;;  %v729_v46 = vld [vmem:[%s4485_s7 + $0x1c] sm:$0x1]  ;;  %v773_v47 = vshll.u32 %v726_v36, 16  ;;  %v779_v51 = vshll.u32 %v727_v40, 16 }
  0x3c   : > { %v2167_v49 = vor.u32 %v2166_v39, %v2163_v38  ;;  %v772_v50 = vrot.slane %v770_v41, 4  ;;  %v3665_v52 = vld [vmem:[%s4485_s7 + $0x18] sm:$0xf]  ;;  %v2154_v54 = vrot.slane %v2153_v43, 4  ;;  %v793_v60 = vshll.u32 %v729_v46, 16 }
  0x3d   : > { %v754_v42 = vsel %vm4543_vm4, %v749_v32, %v753_v11  ;;  %v768_v48 = vsel %vm4543_vm4, %v763_v37, %v767_v16  ;;  %v775_v55 = vrot.slane %v773_v47, 5  ;;  %v3666_v61 = vld [vmem:[%s4485_s7 + $0x1c] sm:$0x1]  ;;  %v3667_v1 = vld [vmem:[%s4485_s7 + $0x20] sm:$0xf]  ;;  %v2175_v2 = vshrl.u32 %v3665_v52, 16 }
  0x3e   : > { %v3510_v53 = vcombine.low %v754_v42, %v768_v48  ;;  %v795_v5 = vrot.slane %v793_v60, 5  ;;  %v3668_v6 = vld [vmem:[%s4485_s7 + $0x24] sm:$0x1]  ;;  %v2178_v7 = vshll.u32 %v3665_v52, 16  ;;  %v2184_v11 = vshll.u32 %v3666_v61, 16 }
  0x3f   : > { %3930 = vmatmul.mubr.msk.bf16.vlgmr.msra.gmra.mrb[0].mxu1 %vm540_vm1, %v4266_v57  ;;  %v2168_v57 = vrot.slane %v2167_v49, 4  ;;  %v776_v63 = vor.u32 %v775_v55, %v772_v50  ;;  %v2177_v10 = vrot.slane %v2175_v2, 4  ;;  %v730_v12 = vld [vmem:[%s4485_s7 + $0x20] sm:$0xf]  ;;  %v2189_v16 = vshrl.u32 %v3667_v1, 16 }
  0x40   : > { %3938 = vmatpush3.bf16.msra.mxu1 %v880_v56  ;;  %4010 = vmatmul.mubr.msk.bf16.vlgmr.msra.gmra.mrb[0].mxu0 %vm540_vm1, %v4267_v58  ;;  %v784_v56 = vshrl.u32 %v728_v45, 16  ;;  %v781_v58 = vrot.slane %v779_v51, 5  ;;  %v2180_v15 = vrot.slane %v2178_v7, 5  ;;  %v2192_v17 = vshll.u32 %v3667_v1, 16  ;;  %v731_v18 = vld [vmem:[%s4485_s7 + $0x24] sm:$0x1] }
  0x41   : > { %4018 = vmatpush3.bf16.msra.mxu0 %v2285_v4  ;;  %3933 = vmatprep.mubr.msk.bf16.mxu1 %vm540_vm1, %v4268_v59  ;;  %v787_v59 = vshll.u32 %v728_v45, 16  ;;  %v2173_v3 = vsel %vm4543_vm4, %v2168_v57, %v2172_v44  ;;  %v777_v9 = vrot.slane %v776_v63, 4  ;;  %v2186_v20 = vrot.slane %v2184_v11, 5  ;;  %v732_v23 = vld [vmem:[%s4485_s7 + $0x28] sm:$0xf] }
  0x42   : > { %4013 = vmatprep.mubr.msk.bf16.mxu0 %vm540_vm1, %v4269_v62  ;;  %4200 = vmatprep.subr.msk.bf16.mxu1 %vm553_vm0, %v3534_v8  ;;  %v2159_v62 = vsel %vm4543_vm4, %v2154_v54, %v2158_v34  ;;  %v786_v0 = vrot.slane %v784_v56, 4  ;;  %v2198_v21 = vshll.u32 %v3668_v6, 16  ;;  %v2515_v22 = vsel %vm553_vm0, %v3702_v31, 0  ;;  %v733_v30 = vld [vmem:[%s4485_s7 + $0x2c] sm:$0x1] }
  0x43   : > { %4208 = vmatprep.subr.msk.bf16.mxu0 %vm553_vm0, %v3702_v31  ;;  %v789_v4 = vrot.slane %v787_v59, 5  ;;  %v3678_v8 = vcombine.low %v2159_v62, %v2173_v3  ;;  %v2191_v27 = vrot.slane %v2189_v16, 4  ;;  %v2194_v28 = vrot.slane %v2192_v17, 5  ;;  %v3669_v31 = vld [vmem:[%s4485_s7 + $0x28] sm:$0xf] }
  0x44   : > { %v2200_v29 = vrot.slane %v2198_v21, 5  ;;  %v798_v32 = vshrl.u32 %v730_v12, 16  ;;  %v801_v33 = vshll.u32 %v730_v12, 16  ;;  %v807_v34 = vshll.u32 %v731_v18, 16  ;;  %v3670_v39 = vld [vmem:[%s4485_s7 + $0x2c] sm:$0x1] }
  0x45   : > { %v790_v14 = vor.u32 %v789_v4, %v786_v0  ;;  %v2195_v37 = vor.u32 %v2194_v28, %v2191_v27  ;;  %v812_v38 = vshrl.u32 %v732_v23, 16  ;;  %v3671_v44 = vld [vmem:[%s4485_s7 + $0x30] sm:$0xf]  ;;  %v815_v48 = vshll.u32 %v732_v23, 16  ;;  %v3672_v51 = vld [vmem:[%s4485_s7 + $0x34] sm:$0x1] }
  0x46   : > { %v800_v41 = vrot.slane %v798_v32, 4  ;;  %v803_v42 = vrot.slane %v801_v33, 5  ;;  %v809_v43 = vrot.slane %v807_v34, 5  ;;  %v821_v50 = vshll.u32 %v733_v30, 16  ;;  %v735_v63 = vld [vmem:[%s4485_s7 + $0x34] sm:$0x1] }
  0x47   : > { %3934 = vmatmul.mubr.msk.bf16.gmra.mrb[4].mxu1 %vm540_vm1, %v4270_v19  ;;  %v782_v19 = vsel %vm4543_vm4, %v777_v9, %v781_v58  ;;  %v791_v24 = vrot.slane %v790_v14, 4  ;;  %v2196_v46 = vrot.slane %v2195_v37, 4  ;;  %v814_v47 = vrot.slane %v812_v38, 4  ;;  %v734_v58 = vld [vmem:[%s4485_s7 + $0x30] sm:$0xf] }
  0x48   : > { %4014 = vmatmul.mubr.msk.bf16.gmra.mrb[4].mxu0 %vm540_vm1, %v4271_v25  ;;  %3939 = vmatprep.mubr.msk.bf16.mxu1 %vm540_vm1, %v3510_v53  ;;  %v2181_v25 = vor.u32 %v2180_v15, %v2177_v10  ;;  %v804_v49 = vor.u32 %v803_v42, %v800_v41  ;;  %v2203_v52 = vshrl.u32 %v3669_v31, 16  ;;  %v2206_v53 = vshll.u32 %v3669_v31, 16  ;;  %v736_v4 = vld [vmem:[%s4485_s7 + $0x38] sm:$0xf]  ;;  %v737_v10 = vld [vmem:[%s4485_s7 + $0x3c] sm:$0x1] }
  0x49   : > { %4019 = vmatprep.mubr.msk.bf16.mxu0 %vm540_vm1, %v3678_v8  ;;  %v796_v35 = vsel %vm4543_vm4, %v791_v24, %v795_v5  ;;  %v2201_v54 = vsel %vm4543_vm4, %v2196_v46, %v2200_v29  ;;  %v817_v55 = vrot.slane %v815_v48, 5  ;;  %v2212_v56 = vshll.u32 %v3670_v39, 16  ;;  %v3673_v18 = vld [vmem:[%s4485_s7 + $0x38] sm:$0xf]  ;;  %v3674_v24 = vld [vmem:[%s4485_s7 + $0x3c] sm:$0x1] }
  0x4a   : > { %v2182_v36 = vrot.slane %v2181_v25, 4  ;;  %v3511_v40 = vcombine.low %v782_v19, %v796_v35  ;;  %v2217_v57 = vshrl.u32 %v3671_v44, 16  ;;  %v805_v60 = vrot.slane %v804_v49, 4  ;;  %v3675_v29 = vld [vmem:[%s4485_s7 + $0x40] sm:$0xf] }
  0x4b   : > { %v823_v61 = vrot.slane %v821_v50, 5  ;;  %v2205_v62 = vrot.slane %v2203_v52, 4  ;;  %v818_v0 = vor.u32 %v817_v55, %v814_v47  ;;  %v2208_v1 = vrot.slane %v2206_v53, 5  ;;  %v4606_v30 = vld [vmem:[%s4987_s1 + $0x10] sm:$0xf] }
  0x4c   : > { %v2187_v45 = vsel %vm4543_vm4, %v2182_v36, %v2186_v20  ;;  %v2214_v2 = vrot.slane %v2212_v56, 5  ;;  %v2219_v3 = vrot.slane %v2217_v57, 4  ;;  %v2220_v5 = vshll.u32 %v3671_v44, 16  ;;  %v3676_v35 = vld [vmem:[%s4485_s7 + $0x44] sm:$0x1] }
  0x4d   : > { %v3679_v59 = vcombine.low %v2187_v45, %v2201_v54  ;;  %v2226_v6 = vshll.u32 %v3672_v51, 16  ;;  %v826_v7 = vshrl.u32 %v734_v58, 16  ;;  %v819_v8 = vrot.slane %v818_v0, 4  ;;  %v4618_v45 = vld [vmem:[%s4987_s1 + $0x30] sm:$0xf] }
  0x4e   : > { %v2209_v9 = vor.u32 %v2208_v1, %v2205_v62  ;;  %v829_v11 = vshll.u32 %v734_v58, 16  ;;  %v835_v12 = vshll.u32 %v735_v63, 16  ;;  %v2222_v14 = vrot.slane %v2220_v5, 5  ;;  %v3519_v50 = vld [vmem:[%s4485_s7 + $0x4c] sm:$0x1] }
  0x4f   : > { %3940 = vmatmul.mubr.msk.bf16.vlgmr.msra.gmra.mrb[0].mxu1 %vm540_vm1, %v3511_v40  ;;  %v2228_v15 = vrot.slane %v2226_v6, 5  ;;  %v828_v16 = vrot.slane %v826_v7, 4  ;;  %v840_v17 = vshrl.u32 %v736_v4, 16  ;;  %v824_v19 = vsel %vm4543_vm4, %v819_v8, %v823_v61  ;;  %v3518_v40 = vld [vmem:[%s4485_s7 + $0x48] sm:$0xf] }
  0x50   : > { %3948 = vmatpush3.bf16.msra.mxu1 %v4531_v13  ;;  %4020 = vmatmul.mubr.msk.bf16.vlgmr.msra.gmra.mrb[0].mxu0 %vm540_vm1, %v3679_v59  ;;  %v810_v13 = vsel %vm4543_vm4, %v805_v60, %v809_v43  ;;  %v2210_v20 = vrot.slane %v2209_v9, 4  ;;  %v831_v21 = vrot.slane %v829_v11, 5  ;;  %v837_v23 = vrot.slane %v835_v12, 5  ;;  %v3520_v51 = vld [vmem:[%s4485_s7 + $0x50] sm:$0xf] }
  0x51   : > { %4028 = vmatpush3.bf16.msra.mxu0 %v2515_v22  ;;  %v3512_v22 = vcombine.low %v810_v13, %v824_v19  ;;  %v2223_v25 = vor.u32 %v2222_v14, %v2219_v3  ;;  %v842_v27 = vrot.slane %v840_v17, 4  ;;  %v843_v28 = vshll.u32 %v736_v4, 16  ;;  %4201 = vmatprep.subr.msk.bf16.mxu1 %vm553_vm0, %v4606_v30  ;;  %v3521_v61 = vld [vmem:[%s4485_s7 + $0x54] sm:$0x1]  ;;  %v3686_v13 = vld [vmem:[%s4485_s7 + $0x50] sm:$0xf] }
  0x52   : > { %v2215_v32 = vsel %vm4543_vm4, %v2210_v20, %v2214_v2  ;;  %v832_v33 = vor.u32 %v831_v21, %v828_v16  ;;  %v849_v34 = vshll.u32 %v737_v10, 16  ;;  %v2231_v36 = vshrl.u32 %v3673_v18, 16  ;;  %4209 = vmatprep.subr.msk.bf16.mxu0 %vm553_vm0, %v4618_v45  ;;  %v3687_v9 = vld [vmem:[%s4485_s7 + $0x54] sm:$0x1]  ;;  %v3688_v10 = vld [vmem:[%s4485_s7 + $0x58] sm:$0xf] }
  0x53   : > { %3943 = vmatprep.mubr.msk.bf16.mxu1 %vm540_vm1, %v3512_v22  ;;  %v2224_v37 = vrot.slane %v2223_v25, 4  ;;  %v845_v38 = vrot.slane %v843_v28, 5  ;;  %v2234_v31 = vshll.u32 %v3673_v18, 16  ;;  %v2240_v39 = vshll.u32 %v3674_v24, 16  ;;  %v3689_v18 = vld [vmem:[%s4485_s7 + $0x5c] sm:$0x1] }
  0x54   : > { %v833_v41 = vrot.slane %v832_v33, 4  ;;  %v851_v42 = vrot.slane %v849_v34, 5  ;;  %v2233_v43 = vrot.slane %v2231_v36, 4  ;;  %v2245_v44 = vshrl.u32 %v3675_v29, 16  ;;  %v3522_v25 = vld [vmem:[%s4485_s7 + $0x58] sm:$0xf] }
  0x55   : > { %v2229_v46 = vsel %vm4543_vm4, %v2224_v37, %v2228_v15  ;;  %v846_v47 = vor.u32 %v845_v38, %v842_v27  ;;  %v2236_v48 = vrot.slane %v2234_v31, 5  ;;  %v2242_v49 = vrot.slane %v2240_v39, 5  ;;  %v3523_v33 = vld [vmem:[%s4485_s7 + $0x5c] sm:$0x1]  ;;  %v3524_v38 = vld [vmem:[%s4485_s7 + $0x60] sm:$0xf] }
  0x56   : > { %v3680_v52 = vcombine.low %v2215_v32, %v2229_v46  ;;  %v838_v53 = vsel %vm4543_vm4, %v833_v41, %v837_v23  ;;  %v2247_v54 = vrot.slane %v2245_v44, 4  ;;  %v2248_v55 = vshll.u32 %v3675_v29, 16 }
  0x57   : > { %v847_v56 = vrot.slane %v846_v47, 4  ;;  %v2237_v57 = vor.u32 %v2236_v48, %v2233_v43  ;;  %v2254_v58 = vshll.u32 %v3676_v35, 16  ;;  %v972_v59 = vshrl.u32 %v3518_v40, 16  ;;  %v3525_v43 = vld [vmem:[%s4485_s7 + $0x64] sm:$0x1] }
  0x58   : > { %4023 = vmatprep.mubr.msk.bf16.mxu0 %vm540_vm1, %v3680_v52  ;;  %v2250_v60 = vrot.slane %v2248_v55, 5  ;;  %v975_v62 = vshll.u32 %v3518_v40, 16  ;;  %v981_v63 = vshll.u32 %v3519_v50, 16  ;;  %v986_v0 = vshrl.u32 %v3520_v51, 16 }
  0x59   : > { %v852_v1 = vsel %vm4543_vm4, %v847_v56, %v851_v42  ;;  %v2238_v2 = vrot.slane %v2237_v57, 4  ;;  %v2256_v3 = vrot.slane %v2254_v58, 5  ;;  %v974_v4 = vrot.slane %v972_v59, 4  ;;  %v3691_v56 = vld [vmem:[%s4485_s7 + $0x64] sm:$0x1] }
  0x5a   : > { %v3513_v5 = vcombine.low %v838_v53, %v852_v1  ;;  %v2251_v6 = vor.u32 %v2250_v60, %v2247_v54  ;;  %v977_v7 = vrot.slane %v975_v62, 5  ;;  %v983_v8 = vrot.slane %v981_v63, 5 }
  0x5b   : > { %v2243_v11 = vsel %vm4543_vm4, %v2238_v2, %v2242_v49  ;;  %v988_v12 = vrot.slane %v986_v0, 4  ;;  %v989_v14 = vshll.u32 %v3520_v51, 16  ;;  %v995_v15 = vshll.u32 %v3521_v61, 16  ;;  %v3690_v51 = vld [vmem:[%s4485_s7 + $0x60] sm:$0xf] }
  0x5c   : > { %3944 = vmatmul.mubr.msk.bf16.gmra.mrb[4].mxu1 %vm540_vm1, %v3513_v5  ;;  %v2252_v16 = vrot.slane %v2251_v6, 4  ;;  %v978_v17 = vor.u32 %v977_v7, %v974_v4  ;;  %v2377_v19 = vshrl.u32 %v3686_v13, 16  ;;  %v2380_v20 = vshll.u32 %v3686_v13, 16  ;;  %v3692_v61 = vld [vmem:[%s4485_s7 + $0x68] sm:$0xf] }
  0x5d   : > { %v991_v21 = vrot.slane %v989_v14, 5  ;;  %v997_v23 = vrot.slane %v995_v15, 5  ;;  %v2386_v24 = vshll.u32 %v3687_v9, 16  ;;  %v2391_v22 = vshrl.u32 %v3688_v10, 16  ;;  %v3693_v2 = vld [vmem:[%s4485_s7 + $0x6c] sm:$0x1] }
  0x5e   : > { %v2257_v27 = vsel %vm4543_vm4, %v2252_v16, %v2256_v3  ;;  %v979_v28 = vrot.slane %v978_v17, 4  ;;  %v2379_v29 = vrot.slane %v2377_v19, 4  ;;  %v2382_v32 = vrot.slane %v2380_v20, 5  ;;  %v3526_v6 = vld [vmem:[%s4485_s7 + $0x68] sm:$0xf] }
  0x5f   : > { %v3681_v34 = vcombine.low %v2243_v11, %v2257_v27  ;;  %v992_v35 = vor.u32 %v991_v21, %v988_v12  ;;  %v2388_v36 = vrot.slane %v2386_v24, 5  ;;  %v2393_v37 = vrot.slane %v2391_v22, 4  ;;  %v3527_v20 = vld [vmem:[%s4485_s7 + $0x6c] sm:$0x1]  ;;  %v3528_v21 = vld [vmem:[%s4485_s7 + $0x70] sm:$0xf] }
  0x60   : > { %v984_v31 = vsel %vm4543_vm4, %v979_v28, %v983_v8  ;;  %v2383_v39 = vor.u32 %v2382_v32, %v2379_v29  ;;  %v2394_v40 = vshll.u32 %v3688_v10, 16  ;;  %v2400_v41 = vshll.u32 %v3689_v18, 16  ;;  %v3694_v27 = vld [vmem:[%s4485_s7 + $0x70] sm:$0xf] }
  0x61   : > { %4024 = vmatmul.mubr.msk.bf16.gmra.mrb[4].mxu0 %vm540_vm1, %v3681_v34  ;;  %v993_v42 = vrot.slane %v992_v35, 4  ;;  %v1000_v44 = vshrl.u32 %v3522_v25, 16  ;;  %v1003_v46 = vshll.u32 %v3522_v25, 16  ;;  %v1009_v47 = vshll.u32 %v3523_v33, 16  ;;  %v3529_v25 = vld [vmem:[%s4485_s7 + $0x74] sm:$0x1] }
  0x62   : > { %v2384_v48 = vrot.slane %v2383_v39, 4  ;;  %v2396_v49 = vrot.slane %v2394_v40, 5  ;;  %v1014_v50 = vshrl.u32 %v3524_v38, 16  ;;  %v2402_v53 = vrot.slane %v2400_v41, 5 }
  0x63   : > { %v998_v52 = vsel %vm4543_vm4, %v993_v42, %v997_v23  ;;  %v1002_v54 = vrot.slane %v1000_v44, 4  ;;  %v1005_v55 = vrot.slane %v1003_v46, 5  ;;  %v1011_v60 = vrot.slane %v1009_v47, 5  ;;  %v3696_v42 = vld [vmem:[%s4485_s7 + $0x78] sm:$0xf] }
  0x64   : > { %v3535_v57 = vcombine.low %v984_v31, %v998_v52  ;;  %v2389_v58 = vsel %vm4543_vm4, %v2384_v48, %v2388_v36  ;;  %v2397_v59 = vor.u32 %v2396_v49, %v2393_v37  ;;  %v1016_v63 = vrot.slane %v1014_v50, 4  ;;  %v3697_v50 = vld [vmem:[%s4485_s7 + $0x7c] sm:$0x1]  ;;  %v3530_v52 = vld [vmem:[%s4485_s7 + $0x78] sm:$0xf] }
  0x65   : > { %v1006_v62 = vor.u32 %v1005_v55, %v1002_v54  ;;  %v1017_v0 = vshll.u32 %v3524_v38, 16  ;;  %v1023_v1 = vshll.u32 %v3525_v43, 16  ;;  %v2405_v4 = vshrl.u32 %v3690_v51, 16  ;;  %v3695_v38 = vld [vmem:[%s4485_s7 + $0x74] sm:$0x1] }
  0x66   : > { %3949 = vmatprep.mubr.msk.bf16.mxu1 %vm540_vm1, %v3535_v57  ;;  %v2398_v3 = vrot.slane %v2397_v59, 4  ;;  %v2408_v13 = vshll.u32 %v3690_v51, 16  ;;  %v2414_v5 = vshll.u32 %v3691_v56, 16  ;;  %v1231_v9 = vsel %vm553_vm0, %v4606_v30, 0 }
  0x67   : > { %v1007_v7 = vrot.slane %v1006_v62, 4  ;;  %v1019_v8 = vrot.slane %v1017_v0, 5  ;;  %v2419_v10 = vshrl.u32 %v3692_v61, 16  ;;  %v1025_v12 = vrot.slane %v1023_v1, 5  ;;  %v3531_v62 = vld [vmem:[%s4485_s7 + $0x7c] sm:$0x1] }
  0x68   : > { %v2403_v11 = vsel %vm4543_vm4, %v2398_v3, %v2402_v53  ;;  %v2407_v14 = vrot.slane %v2405_v4, 4  ;;  %v2410_v15 = vrot.slane %v2408_v13, 5  ;;  %v2416_v19 = vrot.slane %v2414_v5, 5  ;;  %v4682_v53 = vld [vmem:[%s4987_s1 + $0x14] sm:$0xf] }
  0x69   : > { %v3703_v16 = vcombine.low %v2389_v58, %v2403_v11  ;;  %v1012_v17 = vsel %vm4543_vm4, %v1007_v7, %v1011_v60  ;;  %v1020_v18 = vor.u32 %v1019_v8, %v1016_v63  ;;  %v2421_v30 = vrot.slane %v2419_v10, 4  ;;  %v3532_v3 = vld [vmem:[%s4485_s7 + $0x80] sm:$0xf] }
  0x6a   : > { %v2411_v23 = vor.u32 %v2410_v15, %v2407_v14  ;;  %v2422_v24 = vshll.u32 %v3692_v61, 16  ;;  %v2428_v22 = vshll.u32 %v3693_v2, 16  ;;  %v2636_v29 = vsel %vm553_vm0, %v4618_v45, 0  ;;  %v4696_v14 = vld [vmem:[%s4987_s1 + $0x34] sm:$0xf] }
  0x6b   : > { %4029 = vmatprep.mubr.msk.bf16.mxu0 %vm540_vm1, %v3703_v16  ;;  %v1021_v28 = vrot.slane %v1020_v18, 4  ;;  %v1028_v32 = vshrl.u32 %v3526_v6, 16  ;;  %v1031_v33 = vshll.u32 %v3526_v6, 16  ;;  %v1037_v36 = vshll.u32 %v3527_v20, 16 }
  0x6c   : > { %v2412_v34 = vrot.slane %v2411_v23, 4  ;;  %v2424_v35 = vrot.slane %v2422_v24, 5  ;;  %v1042_v37 = vshrl.u32 %v3528_v21, 16  ;;  %v2430_v39 = vrot.slane %v2428_v22, 5 }
  0x6d   : > { %v1026_v31 = vsel %vm4543_vm4, %v1021_v28, %v1025_v12  ;;  %v1030_v40 = vrot.slane %v1028_v32, 4  ;;  %v1033_v41 = vrot.slane %v1031_v33, 5  ;;  %v1045_v48 = vshll.u32 %v3528_v21, 16  ;;  %v3698_v12 = vld [vmem:[%s4485_s7 + $0x80] sm:$0xf] }
  0x6e   : > { %v3536_v43 = vcombine.low %v1012_v17, %v1026_v31  ;;  %v2417_v45 = vsel %vm4543_vm4, %v2412_v34, %v2416_v19  ;;  %v2425_v44 = vor.u32 %v2424_v35, %v2421_v30  ;;  %v1044_v46 = vrot.slane %v1042_v37, 4  ;;  %v3699_v30 = vld [vmem:[%s4485_s7 + $0x84] sm:$0x1]  ;;  %v3700_v28 = vld [vmem:[%s4485_s7 + $0x88] sm:$0xf] }
  0x6f   : > { %v1034_v47 = vor.u32 %v1033_v41, %v1030_v40  ;;  %v1051_v49 = vshll.u32 %v3529_v25, 16  ;;  %v2433_v51 = vshrl.u32 %v3694_v27, 16  ;;  %v2436_v55 = vshll.u32 %v3694_v27, 16  ;;  %v3701_v35 = vld [vmem:[%s4485_s7 + $0x8c] sm:$0x1] }
  0x70   : > { %3950 = vmatmul.mubr.msk.bf16.vlgmr.msra.gmra.mrb[0].mxu1 %vm540_vm1, %v3536_v43  ;;  %v2426_v54 = vrot.slane %v2425_v44, 4  ;;  %v2442_v56 = vshll.u32 %v3695_v38, 16  ;;  %v2447_v57 = vshrl.u32 %v3696_v42, 16  ;;  %v1039_v59 = vrot.slane %v1037_v36, 5 }
  0x71   : > { %3958 = vmatpush3.bf16.msra.mxu1 %v1231_v9  ;;  %v1035_v58 = vrot.slane %v1034_v47, 4  ;;  %v1047_v60 = vrot.slane %v1045_v48, 5  ;;  %v2435_v61 = vrot.slane %v2433_v51, 4  ;;  %v1053_v0 = vrot.slane %v1051_v49, 5  ;;  %v3533_v9 = vld [vmem:[%s4485_s7 + $0x84] sm:$0x1] }
  0x72   : > { %v2431_v63 = vsel %vm4543_vm4, %v2426_v54, %v2430_v39  ;;  %v2438_v1 = vrot.slane %v2436_v55, 5  ;;  %v2444_v2 = vrot.slane %v2442_v56, 5  ;;  %4202 = vmatprep.subr.msk.bf16.mxu1 %vm553_vm0, %v4682_v53  ;;  %v2449_v5 = vrot.slane %v2447_v57, 4 }
  0x73   : > { %v3704_v4 = vcombine.low %v2417_v45, %v2431_v63  ;;  %v1048_v13 = vor.u32 %v1047_v60, %v1044_v46  ;;  %v2450_v6 = vshll.u32 %v3696_v42, 16  ;;  %v2456_v8 = vshll.u32 %v3697_v50, 16 }
  0x74   : > { %v2439_v7 = vor.u32 %v2438_v1, %v2435_v61  ;;  %v1056_v10 = vshrl.u32 %v3530_v52, 16  ;;  %v1059_v11 = vshll.u32 %v3530_v52, 16  ;;  %v1040_v15 = vsel %vm4543_vm4, %v1035_v58, %v1039_v59  ;;  %v4272_v61 = vld [vmem:[%s4485_s7 + $0x90] ss:$8 sps:$4 sm:$0xff]  }
  0x75   : > { %4030 = vmatmul.mubr.msk.bf16.vlgmr.msra.gmra.mrb[0].mxu0 %vm540_vm1, %v3704_v4  ;;  %v1049_v16 = vrot.slane %v1048_v13, 4  ;;  %v2452_v17 = vrot.slane %v2450_v6, 5  ;;  %v1070_v18 = vshrl.u32 %v3532_v3, 16  ;;  %v1065_v23 = vshll.u32 %v3531_v62, 16  ;;  %v3593_v1 = vld [vmem:[%s4987_s1 + $0x18] sm:$0xf] }
  0x76   : > { %4038 = vmatpush3.bf16.msra.mxu0 %v2636_v29  ;;  %v2440_v19 = vrot.slane %v2439_v7, 4  ;;  %v1058_v20 = vrot.slane %v1056_v10, 4  ;;  %v1061_v21 = vrot.slane %v1059_v11, 5  ;;  %v2458_v25 = vrot.slane %v2456_v8, 5  ;;  %v4273_v4 = vld [vmem:[%s4485_s7 + $0x98] ss:$8 sps:$4 sm:$0xff]  }
  0x77   : > { %v1054_v24 = vsel %vm4543_vm4, %v1049_v16, %v1053_v0  ;;  %v2453_v22 = vor.u32 %v2452_v17, %v2449_v5  ;;  %v1072_v27 = vrot.slane %v1070_v18, 4  ;;  %4210 = vmatprep.subr.msk.bf16.mxu0 %vm553_vm0, %v4696_v14  ;;  %v1073_v34 = vshll.u32 %v3532_v3, 16  ;;  %v4730_v13 = vld [vmem:[%s4987_s1 + $0x38] sm:$0xf]  ;;  %v4274_v6 = vld [vmem:[%s4485_s7 + $0xa0] ss:$8 sps:$4 sm:$0xff]  }
  0x78   : > { %v3537_v32 = vcombine.low %v1040_v15, %v1054_v24  ;;  %v2445_v29 = vsel %vm4543_vm4, %v2440_v19, %v2444_v2  ;;  %v1062_v33 = vor.u32 %v1061_v21, %v1058_v20  ;;  %v1079_v37 = vshll.u32 %v3533_v9, 16  ;;  %v4276_v10 = vld [vmem:[%s4485_s7 + $0xb0] ss:$8 sps:$4 sm:$0xff]   ;;  %v3578_v16 = vld [vmem:[%s4485_s7 + $0x94] sm:$0x1] }
  0x79   : > { %v2454_v36 = vrot.slane %v2453_v22, 4  ;;  %v2461_v38 = vshrl.u32 %v3698_v12, 16  ;;  %v2464_v31 = vshll.u32 %v3698_v12, 16  ;;  %v1067_v40 = vrot.slane %v1065_v23, 5  ;;  %v3577_v15 = vld [vmem:[%s4485_s7 + $0x90] sm:$0xf] }
  0x7a   : > { %3953 = vmatprep.mubr.msk.bf16.mxu1 %vm540_vm1, %v3537_v32  ;;  %v1063_v39 = vrot.slane %v1062_v33, 4  ;;  %v1075_v41 = vrot.slane %v1073_v34, 5  ;;  %v2475_v42 = vshrl.u32 %v3700_v28, 16  ;;  %v2470_v46 = vshll.u32 %v3699_v30, 16  ;;  %v3580_v17 = vld [vmem:[%s4485_s7 + $0x9c] sm:$0x1] }
  0x7b   : > { %v2459_v43 = vsel %vm4543_vm4, %v2454_v36, %v2458_v25  ;;  %v2463_v45 = vrot.slane %v2461_v38, 4  ;;  %v2466_v44 = vrot.slane %v2464_v31, 5  ;;  %v1081_v49 = vrot.slane %v1079_v37, 5  ;;  %v4275_v30 = vld [vmem:[%s4485_s7 + $0xa8] ss:$8 sps:$4 sm:$0xff]  }
  0x7c   : > { %v3705_v47 = vcombine.low %v2445_v29, %v2459_v43  ;;  %v1076_v48 = vor.u32 %v1075_v41, %v1072_v27  ;;  %v2477_v51 = vrot.slane %v2475_v42, 4  ;;  %v2478_v52 = vshll.u32 %v3700_v28, 16  ;;  %v3745_v25 = vld [vmem:[%s4485_s7 + $0x98] sm:$0xf]  ;;  %v3746_v27 = vld [vmem:[%s4485_s7 + $0x9c] sm:$0x1] }
  0x7d   : > { %v2467_v50 = vor.u32 %v2466_v44, %v2463_v45  ;;  %v2484_v54 = vshll.u32 %v3701_v35, 16  ;;  %v1068_v55 = vsel %vm4543_vm4, %v1063_v39, %v1067_v40  ;;  %v2472_v58 = vrot.slane %v2470_v46, 5  ;;  %v4277_v28 = vld [vmem:[%s4485_s7 + $0xb8] ss:$8 sps:$4 sm:$0xff]   ;;  %v3748_v37 = vld [vmem:[%s4485_s7 + $0xa4] sm:$0x1] }
  0x7e   : > { %4033 = vmatprep.mubr.msk.bf16.mxu0 %vm540_vm1, %v3705_v47  ;;  %v1077_v56 = vrot.slane %v1076_v48, 4  ;;  %v2480_v59 = vrot.slane %v2478_v52, 5  ;;  %v1352_v8 = vsel %vm553_vm0, %v4682_v53, 0  ;;  %v2757_v9 = vsel %vm553_vm0, %v4696_v14, 0  ;;  %v3579_v53 = vld [vmem:[%s4485_s7 + $0x98] sm:$0xf] }
  0x7f   : > { %v2468_v57 = vrot.slane %v2467_v50, 4  ;;  %v2486_v0 = vrot.slane %v2484_v54, 5  ;;  %v4741_v11 = vsel %vm553_vm0, %v3593_v1, 0  ;;  %v4745_v12 = vsel %vm553_vm0, %v4730_v13, 0  ;;  %v3747_v35 = vld [vmem:[%s4485_s7 + $0xa0] sm:$0xf] }
  0x80   : > { %v1082_v60 = vsel %vm4543_vm4, %v1077_v56, %v1081_v49  ;;  %v2481_v63 = vor.u32 %v2480_v59, %v2477_v51  ;;  %v1444_v18 = vshrl.u32 %v3577_v15, 16  ;;  %v1447_v14 = vshll.u32 %v3577_v15, 16  ;;  %v4278_v40 = vld [vmem:[%s4485_s7 + $0xc0] ss:$8 sps:$4 sm:$0xff]  }
  0x81   : > { %v3538_v62 = vcombine.low %v1068_v55, %v1082_v60  ;;  %v2473_v2 = vsel %vm4543_vm4, %v2468_v57, %v2472_v58  ;;  %v1453_v19 = vshll.u32 %v3578_v16, 16  ;;  %v1458_v20 = vshrl.u32 %v3579_v53, 16  ;;  %v3581_v49 = vld [vmem:[%s4485_s7 + $0xa0] sm:$0xf]  ;;  %v3582_v55 = vld [vmem:[%s4485_s7 + $0xa4] sm:$0x1] }
  0x82   : > { %v2482_v3 = vrot.slane %v2481_v63, 4  ;;  %v1461_v21 = vshll.u32 %v3579_v53, 16  ;;  %v1467_v23 = vshll.u32 %v3580_v17, 16  ;;  %v1446_v24 = vrot.slane %v1444_v18, 4  ;;  %v4280_v56 = vld [vmem:[%s4485_s7 + $0xd8] ss:$8 sps:$4 sm:$0xff]  }
  0x83   : > { %3954 = vmatmul.mubr.msk.bf16.gmra.mrb[4].mxu1 %vm540_vm1, %v3538_v62  ;;  %v1449_v22 = vrot.slane %v1447_v14, 5  ;;  %v1455_v32 = vrot.slane %v1453_v19, 5  ;;  %v1460_v29 = vrot.slane %v1458_v20, 4  ;;  %v2849_v38 = vshrl.u32 %v3745_v25, 16  ;;  %v3583_v59 = vld [vmem:[%s4485_s7 + $0xa8] sm:$0xf] }
  0x84   : > { %3959 = vmatprep.mubr.msk.bf16.mxu1 %vm540_vm1, %v4272_v61  ;;  %v2487_v5 = vsel %vm4543_vm4, %v2482_v3, %v2486_v0  ;;  %v1463_v33 = vrot.slane %v1461_v21, 5  ;;  %v1469_v34 = vrot.slane %v1467_v23, 5  ;;  %v2852_v31 = vshll.u32 %v3745_v25, 16  ;;  %v4776_v63 = vld [vmem:[%s4987_s1 + $0x1c] sm:$0xf] }
  0x85   : > { %v3706_v7 = vcombine.low %v2473_v2, %v2487_v5  ;;  %v1450_v36 = vor.u32 %v1449_v22, %v1446_v24  ;;  %v2858_v39 = vshll.u32 %v3746_v27, 16  ;;  %v2863_v42 = vshrl.u32 %v3747_v35, 16  ;;  %v3750_v18 = vld [vmem:[%s4485_s7 + $0xac] sm:$0x1]  ;;  %v4794_v14 = vld [vmem:[%s4987_s1 + $0x3c] sm:$0xf] }
  0x86   : > { %v1464_v41 = vor.u32 %v1463_v33, %v1460_v29  ;;  %v2866_v43 = vshll.u32 %v3747_v35, 16  ;;  %v2872_v45 = vshll.u32 %v3748_v37, 16  ;;  %v2851_v46 = vrot.slane %v2849_v38, 4  ;;  %v3751_v23 = vld [vmem:[%s4485_s7 + $0xb0] sm:$0xf] }
  0x87   : > { %4034 = vmatmul.mubr.msk.bf16.gmra.mrb[4].mxu0 %vm540_vm1, %v3706_v7  ;;  %v1451_v44 = vrot.slane %v1450_v36, 4  ;;  %v2854_v47 = vrot.slane %v2852_v31, 5  ;;  %v2860_v48 = vrot.slane %v2858_v39, 5  ;;  %v2865_v51 = vrot.slane %v2863_v42, 4  ;;  %v3752_v25 = vld [vmem:[%s4485_s7 + $0xb4] sm:$0x1] }
  0x88   : > { %4039 = vmatprep.mubr.msk.bf16.mxu0 %vm540_vm1, %v4273_v4  ;;  %v1465_v50 = vrot.slane %v1464_v41, 4  ;;  %v2868_v52 = vrot.slane %v2866_v43, 5  ;;  %v2874_v54 = vrot.slane %v2872_v45, 5  ;;  %v1472_v60 = vshrl.u32 %v3581_v49, 16  ;;  %v4279_v4 = vld [vmem:[%s4485_s7 + $0xc8] ss:$8 sps:$4 sm:$0xff]  }
  0x89   : > { %v1456_v57 = vsel %vm4543_vm4, %v1451_v44, %v1455_v32  ;;  %v2855_v58 = vor.u32 %v2854_v47, %v2851_v46  ;;  %v1475_v61 = vshll.u32 %v3581_v49, 16  ;;  %v1481_v2 = vshll.u32 %v3582_v55, 16  ;;  %v4284_v32 = vld [vmem:[%s4485_s7 + $0xf8] ss:$8 sps:$4 sm:$0xff]   ;;  %v3585_v36 = vld [vmem:[%s4485_s7 + $0xb0] sm:$0xf] }
  0x8a   : > { %v1470_v62 = vsel %vm4543_vm4, %v1465_v50, %v1469_v34  ;;  %v2869_v0 = vor.u32 %v2868_v52, %v2865_v51  ;;  %v1486_v3 = vshrl.u32 %v3583_v59, 16  ;;  %v1474_v7 = vrot.slane %v1472_v60, 4  ;;  %v3587_v44 = vld [vmem:[%s4485_s7 + $0xb8] sm:$0xf] }
  0x8b   : > { %3960 = vmatmul.mubr.msk.bf16.vlgmr.msra.gmra.mrb[0].mxu1 %vm540_vm1, %v4274_v6  ;;  %v4782_v5 = vcombine.low %v1456_v57, %v1470_v62  ;;  %v2856_v6 = vrot.slane %v2855_v58, 4  ;;  %v1483_v16 = vrot.slane %v1481_v2, 5  ;;  %v1489_v17 = vshll.u32 %v3583_v59, 16  ;;  %v4283_v50 = vld [vmem:[%s4485_s7 + $0xf0] ss:$8 sps:$4 sm:$0xff]  }
  0x8c   : > { %3968 = vmatpush3.bf16.msra.mxu1 %v1352_v8  ;;  %3963 = vmatprep.mubr.msk.bf16.mxu1 %vm540_vm1, %v4276_v10  ;;  %v1477_v8 = vrot.slane %v1475_v61, 5  ;;  %v4281_v10 = vld [vmem:[%s4485_s7 + $0xe0] ss:$8 sps:$4 sm:$0xff]   ;;  %v2870_v15 = vrot.slane %v2869_v0, 4  ;;  %v1488_v53 = vrot.slane %v1486_v3, 4  ;;  %v4798_v21 = vsel %vm553_vm0, %v4776_v63, 0 }
  0x8d   : > { %4203 = vmatprep.subr.msk.bf16.mxu1 %vm553_vm0, %v3593_v1  ;;  %v3584_v1 = vld [vmem:[%s4485_s7 + $0xac] sm:$0x1]  ;;  %v1491_v22 = vrot.slane %v1489_v17, 5  ;;  %v2886_v35 = vshll.u32 %v3750_v18, 16  ;;  %v2891_v39 = vshrl.u32 %v3751_v23, 16  ;;  %v2894_v43 = vshll.u32 %v3751_v23, 16 }
  0x8e   : > { %v1478_v19 = vor.u32 %v1477_v8, %v1474_v7  ;;  %v1495_v20 = vshll.u32 %v3584_v1, 16  ;;  %v2875_v24 = vsel %vm4543_vm4, %v2870_v15, %v2874_v54  ;;  %v2900_v45 = vshll.u32 %v3752_v25, 16  ;;  %v3588_v54 = vld [vmem:[%s4485_s7 + $0xbc] sm:$0x1]  ;;  %v3753_v61 = vld [vmem:[%s4485_s7 + $0xb8] sm:$0xf] }
  0x8f   : > { %4040 = vmatmul.mubr.msk.bf16.vlgmr.msra.gmra.mrb[0].mxu0 %vm540_vm1, %v4275_v30  ;;  %v4282_v30 = vld [vmem:[%s4485_s7 + $0xe8] ss:$8 sps:$4 sm:$0xff]   ;;  %v1492_v37 = vor.u32 %v1491_v22, %v1488_v53  ;;  %v2888_v42 = vrot.slane %v2886_v35, 5  ;;  %v4817_v49 = vsel %vm553_vm0, %v4794_v14, 0  ;;  %v2896_v51 = vrot.slane %v2894_v43, 5 }
  0x90   : > { %4048 = vmatpush3.bf16.msra.mxu0 %v2757_v9  ;;  %4043 = vmatprep.mubr.msk.bf16.mxu0 %vm540_vm1, %v4277_v28  ;;  %v3749_v9 = vld [vmem:[%s4485_s7 + $0xa8] sm:$0xf]  ;;  %v1479_v33 = vrot.slane %v1478_v19, 4  ;;  %v1497_v34 = vrot.slane %v1495_v20, 5  ;;  %v2902_v52 = vrot.slane %v2900_v45, 5  ;;  %v1500_v55 = vshrl.u32 %v3585_v36, 16 }
  0x91   : > { %4211 = vmatprep.subr.msk.bf16.mxu0 %vm553_vm0, %v4730_v13  ;;  %v2861_v13 = vsel %vm4543_vm4, %v2856_v6, %v2860_v48  ;;  %v2877_v27 = vshrl.u32 %v3749_v9, 16  ;;  %v2880_v28 = vshll.u32 %v3749_v9, 16  ;;  %v1493_v46 = vrot.slane %v1492_v37, 4  ;;  %v3754_v3 = vld [vmem:[%s4485_s7 + $0xbc] sm:$0x1] }
  0x92   : > { %v4806_v29 = vcombine.low %v2861_v13, %v2875_v24  ;;  %v1484_v41 = vsel %vm4543_vm4, %v1479_v33, %v1483_v16  ;;  %v2893_v48 = vrot.slane %v2891_v39, 4  ;;  %v1514_v60 = vshrl.u32 %v3587_v44, 16  ;;  %v4285_v6 = vld [vmem:[%s4485_s7 + $0x100] ss:$8 sps:$4 sm:$0xff]   ;;  %v3756_v13 = vld [vmem:[%s4485_s7 + $0xc4] sm:$0x1] }
  0x93   : > { %3964 = vmatmul.mubr.msk.bf16.gmra.mrb[4].mxu1 %vm540_vm1, %v4278_v40  ;;  %v2879_v38 = vrot.slane %v2877_v27, 4  ;;  %v2882_v31 = vrot.slane %v2880_v28, 5  ;;  %v3586_v40 = vld [vmem:[%s4485_s7 + $0xb4] sm:$0x1]  ;;  %v1498_v57 = vsel %vm4543_vm4, %v1493_v46, %v1497_v34  ;;  %v1502_v1 = vrot.slane %v1500_v55, 4 }
  0x94   : > { %3969 = vmatprep.mubr.msk.bf16.mxu1 %vm540_vm1, %v4280_v56  ;;  %v1503_v56 = vshll.u32 %v3585_v36, 16  ;;  %v1509_v59 = vshll.u32 %v3586_v40, 16  ;;  %v4827_v62 = vcombine.low %v1484_v41, %v1498_v57  ;;  %v2897_v0 = vor.u32 %v2896_v51, %v2893_v48  ;;  %v3589_v25 = vld [vmem:[%s4485_s7 + $0xc0] sm:$0xf]  ;;  %v3590_v34 = vld [vmem:[%s4485_s7 + $0xc4] sm:$0x1] }
  0x95   : > { %v2883_v47 = vor.u32 %v2882_v31, %v2879_v38  ;;  %v1516_v9 = vrot.slane %v1514_v60, 4  ;;  %v1523_v53 = vshll.u32 %v3588_v54, 16  ;;  %v2905_v17 = vshrl.u32 %v3753_v61, 16  ;;  %v3591_v35 = vld [vmem:[%s4485_s7 + $0xc8] sm:$0xf] }
  0x96   : > { %v1505_v2 = vrot.slane %v1503_v56, 5  ;;  %v1511_v8 = vrot.slane %v1509_v59, 5  ;;  %v2898_v15 = vrot.slane %v2897_v0, 4  ;;  %v2908_v19 = vshll.u32 %v3753_v61, 16  ;;  %v4287_v36 = vld [vmem:[%s4485_s7 + $0x110] ss:$8 sps:$4 sm:$0xff]  }
  0x97   : > { %4044 = vmatmul.mubr.msk.bf16.gmra.mrb[4].mxu0 %vm540_vm1, %v4279_v4  ;;  %v2884_v58 = vrot.slane %v2883_v47, 4  ;;  %v3755_v4 = vld [vmem:[%s4485_s7 + $0xc0] sm:$0xf]  ;;  %v2914_v20 = vshll.u32 %v3754_v3, 16  ;;  %v1525_v24 = vrot.slane %v1523_v53, 5  ;;  %v2907_v22 = vrot.slane %v2905_v17, 4 }
  0x98   : > { %4049 = vmatprep.mubr.msk.bf16.mxu0 %vm540_vm1, %v4281_v10  ;;  %v4286_v10 = vld [vmem:[%s4485_s7 + $0x108] ss:$8 sps:$4 sm:$0xff]   ;;  %v1506_v16 = vor.u32 %v1505_v2, %v1502_v1  ;;  %v2903_v23 = vsel %vm4543_vm4, %v2898_v15, %v2902_v52  ;;  %v2928_v31 = vshll.u32 %v3756_v13, 16  ;;  %v3592_v41 = vld [vmem:[%s4485_s7 + $0xcc] sm:$0x1]  ;;  %v1531_v43 = vshll.u32 %v3589_v25, 16 }
  0x99   : > { %v2889_v7 = vsel %vm4543_vm4, %v2884_v58, %v2888_v42  ;;  %v2916_v33 = vrot.slane %v2914_v20, 5  ;;  %v1528_v42 = vshrl.u32 %v3589_v25, 16  ;;  %v1542_v46 = vshrl.u32 %v3591_v35, 16  ;;  %v3757_v47 = vld [vmem:[%s4485_s7 + $0xc8] sm:$0xf] }
  0x9a   : > { %v4844_v27 = vcombine.low %v2889_v7, %v2903_v23  ;;  %v2930_v45 = vrot.slane %v2928_v31, 5  ;;  %v1533_v52 = vrot.slane %v1531_v43, 5  ;;  %v3758_v54 = vld [vmem:[%s4485_s7 + $0xcc] sm:$0x1]  ;;  %v3759_v59 = vld [vmem:[%s4485_s7 + $0xd0] sm:$0xf] }
  0x9b   : > { %3970 = vmatmul.mubr.msk.bf16.vlgmr.msra.gmra.mrb[0].mxu1 %vm540_vm1, %v4282_v30  ;;  %v1507_v30 = vrot.slane %v1506_v16, 4  ;;  %v1530_v51 = vrot.slane %v1528_v42, 4  ;;  %v1544_v58 = vrot.slane %v1542_v46, 4  ;;  %v1545_v61 = vshll.u32 %v3591_v35, 16  ;;  %v3760_v1 = vld [vmem:[%s4485_s7 + $0xd4] sm:$0x1] }
  0x9c   : > { %3978 = vmatpush3.bf16.msra.mxu1 %v4741_v11  ;;  %3973 = vmatprep.mubr.msk.bf16.mxu1 %vm540_vm1, %v4284_v32  ;;  %v1517_v11 = vshll.u32 %v3587_v44, 16  ;;  %v2910_v32 = vrot.slane %v2908_v19, 5  ;;  %v1537_v44 = vshll.u32 %v3590_v34, 16  ;;  %v1551_v0 = vshll.u32 %v3592_v41, 16  ;;  %v3602_v7 = vld [vmem:[%s4485_s7 + $0xd8] sm:$0xf] }
  0x9d   : > { %4204 = vmatprep.subr.msk.bf16.mxu1 %vm553_vm0, %v4776_v63  ;;  %v2919_v63 = vshrl.u32 %v3755_v4, 16  ;;  %v1512_v37 = vsel %vm4543_vm4, %v1507_v30, %v1511_v8  ;;  %v1534_v60 = vor.u32 %v1533_v52, %v1530_v51  ;;  %v2933_v3 = vshrl.u32 %v3757_v47, 16  ;;  %v3603_v15 = vld [vmem:[%s4485_s7 + $0xdc] sm:$0x1]  ;;  %v3604_v13 = vld [vmem:[%s4485_s7 + $0xe0] sm:$0xf] }
  0x9e   : > { %v1519_v18 = vrot.slane %v1517_v11, 5  ;;  %v2911_v40 = vor.u32 %v2910_v32, %v2907_v22  ;;  %v1539_v57 = vrot.slane %v1537_v44, 5  ;;  %v1553_v11 = vrot.slane %v1551_v0, 5  ;;  %v3605_v22 = vld [vmem:[%s4485_s7 + $0xe4] sm:$0x1] }
  0x9f   : > { %4050 = vmatmul.mubr.msk.bf16.vlgmr.msra.gmra.mrb[0].mxu0 %vm540_vm1, %v4283_v50  ;;  %v2921_v38 = vrot.slane %v2919_v63, 4  ;;  %v1535_v8 = vrot.slane %v1534_v60, 4  ;;  %v2935_v53 = vrot.slane %v2933_v3, 4  ;;  %v2950_v30 = vshll.u32 %v3759_v59, 16  ;;  %v3770_v34 = vld [vmem:[%s4485_s7 + $0xe0] sm:$0xf] }
  0xa0   : > { %4058 = vmatpush3.bf16.msra.mxu0 %v4745_v12  ;;  %4053 = vmatprep.mubr.msk.bf16.mxu0 %vm540_vm1, %v4285_v6  ;;  %v1520_v28 = vor.u32 %v1519_v18, %v1516_v9  ;;  %v2922_v12 = vshll.u32 %v3755_v4, 16  ;;  %v2912_v50 = vrot.slane %v2911_v40, 4  ;;  %v2936_v4 = vshll.u32 %v3757_v47, 16  ;;  %v3772_v41 = vld [vmem:[%s4485_s7 + $0xe8] sm:$0xf] }
  0xa1   : > { %4212 = vmatprep.subr.msk.bf16.mxu0 %vm553_vm0, %v4794_v14  ;;  %v2942_v6 = vshll.u32 %v3758_v54, 16  ;;  %v1547_v9 = vrot.slane %v1545_v61, 5  ;;  %v1674_v25 = vshrl.u32 %v3602_v7, 16  ;;  %v1683_v32 = vshll.u32 %v3603_v15, 16  ;;  %v3607_v0 = vld [vmem:[%s4485_s7 + $0xec] sm:$0x1] }
  0xa2   : > { %v1521_v39 = vrot.slane %v1520_v28, 4  ;;  %v2924_v14 = vrot.slane %v2922_v12, 5  ;;  %v2938_v17 = vrot.slane %v2936_v4, 5  ;;  %v3771_v12 = vld [vmem:[%s4485_s7 + $0xe4] sm:$0x1]  ;;  %v1697_v46 = vshll.u32 %v3605_v22, 16 }
  0xa3   : > { %3974 = vmatmul.mubr.msk.bf16.gmra.mrb[4].mxu1 %vm540_vm1, %v4286_v10  ;;  %v2947_v10 = vshrl.u32 %v3759_v59, 16  ;;  %v2944_v18 = vrot.slane %v2942_v6, 5  ;;  %v1548_v20 = vor.u32 %v1547_v9, %v1544_v58  ;;  %v3079_v47 = vshrl.u32 %v3770_v34, 16  ;;  %v3606_v58 = vld [vmem:[%s4485_s7 + $0xe8] sm:$0xf] }
  0xa4   : > { %3979 = vmatprep.mubr.msk.bf16.mxu1 %vm540_vm1, %v4782_v5  ;;  %v1526_v48 = vsel %vm4543_vm4, %v1521_v39, %v1525_v24  ;;  %v2925_v56 = vor.u32 %v2924_v14, %v2921_v38  ;;  %v2917_v5 = vsel %vm4543_vm4, %v2912_v50, %v2916_v33  ;;  %v2939_v23 = vor.u32 %v2938_v17, %v2935_v53  ;;  %v3776_v22 = vld [vmem:[%s4485_s7 + $0xf8] sm:$0xf] }
  0xa5   : > { %v3596_v55 = vcombine.low %v1512_v37, %v1526_v48  ;;  %v2949_v63 = vrot.slane %v2947_v10, 4  ;;  %v2956_v24 = vshll.u32 %v3760_v1, 16  ;;  %v1549_v28 = vrot.slane %v1548_v20, 4  ;;  %v3608_v1 = vld [vmem:[%s4485_s7 + $0xf0] sm:$0xf] }
  0xa6   : > { %v2926_v2 = vrot.slane %v2925_v56, 4  ;;  %v1688_v33 = vshrl.u32 %v3604_v13, 16  ;;  %v2940_v35 = vrot.slane %v2939_v23, 4  ;;  %v1676_v38 = vrot.slane %v1674_v25, 4 }
  0xa7   : > { %4054 = vmatmul.mubr.msk.bf16.gmra.mrb[4].mxu0 %vm540_vm1, %v4287_v36  ;;  %v2952_v36 = vrot.slane %v2950_v30, 5  ;;  %v2958_v37 = vrot.slane %v2956_v24, 5  ;;  %v1685_v39 = vrot.slane %v1683_v32, 5  ;;  %v3082_v48 = vshll.u32 %v3770_v34, 16  ;;  %v3775_v24 = vld [vmem:[%s4485_s7 + $0xf4] sm:$0x1] }
  0xa8   : > { %4059 = vmatprep.mubr.msk.bf16.mxu0 %vm540_vm1, %v4806_v29  ;;  %v2931_v16 = vsel %vm4543_vm4, %v2926_v2, %v2930_v45  ;;  %v1540_v29 = vsel %vm4543_vm4, %v1535_v8, %v1539_v57  ;;  %v1690_v40 = vrot.slane %v1688_v33, 4  ;;  %v2945_v43 = vsel %vm4543_vm4, %v2940_v35, %v2944_v18  ;;  %v3777_v33 = vld [vmem:[%s4485_s7 + $0xfc] sm:$0x1] }
  0xa9   : > { %v3764_v19 = vcombine.low %v2917_v5, %v2931_v16  ;;  %v2953_v14 = vor.u32 %v2952_v36, %v2949_v63  ;;  %v1691_v45 = vshll.u32 %v3604_v13, 16  ;;  %v3088_v52 = vshll.u32 %v3771_v12, 16  ;;  %v3609_v16 = vld [vmem:[%s4485_s7 + $0xf4] sm:$0x1] }
  0xaa   : > { %v3093_v54 = vshrl.u32 %v3772_v41, 16  ;;  %v1699_v56 = vrot.slane %v1697_v46, 5  ;;  %v3081_v57 = vrot.slane %v3079_v47, 4  ;;  %v3096_v6 = vshll.u32 %v3772_v41, 16 }
  0xab   : > { %3980 = vmatmul.mubr.msk.bf16.vlgmr.msra.gmra.mrb[0].mxu1 %vm540_vm1, %v4827_v62  ;;  %v1677_v62 = vshll.u32 %v3602_v7, 16  ;;  %v2954_v50 = vrot.slane %v2953_v14, 4  ;;  %v1693_v51 = vrot.slane %v1691_v45, 5  ;;  %v3090_v60 = vrot.slane %v3088_v52, 5  ;;  %v3612_v45 = vld [vmem:[%s4485_s7 + $0x100] sm:$0xf] }
  0xac   : > { %3988 = vmatpush3.bf16.msra.mxu1 %v4798_v21  ;;  %3983 = vmatprep.mubr.msk.bf16.mxu1 %vm540_vm1, %v3596_v55  ;;  %v1554_v21 = vsel %vm4543_vm4, %v1549_v28, %v1553_v11  ;;  %v3095_v61 = vrot.slane %v3093_v54, 4  ;;  %v1702_v9 = vshrl.u32 %v3606_v58, 16  ;;  %v1705_v11 = vshll.u32 %v3606_v58, 16 }
  0xad   : > { %v1679_v31 = vrot.slane %v1677_v62, 5  ;;  %v3597_v42 = vcombine.low %v1540_v29, %v1554_v21  ;;  %v2959_v59 = vsel %vm4543_vm4, %v2954_v50, %v2958_v37  ;;  %v1694_v5 = vor.u32 %v1693_v51, %v1690_v40  ;;  %v3774_v29 = vld [vmem:[%s4485_s7 + $0xf0] sm:$0xf]  ;;  %v3611_v40 = vld [vmem:[%s4485_s7 + $0xfc] sm:$0x1] }
  0xae   : > { %v3765_v2 = vcombine.low %v2945_v43, %v2959_v59  ;;  %v3098_v15 = vrot.slane %v3096_v6, 5  ;;  %v1711_v53 = vshll.u32 %v3607_v0, 16  ;;  %v1716_v17 = vshrl.u32 %v3608_v1, 16 }
  0xaf   : > { %4060 = vmatmul.mubr.msk.bf16.vlgmr.msra.gmra.mrb[0].mxu0 %vm540_vm1, %v4844_v27  ;;  %v1680_v44 = vor.u32 %v1679_v31, %v1676_v38  ;;  %v3773_v27 = vld [vmem:[%s4485_s7 + $0xec] sm:$0x1]  ;;  %v1695_v7 = vrot.slane %v1694_v5, 4  ;;  %v1704_v13 = vrot.slane %v1702_v9, 4  ;;  %v1719_v62 = vshll.u32 %v3608_v1, 16 }
  0xb0   : > { %4068 = vmatpush3.bf16.msra.mxu0 %v4817_v49  ;;  %4063 = vmatprep.mubr.msk.bf16.mxu0 %vm540_vm1, %v3764_v19  ;;  %v3084_v49 = vrot.slane %v3082_v48, 5  ;;  %v3102_v8 = vshll.u32 %v3773_v27, 16  ;;  %v1707_v19 = vrot.slane %v1705_v11, 5  ;;  %v3099_v63 = vor.u32 %v3098_v15, %v3095_v61  ;;  %v3610_v38 = vld [vmem:[%s4485_s7 + $0xf8] sm:$0xf] }
  0xb1   : > { %v1681_v55 = vrot.slane %v1680_v44, 4  ;;  %v1700_v18 = vsel %vm4543_vm4, %v1695_v7, %v1699_v56  ;;  %v1713_v30 = vrot.slane %v1711_v53, 5  ;;  %v1718_v28 = vrot.slane %v1716_v17, 4  ;;  %v3778_v61 = vld [vmem:[%s4485_s7 + $0x100] sm:$0xf] }
  0xb2   : > { %v3085_v4 = vor.u32 %v3084_v49, %v3081_v57  ;;  %v3104_v23 = vrot.slane %v3102_v8, 5  ;;  %v1708_v25 = vor.u32 %v1707_v19, %v1704_v13  ;;  %v1725_v32 = vshll.u32 %v3609_v16, 16  ;;  %v3779_v11 = vld [vmem:[%s4485_s7 + $0x104] sm:$0x1]  ;;  %v3781_v19 = vld [vmem:[%s4485_s7 + $0x10c] sm:$0x1] }
  0xb3   : > { %3984 = vmatmul.mubr.msk.bf16.gmra.mrb[4].mxu1 %vm540_vm1, %v3597_v42  ;;  %v1686_v3 = vsel %vm4543_vm4, %v1681_v55, %v1685_v39  ;;  %v3100_v35 = vrot.slane %v3099_v63, 4  ;;  %v3107_v36 = vshrl.u32 %v3774_v29, 16  ;;  %v3110_v37 = vshll.u32 %v3774_v29, 16  ;;  %v3613_v55 = vld [vmem:[%s4485_s7 + $0x104] sm:$0x1] }
  0xb4   : > { %v3086_v10 = vrot.slane %v3085_v4, 4  ;;  %v3619_v20 = vcombine.low %v1686_v3, %v1700_v18  ;;  %v1709_v12 = vrot.slane %v1708_v25, 4  ;;  %v1721_v21 = vrot.slane %v1719_v62, 5  ;;  %v3780_v4 = vld [vmem:[%s4485_s7 + $0x108] sm:$0xf] }
  0xb5   : > { %v3116_v31 = vshll.u32 %v3775_v24, 16  ;;  %v3121_v39 = vshrl.u32 %v3776_v22, 16  ;;  %v3105_v41 = vsel %vm4543_vm4, %v3100_v35, %v3104_v23  ;;  %v1727_v42 = vrot.slane %v1725_v32, 5  ;;  %v3614_v24 = vld [vmem:[%s4485_s7 + $0x108] sm:$0xf] }
  0xb6   : > { %3989 = vmatprep.mubr.msk.bf16.mxu1 %vm540_vm1, %v3619_v20  ;;  %v3091_v34 = vsel %vm4543_vm4, %v3086_v10, %v3090_v60  ;;  %v3109_v43 = vrot.slane %v3107_v36, 4  ;;  %v3112_v14 = vrot.slane %v3110_v37, 5  ;;  %v1714_v46 = vsel %vm4543_vm4, %v1709_v12, %v1713_v30  ;;  %v3616_v32 = vld [vmem:[%s4485_s7 + $0x110] sm:$0xf]  ;;  %v3615_v37 = vld [vmem:[%s4485_s7 + $0x10c] sm:$0x1] }
  0xb7   : > { %4064 = vmatmul.mubr.msk.bf16.gmra.mrb[4].mxu0 %vm540_vm1, %v3765_v2  ;;  %v3787_v44 = vcombine.low %v3091_v34, %v3105_v41  ;;  %v1722_v47 = vor.u32 %v1721_v21, %v1718_v28  ;;  %v3123_v48 = vrot.slane %v3121_v39, 4  ;;  %v3124_v51 = vshll.u32 %v3776_v22, 16 }
  0xb8   : > { %v3113_v50 = vor.u32 %v3112_v14, %v3109_v43  ;;  %v3130_v27 = vshll.u32 %v3777_v33, 16  ;;  %v1730_v52 = vshrl.u32 %v3610_v38, 16  ;;  %v1733_v56 = vshll.u32 %v3610_v38, 16 }
  0xb9   : > { %4069 = vmatprep.mubr.msk.bf16.mxu0 %vm540_vm1, %v3787_v44  ;;  %v1723_v54 = vrot.slane %v1722_v47, 4  ;;  %v1739_v57 = vshll.u32 %v3611_v40, 16  ;;  %v1744_v49 = vshrl.u32 %v3612_v45, 16  ;;  %v3118_v59 = vrot.slane %v3116_v31, 5  ;;  %v3782_v47 = vld [vmem:[%s4485_s7 + $0x110] sm:$0xf] }
  0xba   : > { %v3114_v58 = vrot.slane %v3113_v50, 4  ;;  %v3126_v5 = vrot.slane %v3124_v51, 5  ;;  %v1732_v60 = vrot.slane %v1730_v52, 4  ;;  %v3132_v1 = vrot.slane %v3130_v27, 5  ;;  %v3784_v27 = vld [vmem:[%s4485_s7 + $0x118] sm:$0xf] }
  0xbb   : > { %v1728_v0 = vsel %vm4543_vm4, %v1723_v54, %v1727_v42  ;;  %v1735_v2 = vrot.slane %v1733_v56, 5  ;;  %v1741_v3 = vrot.slane %v1739_v57, 5  ;;  %v1746_v8 = vrot.slane %v1744_v49, 4  ;;  %v3617_v42 = vld [vmem:[%s4485_s7 + $0x114] sm:$0x1] }
  0xbc   : > { %v3620_v6 = vcombine.low %v1714_v46, %v1728_v0  ;;  %v3127_v7 = vor.u32 %v3126_v5, %v3123_v48  ;;  %v1747_v9 = vshll.u32 %v3612_v45, 16  ;;  %v1753_v15 = vshll.u32 %v3613_v55, 16  ;;  %v3783_v57 = vld [vmem:[%s4485_s7 + $0x114] sm:$0x1] }
  0xbd   : > { %v1736_v10 = vor.u32 %v1735_v2, %v1732_v60  ;;  %v3135_v16 = vshrl.u32 %v3778_v61, 16  ;;  %v3138_v53 = vshll.u32 %v3778_v61, 16  ;;  %v3119_v17 = vsel %vm4543_vm4, %v3114_v58, %v3118_v59 }
  0xbe   : > { %3990 = vmatmul.mubr.msk.bf16.vlgmr.msra.gmra.mrb[0].mxu1 %vm540_vm1, %v3620_v6  ;;  %v3128_v18 = vrot.slane %v3127_v7, 4  ;;  %v1749_v13 = vrot.slane %v1747_v9, 5  ;;  %v3149_v29 = vshrl.u32 %v3780_v4, 16  ;;  %v3144_v30 = vshll.u32 %v3779_v11, 16 }
  0xbf   : > { %v1737_v20 = vrot.slane %v1736_v10, 4  ;;  %v3137_v63 = vrot.slane %v3135_v16, 4  ;;  %v3140_v23 = vrot.slane %v3138_v53, 5  ;;  %v1755_v28 = vrot.slane %v1753_v15, 5 }
  0xc0   : > { %v3133_v22 = vsel %vm4543_vm4, %v3128_v18, %v3132_v1  ;;  %v1750_v25 = vor.u32 %v1749_v13, %v1746_v8  ;;  %v3151_v62 = vrot.slane %v3149_v29, 4  ;;  %v3152_v36 = vshll.u32 %v3780_v4, 16  ;;  %v3785_v1 = vld [vmem:[%s4485_s7 + $0x11c] sm:$0x1]  ;;  %s3805_s7 = sshll.u32 %s4998_s11, 5 }
  0xc1   : > { %v3788_v33 = vcombine.low %v3119_v17, %v3133_v22  ;;  %v1742_v34 = vsel %vm4543_vm4, %v1737_v20, %v1741_v3  ;;  %v3141_v35 = vor.u32 %v3140_v23, %v3137_v63  ;;  %v3158_v12 = vshll.u32 %v3781_v19, 16  ;;  %s4965_s19 = scalar_lea.vmem %s4988_s2, %s3805_s7 }
  0xc2   : > { %v1751_v38 = vrot.slane %v1750_v25, 4  ;;  %v1758_v21 = vshrl.u32 %v3614_v24, 16  ;;  %v1761_v31 = vshll.u32 %v3614_v24, 16  ;;  %v3146_v40 = vrot.slane %v3144_v30, 5 }
  0xc3   : > { %4070 = vmatmul.mubr.msk.bf16.vlgmr.msra.gmra.mrb[0].mxu0 %vm540_vm1, %v3788_v33  ;;  %v3142_v39 = vrot.slane %v3141_v35, 4  ;;  %v3154_v41 = vrot.slane %v3152_v36, 5  ;;  %v1772_v43 = vshrl.u32 %v3616_v32, 16  ;;  %v1767_v46 = vshll.u32 %v3615_v37, 16 }
  0xc4   : > { %v1756_v14 = vsel %vm4543_vm4, %v1751_v38, %v1755_v28  ;;  %v1760_v45 = vrot.slane %v1758_v21, 4  ;;  %v1763_v44 = vrot.slane %v1761_v31, 5  ;;  %v3160_v51 = vrot.slane %v3158_v12, 5 }
  0xc5   : > { %v3621_v48 = vcombine.low %v1742_v34, %v1756_v14  ;;  %v3155_v50 = vor.u32 %v3154_v41, %v3151_v62  ;;  %v1774_v54 = vrot.slane %v1772_v43, 4  ;;  %v1775_v55 = vshll.u32 %v3616_v32, 16 }
  0xc6   : > { %v1764_v52 = vor.u32 %v1763_v44, %v1760_v45  ;;  %v1781_v56 = vshll.u32 %v3617_v42, 16  ;;  %v3147_v49 = vsel %vm4543_vm4, %v3142_v39, %v3146_v40  ;;  %v3163_v59 = vshrl.u32 %v3782_v47, 16 }
  0xc7   : > { %3993 = vmatprep.mubr.msk.bf16.mxu1 %vm540_vm1, %v3621_v48  ;;  %v3156_v58 = vrot.slane %v3155_v50, 4  ;;  %v3166_v5 = vshll.u32 %v3782_v47, 16  ;;  %v1769_v61 = vrot.slane %v1767_v46, 5  ;;  %v1777_v0 = vrot.slane %v1775_v55, 5 }
  0xc8   : > { %v1765_v60 = vrot.slane %v1764_v52, 4  ;;  %v3177_v2 = vshrl.u32 %v3784_v27, 16  ;;  %v3165_v4 = vrot.slane %v3163_v59, 4  ;;  %v3172_v7 = vshll.u32 %v3783_v57, 16 }
  0xc9   : > { %v3161_v3 = vsel %vm4543_vm4, %v3156_v58, %v3160_v51  ;;  %v3168_v6 = vrot.slane %v3166_v5, 5  ;;  %v1778_v9 = vor.u32 %v1777_v0, %v1774_v54  ;;  %v1783_v11 = vrot.slane %v1781_v56, 5 }
  0xca   : > { %v3789_v8 = vcombine.low %v3147_v49, %v3161_v3  ;;  %v3179_v15 = vrot.slane %v3177_v2, 4  ;;  %v3180_v16 = vshll.u32 %v3784_v27, 16  ;;  %v3186_v53 = vshll.u32 %v3785_v1, 16 }
  0xcb   : > { %v3169_v10 = vor.u32 %v3168_v6, %v3165_v4  ;;  %v1770_v17 = vsel %vm4543_vm4, %v1765_v60, %v1769_v61  ;;  %v1779_v18 = vrot.slane %v1778_v9, 4  ;;  %v3174_v19 = vrot.slane %v3172_v7, 5 }
  0xcc   : > { %4073 = vmatprep.mubr.msk.bf16.mxu0 %vm540_vm1, %v3789_v8  ;;  %v3182_v29 = vrot.slane %v3180_v16, 5  ;;  %v3188_v30 = vrot.slane %v3186_v53, 5 }
  0xcd   : > { %v3170_v13 = vrot.slane %v3169_v10, 4  ;;  %v1784_v20 = vsel %vm4543_vm4, %v1779_v18, %v1783_v11 }
  0xce   : > { %v3622_v63 = vcombine.low %v1770_v17, %v1784_v20  ;;  %v3183_v23 = vor.u32 %v3182_v29, %v3179_v15 }
  0xcf   : > { %v3175_v24 = vsel %vm4543_vm4, %v3170_v13, %v3174_v19 }
  0xd0   : > { %3994 = vmatmul.mubr.msk.bf16.gmra.mrb[4].mxu1 %vm540_vm1, %v3622_v63  ;;  %v3184_v22 = vrot.slane %v3183_v23, 4 }
  0xd2   : > { %v3189_v25 = vsel %vm4543_vm4, %v3184_v22, %v3188_v30 }
  0xd3   : > { %v3790_v28 = vcombine.low %v3175_v24, %v3189_v25 }
  0xd5   : > { %4074 = vmatmul.mubr.msk.bf16.gmra.mrb[4].mxu0 %vm540_vm1, %v3790_v28 }
 0x191   : > { %v3991_v62 = vpop.f32.mrb[0].mxu1 }
 0x192   : > { %v1848_v32 = vpop.f32.mrb[1].mxu1 }
 0x193   : > { %v3992_v33 = vpop.f32.mrb[2].mxu1 }
 0x194   : > { %v1851_v34 = vpop.f32.mrb[3].mxu1 }
 0x196   : > { %v4071_v35 = vpop.f32.mrb[0].mxu0 }
 0x197   : > { %v4077_v36 = vadd.f32 %v4071_v35, %v3991_v62  ;;  %v3253_v37 = vpop.f32.mrb[1].mxu0 }
 0x198   : > { %v4078_v38 = vadd.f32 %v3253_v37, %v1848_v32  ;;  %v4072_v12 = vpop.f32.mrb[2].mxu0 }
 0x199   : > { %v3302_v21 = vmul.f32 0.2, %v4077_v36  ;;  %v4079_v31 = vadd.f32 %v4072_v12, %v3992_v33  ;;  %v3256_v39 = vpop.f32.mrb[3].mxu0  ;;  %vm3294_vm5 = vcmp.ge.f32.partialorder %v4077_v36, 0.0 }
 0x19a   : > { %v3300_v26 = vmul.f32 0.2, %v4078_v38  ;;  %v4080_v40 = vadd.f32 %v3256_v39, %v1851_v34  ;;  %vm3292_vm6 = vcmp.ge.f32.partialorder %v4078_v38, 0.0 }
 0x19b   : > { %vm3295_vm7 = vcmp.ge.f32.partialorder %v4079_v31, 0.0  ;;  %v3303_v41 = vmul.f32 0.2, %v4079_v31  ;;  %v3310_v43 = vsel %vm3294_vm5, %v4077_v36, %v3302_v21 }
 0x19c   : > { %vm3293_vm8 = vcmp.ge.f32.partialorder %v4080_v40, 0.0  ;;  %v3301_v42 = vmul.f32 0.2, %v4080_v40  ;;  %v3308_v45 = vsel %vm3292_vm6, %v4078_v38, %v3300_v26 }
 0x19d   : > { %v3311_v14 = vsel %vm3295_vm7, %v4079_v31, %v3303_v41 }
 0x19e   : > { %v3822_v44 = vpack.c.bf16 %v3311_v14, %v3310_v43  ;;  %v3309_v46 = vsel %vm3293_vm8, %v4080_v40, %v3301_v42 }
 0x19f   : > { %v3817_v47 = vpack.c.bf16 %v3309_v46, %v3308_v45 }
 0x1a0   : > { %3834 = vst [vmem:[%s4965_s19 + $0x8] sm:$0xff] %v3822_v44  }
 0x1a1   : > { %3818 = vst [vmem:[%s4965_s19] sm:$0xff] %v3817_v47  }
 0x1a3   : > { %v3995_v48 = vpop.f32.mrb[4].mxu1 }
 0x1a4   : > { %v1864_v50 = vpop.f32.mrb[5].mxu1 }
 0x1a5   : > { %v3996_v51 = vpop.f32.mrb[6].mxu1 }
 0x1a6   : > { %v1867_v27 = vpop.f32.mrb[7].mxu1 }
 0x1a8   : > { %v4075_v52 = vpop.f32.mrb[4].mxu0 }
 0x1a9   : > { %v4081_v54 = vadd.f32 %v4075_v52, %v3995_v48  ;;  %v3269_v55 = vpop.f32.mrb[5].mxu0 }
 0x1aa   : > { %v4082_v56 = vadd.f32 %v3269_v55, %v1864_v50  ;;  %v4076_v57 = vpop.f32.mrb[6].mxu0 }
 0x1ab   : > { %v3306_v49 = vmul.f32 0.2, %v4081_v54  ;;  %v4083_v58 = vadd.f32 %v4076_v57, %v3996_v51  ;;  %v3272_v59 = vpop.f32.mrb[7].mxu0  ;;  %vm3298_vm9 = vcmp.ge.f32.partialorder %v4081_v54, 0.0 }
 0x1ac   : > { %v3304_v5 = vmul.f32 0.2, %v4082_v56  ;;  %v4084_v60 = vadd.f32 %v3272_v59, %v1867_v27  ;;  %vm3296_vm10 = vcmp.ge.f32.partialorder %v4082_v56, 0.0 }
 0x1ad   : > { %vm3299_vm11 = vcmp.ge.f32.partialorder %v4083_v58, 0.0  ;;  %v3307_v61 = vmul.f32 0.2, %v4083_v58  ;;  %v3314_v1 = vsel %vm3298_vm9, %v4081_v54, %v3306_v49 }
 0x1ae   : > { %vm3297_vm12 = vcmp.ge.f32.partialorder %v4084_v60, 0.0  ;;  %v3305_v0 = vmul.f32 0.2, %v4084_v60  ;;  %v3312_v3 = vsel %vm3296_vm10, %v4082_v56, %v3304_v5 }
 0x1af   : > { %v3315_v2 = vsel %vm3299_vm11, %v4083_v58, %v3307_v61 }
 0x1b0   : > { %v3832_v4 = vpack.c.bf16 %v3315_v2, %v3314_v1  ;;  %v3313_v6 = vsel %vm3297_vm12, %v4084_v60, %v3305_v0 }
 0x1b1   : > { %v3827_v7 = vpack.c.bf16 %v3313_v6, %v3312_v3 }
 0x1b2   : > { %3836 = vst [vmem:[%s4965_s19 + $0x18] sm:$0xff] %v3832_v4  }
 0x1b3   : > { %3835 = vst [vmem:[%s4965_s19 + $0x10] sm:$0xff] %v3827_v7  }
 0x1b4 PF: > { %s12_s13 = sadd.s32 1, %s4326_s13   ;;  %s4991_s9 = smov %s4314_s10 }
 0x1b5   : > { %p9_p10 = scmp.ge.s32.totalorder %s12_s13, 4   ;;  %s4992_s10 = smov %s4378_s17 }
 0x1b6   : > { %s4993_s11 = smov %s4322_s12  ;;  %s4994_s12 = smov %s4996_s14 }
 0x1b7   :  { %11 = sbr.rel (!%p9_p10) target bundleno = 3 (0x3), region = 127 }

</bundles_post_ra>
